<compile_context>
chip_gen: v7x
topology: tpu7x:2x2x1
jax: 0.10.0
libtpu: 0.0.40
codegen_flags: <defaults>
</compile_context>

<pallas_src>
import functools

import jax
import jax.numpy as jnp
import numpy as np
from jax.experimental import pallas as pl
from jax.experimental.pallas import tpu as pltpu

# ----------------------------- configuration -------------------------------
DIM = 32          # query_dim / n_embd
N_HEADS = 4
D_HEAD = 8        # inner_dim = N_HEADS * D_HEAD = 32
CONTEXT_DIM = 16
SEQ = 16          # query sequence length
CTX_SEQ = 8       # context sequence length
BATCH = 2
FF_INNER = DIM * 4
LN_EPS = 1e-5


# ------------------------------ fused Pallas kernel -------------------------
def block_kernel(x_ref, t_ref, ctx_ref,
                 adaln_w, adaln_b,
                 attn_q, attn1_kv, attn2_kv, attn_o, bias_d,
                 ff_w1, ff_b1, ff_w2,
                 o_ref, *, heads, bblk):
    f32 = jnp.float32

    def modulation(t, i):
        # "(1 + scale)" already folded into adaln_b[2*i] on the host.
        sc = jnp.dot(t, adaln_w[2 * i], preferred_element_type=f32) + adaln_b[2 * i]
        sh = jnp.dot(t, adaln_w[2 * i + 1], preferred_element_type=f32) + adaln_b[2 * i + 1]
        return sc, sh

    def ada_ln(y, sc, sh):
        mean = jnp.mean(y, axis=-1, keepdims=True)
        var = jnp.mean((y - mean) ** 2, axis=-1, keepdims=True)
        return (y - mean) * jax.lax.rsqrt(var + LN_EPS) * sc + sh

    def attention(q_in, kv_in, ai, kv_ref):
        # Per-head weights are leading-axis slices of packed refs (free);
        # attention scale is pre-folded into attn_q.
        acc = jnp.zeros((q_in.shape[0], DIM), f32)
        for hh in range(heads):                                   # static unroll
            qh = jnp.dot(q_in, attn_q[ai * heads + hh],
                         preferred_element_type=f32)              # (N, dh)
            kh = jnp.dot(kv_in, kv_ref[hh],
                         preferred_element_type=f32)              # (M, dh)
            vh = jnp.dot(kv_in, kv_ref[heads + hh],
                         preferred_element_type=f32)              # (M, dh)
            sim = jax.lax.dot_general(qh, kh, (((1,), (1,)), ((), ())),
                                      preferred_element_type=f32)  # (N, M)
            sim = sim - jnp.max(sim, axis=-1, keepdims=True)
            p = jnp.exp(sim)
            attn = p * pl.reciprocal(jnp.sum(p, axis=-1, keepdims=True),
                                     approx=True)
            oh = jnp.dot(attn, vh, preferred_element_type=f32)     # (N, dh)
            acc = acc + jnp.dot(oh, attn_o[ai * heads + hh],
                                preferred_element_type=f32)        # (N, D)
        return acc + bias_d[ai]

    inv_sqrt2 = 0.7071067811865476

    for b in range(bblk):                      # static unroll over batches in block
        x = x_ref[b].astype(f32)               # (N, D)
        t = t_ref[b].astype(f32)               # (1, D)
        ctx = ctx_ref[b].astype(f32)           # (M, Dc)

        # ---- x = attn1(norm1(x, t)) + x  (self-attention) -------------------
        sc, sh = modulation(t, 0)
        xn = ada_ln(x, sc, sh)
        x = x + attention(xn, xn, 0, attn1_kv)

        # ---- x = attn2(norm2(x, t), context) + x ----------------------------
        sc, sh = modulation(t, 1)
        xn = ada_ln(x, sc, sh)
        x = x + attention(xn, ctx, 1, attn2_kv)

        # ---- x = ff(norm3(x, t)) + x   (GEGLU feed-forward) ------------------
        sc, sh = modulation(t, 2)
        xn = ada_ln(x, sc, sh)
        px = jnp.dot(xn, ff_w1[0], preferred_element_type=f32) + ff_b1[0]
        pg = jnp.dot(xn, ff_w1[1], preferred_element_type=f32) + ff_b1[1]
        gelu_g = 0.5 * pg * (1.0 + jax.lax.erf(pg * inv_sqrt2))    # exact gelu
        x = x + jnp.dot(px * gelu_g, ff_w2[...], preferred_element_type=f32) + bias_d[2]

        o_ref[b] = x.astype(o_ref.dtype)


# ------------------------- one-time weight packing ---------------------------
def pack_params(p):
    """One-time host-side weight transform: pack ~30 tiny operands into 10
    stacked arrays (new leading axes only), fold attention scale into Wq and
    the AdaLN '+1' into the scale bias."""
    heads, dh = N_HEADS, D_HEAD
    scale = float(dh) ** -0.5

    def split_heads_in(w):   # (Din, heads*dh) -> (heads, Din, dh)
        return w.reshape(w.shape[0], heads, dh).transpose(1, 0, 2)

    def split_heads_out(w):  # (heads*dh, Dout) -> (heads, dh, Dout)
        return w.reshape(heads, dh, w.shape[1])

    pp = {
        # [n1_scale, n1_shift, n2_scale, n2_shift, n3_scale, n3_shift]
        "adaln_w": jnp.stack([p["n1_ws"], p["n1_wh"],
                              p["n2_ws"], p["n2_wh"],
                              p["n3_ws"], p["n3_wh"]]),
        "adaln_b": jnp.stack([p["n1_bs"] + 1.0, p["n1_bh"],
                              p["n2_bs"] + 1.0, p["n2_bh"],
                              p["n3_bs"] + 1.0, p["n3_bh"]]),
        # per-head Q weights, scale folded in; [attn1 heads..., attn2 heads...]
        "attn_q": jnp.concatenate([split_heads_in(p["a1_wq"] * scale),
                                   split_heads_in(p["a2_wq"] * scale)], axis=0),
        # [k heads..., v heads...]
        "attn1_kv": jnp.concatenate([split_heads_in(p["a1_wk"]),
                                     split_heads_in(p["a1_wv"])], axis=0),
        "attn2_kv": jnp.concatenate([split_heads_in(p["a2_wk"]),
                                     split_heads_in(p["a2_wv"])], axis=0),
        "attn_o": jnp.concatenate([split_heads_out(p["a1_wo"]),
                                   split_heads_out(p["a2_wo"])], axis=0),
        "bias_d": jnp.stack([p["a1_bo"], p["a2_bo"], p["ff_b2"]]),   # (3,1,D)
        "ff_w1": jnp.stack([p["ff_w1x"], p["ff_w1g"]]),              # (2,D,FFI)
        "ff_b1": jnp.stack([p["ff_b1x"], p["ff_b1g"]]),              # (2,1,FFI)
        "ff_w2": p["ff_w2"],                                         # (FFI,D)
    }
    return jax.tree_util.tree_map(lambda a: jnp.asarray(a, jnp.float32), pp)


# ------------------------------ wrapper --------------------------------------
def _two_tensorcores():
    """True on chips with 2 TensorCores per chip (v7x)."""
    try:
        kind = jax.devices()[0].device_kind.lower()
        return ("v7" in kind) or ("7x" in kind)
    except Exception:
        return False


def basic_transformer_block(x, t, context, pp):
    """Fused Pallas forward of BasicTransformerBlock (ls*/drop_path* identity)."""
    B, N, D = x.shape
    M, Dc = context.shape[1], context.shape[2]

    # v7x: 1 batch per grid step -> each TensorCore takes one batch.
    # v5e/v6e (single TC): fold the whole batch into one grid step.
    bblk = 1 if _two_tensorcores() else B
    nb = B // bblk

    kernel = functools.partial(block_kernel, heads=N_HEADS, bblk=bblk)

    def rep(shape):  # replicated (weight) block: same full block every step
        nd = len(shape)
        return pl.BlockSpec(shape, lambda i, _nd=nd: (0,) * _nd)

    in_specs = [
        pl.BlockSpec((bblk, N, D), lambda i: (i, 0, 0)),     # x
        pl.BlockSpec((bblk, 1, D), lambda i: (i, 0, 0)),     # t
        pl.BlockSpec((bblk, M, Dc), lambda i: (i, 0, 0)),    # context
        rep(pp["adaln_w"].shape), rep(pp["adaln_b"].shape),
        rep(pp["attn_q"].shape),
        rep(pp["attn1_kv"].shape), rep(pp["attn2_kv"].shape),
        rep(pp["attn_o"].shape), rep(pp["bias_d"].shape),
        rep(pp["ff_w1"].shape), rep(pp["ff_b1"].shape), rep(pp["ff_w2"].shape),
    ]

    return pl.pallas_call(
        kernel,
        out_shape=jax.ShapeDtypeStruct((B, N, D), x.dtype),
        grid=(nb,),
        in_specs=in_specs,
        out_specs=pl.BlockSpec((bblk, N, D), lambda i: (i, 0, 0)),
        input_output_aliases={0: 0},     # residual stream overwrites x in HBM
        compiler_params=pltpu.CompilerParams(dimension_semantics=("parallel",)),
    )(x, t, context,
      pp["adaln_w"], pp["adaln_b"], pp["attn_q"], pp["attn1_kv"],
      pp["attn2_kv"], pp["attn_o"], pp["bias_d"],
      pp["ff_w1"], pp["ff_b1"], pp["ff_w2"])


# ------------------------------ pure-JAX reference ---------------------------
def _ref_ada_ln(x, t, ws, bs, wh, bh):
    scale = t @ ws + bs
    shift = t @ wh + bh
    mean = x.mean(-1, keepdims=True)
    var = ((x - mean) ** 2).mean(-1, keepdims=True)
    xn = (x - mean) / jnp.sqrt(var + LN_EPS)
    return xn * (1.0 + scale) + shift


def _ref_attn(x, ctx, wq, wk, wv, wo, bo, heads, d_head):
    B, N, _ = x.shape
    q, k, v = x @ wq, ctx @ wk, ctx @ wv

    def split(a):
        b, n, _ = a.shape
        return a.reshape(b, n, heads, d_head).transpose(0, 2, 1, 3)

    q, k, v = split(q), split(k), split(v)
    sim = jnp.einsum("bhid,bhjd->bhij", q, k) * (d_head ** -0.5)
    attn = jax.nn.softmax(sim, axis=-1)
    out = jnp.einsum("bhij,bhjd->bhid", attn, v)
    out = out.transpose(0, 2, 1, 3).reshape(B, N, heads * d_head)
    return out @ wo + bo


def _ref_ff(x, w1x, b1x, w1g, b1g, w2, b2):
    xp = x @ w1x + b1x
    gate = x @ w1g + b1g
    return (xp * jax.nn.gelu(gate, approximate=False)) @ w2 + b2


def _ref_block(x, t, context, p):
    xn = _ref_ada_ln(x, t, p["n1_ws"], p["n1_bs"], p["n1_wh"], p["n1_bh"])
    x = _ref_attn(xn, xn, p["a1_wq"], p["a1_wk"], p["a1_wv"], p["a1_wo"],
                  p["a1_bo"], N_HEADS, D_HEAD) + x
    xn = _ref_ada_ln(x, t, p["n2_ws"], p["n2_bs"], p["n2_wh"], p["n2_bh"])
    x = _ref_attn(xn, context, p["a2_wq"], p["a2_wk"], p["a2_wv"], p["a2_wo"],
                  p["a2_bo"], N_HEADS, D_HEAD) + x
    xn = _ref_ada_ln(x, t, p["n3_ws"], p["n3_bs"], p["n3_wh"], p["n3_bh"])
    x = _ref_ff(xn, p["ff_w1x"], p["ff_b1x"], p["ff_w1g"], p["ff_b1g"],
                p["ff_w2"], p["ff_b2"]) + x
    return x


# ------------------------------ parameter init -------------------------------
def make_params(key):
    inner = N_HEADS * D_HEAD
    keys = iter(jax.random.split(key, 32))

    def lin(fan_in, fan_out):
        return (jax.random.normal(next(keys), (fan_in, fan_out), jnp.float32)
                / np.sqrt(fan_in)).astype(jnp.float32)

    def bias(n):
        return 0.01 * jax.random.normal(next(keys), (1, n), jnp.float32)

    p = {}
    # AdaLayerNorm linears, pre-split into scale / shift halves.
    for name in ("n1", "n2", "n3"):
        p[f"{name}_ws"] = lin(DIM, DIM)
        p[f"{name}_bs"] = bias(DIM)
        p[f"{name}_wh"] = lin(DIM, DIM)
        p[f"{name}_bh"] = bias(DIM)
    # attn1 (self-attention)
    p["a1_wq"] = lin(DIM, inner)
    p["a1_wk"] = lin(DIM, inner)
    p["a1_wv"] = lin(DIM, inner)
    p["a1_wo"] = lin(inner, DIM)
    p["a1_bo"] = bias(DIM)
    # attn2 (cross-attention)
    p["a2_wq"] = lin(DIM, inner)
    p["a2_wk"] = lin(CONTEXT_DIM, inner)
    p["a2_wv"] = lin(CONTEXT_DIM, inner)
    p["a2_wo"] = lin(inner, DIM)
    p["a2_bo"] = bias(DIM)
    # GEGLU feed-forward, w1 pre-split into value / gate halves.
    p["ff_w1x"] = lin(DIM, FF_INNER)
    p["ff_b1x"] = bias(FF_INNER)
    p["ff_w1g"] = lin(DIM, FF_INNER)
    p["ff_b1g"] = bias(FF_INNER)
    p["ff_w2"] = lin(FF_INNER, DIM)
    p["ff_b2"] = bias(DIM)
    return p


# ---------------------------------- main --------------------------------------
if __name__ == "__main__":
    key = jax.random.PRNGKey(0)
    kx, kt, kc, kp = jax.random.split(key, 4)

    x = jax.random.normal(kx, (BATCH, SEQ, DIM), jnp.float32)
    t = jax.random.normal(kt, (BATCH, 1, DIM), jnp.float32)        # timestep embedding
    context = jax.random.normal(kc, (BATCH, CTX_SEQ, CONTEXT_DIM), jnp.float32)

    params = make_params(kp)

    with jax.default_matmul_precision("float32"):
        ref = _ref_block(x, t, context, params)

    packed = pack_params(params)           # one-time host-side weight transform
    fwd = jax.jit(basic_transformer_block)
    out = fwd(x, t, context, packed)
    out = jax.block_until_ready(out)

    np.testing.assert_allclose(np.asarray(out), np.asarray(ref), rtol=1e-2, atol=1e-2)

    print("KERNEL_OK")
</pallas_src>

<mosaic_0001>
module attributes {stable_mosaic.version = 11 : i64} {
  func.func @block_kernel(%arg0: i32, %arg1: memref<2x16x32xf32, #tpu.memory_space<vmem>>, %arg2: memref<2x1x32xf32, #tpu.memory_space<vmem>>, %arg3: memref<2x8x16xf32, #tpu.memory_space<vmem>>, %arg4: memref<6x32x32xf32, #tpu.memory_space<vmem>>, %arg5: memref<6x1x32xf32, #tpu.memory_space<vmem>>, %arg6: memref<8x32x8xf32, #tpu.memory_space<vmem>>, %arg7: memref<8x32x8xf32, #tpu.memory_space<vmem>>, %arg8: memref<8x16x8xf32, #tpu.memory_space<vmem>>, %arg9: memref<8x8x32xf32, #tpu.memory_space<vmem>>, %arg10: memref<3x1x32xf32, #tpu.memory_space<vmem>>, %arg11: memref<2x32x128xf32, #tpu.memory_space<vmem>>, %arg12: memref<2x1x128xf32, #tpu.memory_space<vmem>>, %arg13: memref<128x32xf32, #tpu.memory_space<vmem>>, %arg14: memref<2x16x32xf32, #tpu.memory_space<vmem>>) attributes {dimension_semantics = [#tpu.dimension_semantics<parallel>], iteration_bounds = array<i64: 1>, scalar_prefetch = 0 : i64, scratch_operands = 0 : i64, tpu.core_type = #tpu.core_type<tc>, window_params = [{transform_indices = @transform_0, window_bounds = array<i64: 2, 16, 32>}, {transform_indices = @transform_1, window_bounds = array<i64: 2, 1, 32>}, {transform_indices = @transform_2, window_bounds = array<i64: 2, 8, 16>}, {pipeline_mode = #tpu.pipeline_mode<synchronous>, transform_indices = @transform_3, window_bounds = array<i64: 6, 32, 32>}, {pipeline_mode = #tpu.pipeline_mode<synchronous>, transform_indices = @transform_4, window_bounds = array<i64: 6, 1, 32>}, {pipeline_mode = #tpu.pipeline_mode<synchronous>, transform_indices = @transform_5, window_bounds = array<i64: 8, 32, 8>}, {pipeline_mode = #tpu.pipeline_mode<synchronous>, transform_indices = @transform_6, window_bounds = array<i64: 8, 32, 8>}, {pipeline_mode = #tpu.pipeline_mode<synchronous>, transform_indices = @transform_7, window_bounds = array<i64: 8, 16, 8>}, {pipeline_mode = #tpu.pipeline_mode<synchronous>, transform_indices = @transform_8, window_bounds = array<i64: 8, 8, 32>}, {pipeline_mode = #tpu.pipeline_mode<synchronous>, transform_indices = @transform_9, window_bounds = array<i64: 3, 1, 32>}, {pipeline_mode = #tpu.pipeline_mode<synchronous>, transform_indices = @transform_10, window_bounds = array<i64: 2, 32, 128>}, {pipeline_mode = #tpu.pipeline_mode<synchronous>, transform_indices = @transform_11, window_bounds = array<i64: 2, 1, 128>}, {pipeline_mode = #tpu.pipeline_mode<synchronous>, transform_indices = @transform_12, window_bounds = array<i64: 128, 32>}, {transform_indices = @transform_13, window_bounds = array<i64: 2, 16, 32>}]} {
    %c0 = arith.constant 0 : index
    %c0_0 = arith.constant 0 : index
    %c0_1 = arith.constant 0 : index
    %0 = vector.load %arg1[%c0, %c0_0, %c0_1] : memref<2x16x32xf32, #tpu.memory_space<vmem>>, vector<1x16x32xf32>
    %1 = vector.shape_cast %0 : vector<1x16x32xf32> to vector<16x32xf32>
    %c0_2 = arith.constant 0 : index
    %c0_3 = arith.constant 0 : index
    %c0_4 = arith.constant 0 : index
    %2 = vector.load %arg2[%c0_2, %c0_3, %c0_4] : memref<2x1x32xf32, #tpu.memory_space<vmem>>, vector<1x1x32xf32>
    %3 = vector.shape_cast %2 : vector<1x1x32xf32> to vector<1x32xf32>
    %c0_5 = arith.constant 0 : index
    %c0_6 = arith.constant 0 : index
    %c0_7 = arith.constant 0 : index
    %4 = vector.load %arg3[%c0_5, %c0_6, %c0_7] : memref<2x8x16xf32, #tpu.memory_space<vmem>>, vector<1x8x16xf32>
    %5 = vector.shape_cast %4 : vector<1x8x16xf32> to vector<8x16xf32>
    %c0_8 = arith.constant 0 : index
    %c0_9 = arith.constant 0 : index
    %c0_10 = arith.constant 0 : index
    %6 = vector.load %arg4[%c0_8, %c0_9, %c0_10] : memref<6x32x32xf32, #tpu.memory_space<vmem>>, vector<1x32x32xf32>
    %7 = vector.shape_cast %6 : vector<1x32x32xf32> to vector<32x32xf32>
    %cst = arith.constant dense<0.000000e+00> : vector<1x32xf32>
    %8 = tpu.matmul %3, %7, %cst {dimension_numbers = #tpu.dot_dimension_numbers<[1], [0], [0], [1], [0, 0, 1, 1], [], []>} : vector<1x32xf32>, vector<32x32xf32>, vector<1x32xf32> -> vector<1x32xf32>
    %c0_11 = arith.constant 0 : index
    %c0_12 = arith.constant 0 : index
    %c0_13 = arith.constant 0 : index
    %9 = vector.load %arg5[%c0_11, %c0_12, %c0_13] : memref<6x1x32xf32, #tpu.memory_space<vmem>>, vector<1x1x32xf32>
    %10 = vector.shape_cast %9 : vector<1x1x32xf32> to vector<1x32xf32>
    %11 = arith.addf %8, %10 : vector<1x32xf32>
    %c1 = arith.constant 1 : index
    %c0_14 = arith.constant 0 : index
    %c0_15 = arith.constant 0 : index
    %12 = vector.load %arg4[%c1, %c0_14, %c0_15] : memref<6x32x32xf32, #tpu.memory_space<vmem>>, vector<1x32x32xf32>
    %13 = vector.shape_cast %12 : vector<1x32x32xf32> to vector<32x32xf32>
    %cst_16 = arith.constant dense<0.000000e+00> : vector<1x32xf32>
    %14 = tpu.matmul %3, %13, %cst_16 {dimension_numbers = #tpu.dot_dimension_numbers<[1], [0], [0], [1], [0, 0, 1, 1], [], []>} : vector<1x32xf32>, vector<32x32xf32>, vector<1x32xf32> -> vector<1x32xf32>
    %c1_17 = arith.constant 1 : index
    %c0_18 = arith.constant 0 : index
    %c0_19 = arith.constant 0 : index
    %15 = vector.load %arg5[%c1_17, %c0_18, %c0_19] : memref<6x1x32xf32, #tpu.memory_space<vmem>>, vector<1x1x32xf32>
    %16 = vector.shape_cast %15 : vector<1x1x32xf32> to vector<1x32xf32>
    %17 = arith.addf %14, %16 : vector<1x32xf32>
    %cst_20 = arith.constant dense<0.000000e+00> : vector<16xf32>
    %18 = vector.multi_reduction <add>, %1, %cst_20 [1] : vector<16x32xf32> to vector<16xf32>
    %19 = vector.shape_cast %18 : vector<16xf32> to vector<16x1xf32>
    %cst_21 = arith.constant 3.200000e+01 : f32
    %20 = vector.broadcast %cst_21 : f32 to vector<16x1xf32>
    %21 = arith.divf %19, %20 : vector<16x1xf32>
    %22 = vector.broadcast %21 : vector<16x1xf32> to vector<16x32xf32>
    %23 = arith.subf %1, %22 : vector<16x32xf32>
    %24 = arith.mulf %23, %23 : vector<16x32xf32>
    %cst_22 = arith.constant dense<0.000000e+00> : vector<16xf32>
    %25 = vector.multi_reduction <add>, %24, %cst_22 [1] : vector<16x32xf32> to vector<16xf32>
    %26 = vector.shape_cast %25 : vector<16xf32> to vector<16x1xf32>
    %cst_23 = arith.constant 3.200000e+01 : f32
    %27 = vector.broadcast %cst_23 : f32 to vector<16x1xf32>
    %28 = arith.divf %26, %27 : vector<16x1xf32>
    %29 = vector.broadcast %21 : vector<16x1xf32> to vector<16x32xf32>
    %30 = arith.subf %1, %29 : vector<16x32xf32>
    %cst_24 = arith.constant 9.99999974E-6 : f32
    %31 = vector.broadcast %cst_24 : f32 to vector<16x1xf32>
    %32 = arith.addf %28, %31 : vector<16x1xf32>
    %33 = math.rsqrt %32 : vector<16x1xf32>
    %34 = vector.broadcast %33 : vector<16x1xf32> to vector<16x32xf32>
    %35 = arith.mulf %30, %34 : vector<16x32xf32>
    %36 = vector.broadcast %11 : vector<1x32xf32> to vector<16x32xf32>
    %37 = arith.mulf %35, %36 : vector<16x32xf32>
    %38 = vector.broadcast %17 : vector<1x32xf32> to vector<16x32xf32>
    %39 = arith.addf %37, %38 : vector<16x32xf32>
    %cst_25 = arith.constant 0.000000e+00 : f32
    %40 = vector.broadcast %cst_25 : f32 to vector<16x32xf32>
    %c0_26 = arith.constant 0 : index
    %c0_27 = arith.constant 0 : index
    %c0_28 = arith.constant 0 : index
    %41 = vector.load %arg6[%c0_26, %c0_27, %c0_28] : memref<8x32x8xf32, #tpu.memory_space<vmem>>, vector<1x32x8xf32>
    %42 = vector.shape_cast %41 : vector<1x32x8xf32> to vector<32x8xf32>
    %cst_29 = arith.constant dense<0.000000e+00> : vector<16x8xf32>
    %43 = tpu.matmul %39, %42, %cst_29 {dimension_numbers = #tpu.dot_dimension_numbers<[1], [0], [0], [1], [0, 0, 1, 1], [], []>} : vector<16x32xf32>, vector<32x8xf32>, vector<16x8xf32> -> vector<16x8xf32>
    %c0_30 = arith.constant 0 : index
    %c0_31 = arith.constant 0 : index
    %c0_32 = arith.constant 0 : index
    %44 = vector.load %arg7[%c0_30, %c0_31, %c0_32] : memref<8x32x8xf32, #tpu.memory_space<vmem>>, vector<1x32x8xf32>
    %45 = vector.shape_cast %44 : vector<1x32x8xf32> to vector<32x8xf32>
    %cst_33 = arith.constant dense<0.000000e+00> : vector<16x8xf32>
    %46 = tpu.matmul %39, %45, %cst_33 {dimension_numbers = #tpu.dot_dimension_numbers<[1], [0], [0], [1], [0, 0, 1, 1], [], []>} : vector<16x32xf32>, vector<32x8xf32>, vector<16x8xf32> -> vector<16x8xf32>
    %c4 = arith.constant 4 : index
    %c0_34 = arith.constant 0 : index
    %c0_35 = arith.constant 0 : index
    %47 = vector.load %arg7[%c4, %c0_34, %c0_35] : memref<8x32x8xf32, #tpu.memory_space<vmem>>, vector<1x32x8xf32>
    %48 = vector.shape_cast %47 : vector<1x32x8xf32> to vector<32x8xf32>
    %cst_36 = arith.constant dense<0.000000e+00> : vector<16x8xf32>
    %49 = tpu.matmul %39, %48, %cst_36 {dimension_numbers = #tpu.dot_dimension_numbers<[1], [0], [0], [1], [0, 0, 1, 1], [], []>} : vector<16x32xf32>, vector<32x8xf32>, vector<16x8xf32> -> vector<16x8xf32>
    %cst_37 = arith.constant dense<0.000000e+00> : vector<16x16xf32>
    %50 = tpu.matmul %43, %46, %cst_37 {dimension_numbers = #tpu.dot_dimension_numbers<[1], [1], [0], [0], [0, 0, 1, 0], [], []>} : vector<16x8xf32>, vector<16x8xf32>, vector<16x16xf32> -> vector<16x16xf32>
    %cst_38 = arith.constant dense<0xFF800000> : vector<16xf32>
    %51 = vector.multi_reduction <maximumf>, %50, %cst_38 [1] : vector<16x16xf32> to vector<16xf32>
    %52 = vector.shape_cast %51 : vector<16xf32> to vector<16x1xf32>
    %53 = vector.broadcast %52 : vector<16x1xf32> to vector<16x16xf32>
    %54 = arith.subf %50, %53 : vector<16x16xf32>
    %55 = math.exp %54 : vector<16x16xf32>
    %cst_39 = arith.constant dense<0.000000e+00> : vector<16xf32>
    %56 = vector.multi_reduction <add>, %55, %cst_39 [1] : vector<16x16xf32> to vector<16xf32>
    %57 = vector.shape_cast %56 : vector<16xf32> to vector<16x1xf32>
    %58 = tpu.reciprocal %57 {approx = true} : vector<16x1xf32> -> vector<16x1xf32>
    %59 = vector.broadcast %58 : vector<16x1xf32> to vector<16x16xf32>
    %60 = arith.mulf %55, %59 : vector<16x16xf32>
    %cst_40 = arith.constant dense<0.000000e+00> : vector<16x8xf32>
    %61 = tpu.matmul %60, %49, %cst_40 {dimension_numbers = #tpu.dot_dimension_numbers<[1], [0], [0], [1], [0, 0, 1, 1], [], []>} : vector<16x16xf32>, vector<16x8xf32>, vector<16x8xf32> -> vector<16x8xf32>
    %c0_41 = arith.constant 0 : index
    %c0_42 = arith.constant 0 : index
    %c0_43 = arith.constant 0 : index
    %62 = vector.load %arg9[%c0_41, %c0_42, %c0_43] : memref<8x8x32xf32, #tpu.memory_space<vmem>>, vector<1x8x32xf32>
    %63 = vector.shape_cast %62 : vector<1x8x32xf32> to vector<8x32xf32>
    %cst_44 = arith.constant dense<0.000000e+00> : vector<16x32xf32>
    %64 = tpu.matmul %61, %63, %cst_44 {dimension_numbers = #tpu.dot_dimension_numbers<[1], [0], [0], [1], [0, 0, 1, 1], [], []>} : vector<16x8xf32>, vector<8x32xf32>, vector<16x32xf32> -> vector<16x32xf32>
    %65 = arith.addf %40, %64 : vector<16x32xf32>
    %c1_45 = arith.constant 1 : index
    %c0_46 = arith.constant 0 : index
    %c0_47 = arith.constant 0 : index
    %66 = vector.load %arg6[%c1_45, %c0_46, %c0_47] : memref<8x32x8xf32, #tpu.memory_space<vmem>>, vector<1x32x8xf32>
    %67 = vector.shape_cast %66 : vector<1x32x8xf32> to vector<32x8xf32>
    %cst_48 = arith.constant dense<0.000000e+00> : vector<16x8xf32>
    %68 = tpu.matmul %39, %67, %cst_48 {dimension_numbers = #tpu.dot_dimension_numbers<[1], [0], [0], [1], [0, 0, 1, 1], [], []>} : vector<16x32xf32>, vector<32x8xf32>, vector<16x8xf32> -> vector<16x8xf32>
    %c1_49 = arith.constant 1 : index
    %c0_50 = arith.constant 0 : index
    %c0_51 = arith.constant 0 : index
    %69 = vector.load %arg7[%c1_49, %c0_50, %c0_51] : memref<8x32x8xf32, #tpu.memory_space<vmem>>, vector<1x32x8xf32>
    %70 = vector.shape_cast %69 : vector<1x32x8xf32> to vector<32x8xf32>
    %cst_52 = arith.constant dense<0.000000e+00> : vector<16x8xf32>
    %71 = tpu.matmul %39, %70, %cst_52 {dimension_numbers = #tpu.dot_dimension_numbers<[1], [0], [0], [1], [0, 0, 1, 1], [], []>} : vector<16x32xf32>, vector<32x8xf32>, vector<16x8xf32> -> vector<16x8xf32>
    %c5 = arith.constant 5 : index
    %c0_53 = arith.constant 0 : index
    %c0_54 = arith.constant 0 : index
    %72 = vector.load %arg7[%c5, %c0_53, %c0_54] : memref<8x32x8xf32, #tpu.memory_space<vmem>>, vector<1x32x8xf32>
    %73 = vector.shape_cast %72 : vector<1x32x8xf32> to vector<32x8xf32>
    %cst_55 = arith.constant dense<0.000000e+00> : vector<16x8xf32>
    %74 = tpu.matmul %39, %73, %cst_55 {dimension_numbers = #tpu.dot_dimension_numbers<[1], [0], [0], [1], [0, 0, 1, 1], [], []>} : vector<16x32xf32>, vector<32x8xf32>, vector<16x8xf32> -> vector<16x8xf32>
    %cst_56 = arith.constant dense<0.000000e+00> : vector<16x16xf32>
    %75 = tpu.matmul %68, %71, %cst_56 {dimension_numbers = #tpu.dot_dimension_numbers<[1], [1], [0], [0], [0, 0, 1, 0], [], []>} : vector<16x8xf32>, vector<16x8xf32>, vector<16x16xf32> -> vector<16x16xf32>
    %cst_57 = arith.constant dense<0xFF800000> : vector<16xf32>
    %76 = vector.multi_reduction <maximumf>, %75, %cst_57 [1] : vector<16x16xf32> to vector<16xf32>
    %77 = vector.shape_cast %76 : vector<16xf32> to vector<16x1xf32>
    %78 = vector.broadcast %77 : vector<16x1xf32> to vector<16x16xf32>
    %79 = arith.subf %75, %78 : vector<16x16xf32>
    %80 = math.exp %79 : vector<16x16xf32>
    %cst_58 = arith.constant dense<0.000000e+00> : vector<16xf32>
    %81 = vector.multi_reduction <add>, %80, %cst_58 [1] : vector<16x16xf32> to vector<16xf32>
    %82 = vector.shape_cast %81 : vector<16xf32> to vector<16x1xf32>
    %83 = tpu.reciprocal %82 {approx = true} : vector<16x1xf32> -> vector<16x1xf32>
    %84 = vector.broadcast %83 : vector<16x1xf32> to vector<16x16xf32>
    %85 = arith.mulf %80, %84 : vector<16x16xf32>
    %cst_59 = arith.constant dense<0.000000e+00> : vector<16x8xf32>
    %86 = tpu.matmul %85, %74, %cst_59 {dimension_numbers = #tpu.dot_dimension_numbers<[1], [0], [0], [1], [0, 0, 1, 1], [], []>} : vector<16x16xf32>, vector<16x8xf32>, vector<16x8xf32> -> vector<16x8xf32>
    %c1_60 = arith.constant 1 : index
    %c0_61 = arith.constant 0 : index
    %c0_62 = arith.constant 0 : index
    %87 = vector.load %arg9[%c1_60, %c0_61, %c0_62] : memref<8x8x32xf32, #tpu.memory_space<vmem>>, vector<1x8x32xf32>
    %88 = vector.shape_cast %87 : vector<1x8x32xf32> to vector<8x32xf32>
    %cst_63 = arith.constant dense<0.000000e+00> : vector<16x32xf32>
    %89 = tpu.matmul %86, %88, %cst_63 {dimension_numbers = #tpu.dot_dimension_numbers<[1], [0], [0], [1], [0, 0, 1, 1], [], []>} : vector<16x8xf32>, vector<8x32xf32>, vector<16x32xf32> -> vector<16x32xf32>
    %90 = arith.addf %65, %89 : vector<16x32xf32>
    %c2 = arith.constant 2 : index
    %c0_64 = arith.constant 0 : index
    %c0_65 = arith.constant 0 : index
    %91 = vector.load %arg6[%c2, %c0_64, %c0_65] : memref<8x32x8xf32, #tpu.memory_space<vmem>>, vector<1x32x8xf32>
    %92 = vector.shape_cast %91 : vector<1x32x8xf32> to vector<32x8xf32>
    %cst_66 = arith.constant dense<0.000000e+00> : vector<16x8xf32>
    %93 = tpu.matmul %39, %92, %cst_66 {dimension_numbers = #tpu.dot_dimension_numbers<[1], [0], [0], [1], [0, 0, 1, 1], [], []>} : vector<16x32xf32>, vector<32x8xf32>, vector<16x8xf32> -> vector<16x8xf32>
    %c2_67 = arith.constant 2 : index
    %c0_68 = arith.constant 0 : index
    %c0_69 = arith.constant 0 : index
    %94 = vector.load %arg7[%c2_67, %c0_68, %c0_69] : memref<8x32x8xf32, #tpu.memory_space<vmem>>, vector<1x32x8xf32>
    %95 = vector.shape_cast %94 : vector<1x32x8xf32> to vector<32x8xf32>
    %cst_70 = arith.constant dense<0.000000e+00> : vector<16x8xf32>
    %96 = tpu.matmul %39, %95, %cst_70 {dimension_numbers = #tpu.dot_dimension_numbers<[1], [0], [0], [1], [0, 0, 1, 1], [], []>} : vector<16x32xf32>, vector<32x8xf32>, vector<16x8xf32> -> vector<16x8xf32>
    %c6 = arith.constant 6 : index
    %c0_71 = arith.constant 0 : index
    %c0_72 = arith.constant 0 : index
    %97 = vector.load %arg7[%c6, %c0_71, %c0_72] : memref<8x32x8xf32, #tpu.memory_space<vmem>>, vector<1x32x8xf32>
    %98 = vector.shape_cast %97 : vector<1x32x8xf32> to vector<32x8xf32>
    %cst_73 = arith.constant dense<0.000000e+00> : vector<16x8xf32>
    %99 = tpu.matmul %39, %98, %cst_73 {dimension_numbers = #tpu.dot_dimension_numbers<[1], [0], [0], [1], [0, 0, 1, 1], [], []>} : vector<16x32xf32>, vector<32x8xf32>, vector<16x8xf32> -> vector<16x8xf32>
    %cst_74 = arith.constant dense<0.000000e+00> : vector<16x16xf32>
    %100 = tpu.matmul %93, %96, %cst_74 {dimension_numbers = #tpu.dot_dimension_numbers<[1], [1], [0], [0], [0, 0, 1, 0], [], []>} : vector<16x8xf32>, vector<16x8xf32>, vector<16x16xf32> -> vector<16x16xf32>
    %cst_75 = arith.constant dense<0xFF800000> : vector<16xf32>
    %101 = vector.multi_reduction <maximumf>, %100, %cst_75 [1] : vector<16x16xf32> to vector<16xf32>
    %102 = vector.shape_cast %101 : vector<16xf32> to vector<16x1xf32>
    %103 = vector.broadcast %102 : vector<16x1xf32> to vector<16x16xf32>
    %104 = arith.subf %100, %103 : vector<16x16xf32>
    %105 = math.exp %104 : vector<16x16xf32>
    %cst_76 = arith.constant dense<0.000000e+00> : vector<16xf32>
    %106 = vector.multi_reduction <add>, %105, %cst_76 [1] : vector<16x16xf32> to vector<16xf32>
    %107 = vector.shape_cast %106 : vector<16xf32> to vector<16x1xf32>
    %108 = tpu.reciprocal %107 {approx = true} : vector<16x1xf32> -> vector<16x1xf32>
    %109 = vector.broadcast %108 : vector<16x1xf32> to vector<16x16xf32>
    %110 = arith.mulf %105, %109 : vector<16x16xf32>
    %cst_77 = arith.constant dense<0.000000e+00> : vector<16x8xf32>
    %111 = tpu.matmul %110, %99, %cst_77 {dimension_numbers = #tpu.dot_dimension_numbers<[1], [0], [0], [1], [0, 0, 1, 1], [], []>} : vector<16x16xf32>, vector<16x8xf32>, vector<16x8xf32> -> vector<16x8xf32>
    %c2_78 = arith.constant 2 : index
    %c0_79 = arith.constant 0 : index
    %c0_80 = arith.constant 0 : index
    %112 = vector.load %arg9[%c2_78, %c0_79, %c0_80] : memref<8x8x32xf32, #tpu.memory_space<vmem>>, vector<1x8x32xf32>
    %113 = vector.shape_cast %112 : vector<1x8x32xf32> to vector<8x32xf32>
    %cst_81 = arith.constant dense<0.000000e+00> : vector<16x32xf32>
    %114 = tpu.matmul %111, %113, %cst_81 {dimension_numbers = #tpu.dot_dimension_numbers<[1], [0], [0], [1], [0, 0, 1, 1], [], []>} : vector<16x8xf32>, vector<8x32xf32>, vector<16x32xf32> -> vector<16x32xf32>
    %115 = arith.addf %90, %114 : vector<16x32xf32>
    %c3 = arith.constant 3 : index
    %c0_82 = arith.constant 0 : index
    %c0_83 = arith.constant 0 : index
    %116 = vector.load %arg6[%c3, %c0_82, %c0_83] : memref<8x32x8xf32, #tpu.memory_space<vmem>>, vector<1x32x8xf32>
    %117 = vector.shape_cast %116 : vector<1x32x8xf32> to vector<32x8xf32>
    %cst_84 = arith.constant dense<0.000000e+00> : vector<16x8xf32>
    %118 = tpu.matmul %39, %117, %cst_84 {dimension_numbers = #tpu.dot_dimension_numbers<[1], [0], [0], [1], [0, 0, 1, 1], [], []>} : vector<16x32xf32>, vector<32x8xf32>, vector<16x8xf32> -> vector<16x8xf32>
    %c3_85 = arith.constant 3 : index
    %c0_86 = arith.constant 0 : index
    %c0_87 = arith.constant 0 : index
    %119 = vector.load %arg7[%c3_85, %c0_86, %c0_87] : memref<8x32x8xf32, #tpu.memory_space<vmem>>, vector<1x32x8xf32>
    %120 = vector.shape_cast %119 : vector<1x32x8xf32> to vector<32x8xf32>
    %cst_88 = arith.constant dense<0.000000e+00> : vector<16x8xf32>
    %121 = tpu.matmul %39, %120, %cst_88 {dimension_numbers = #tpu.dot_dimension_numbers<[1], [0], [0], [1], [0, 0, 1, 1], [], []>} : vector<16x32xf32>, vector<32x8xf32>, vector<16x8xf32> -> vector<16x8xf32>
    %c7 = arith.constant 7 : index
    %c0_89 = arith.constant 0 : index
    %c0_90 = arith.constant 0 : index
    %122 = vector.load %arg7[%c7, %c0_89, %c0_90] : memref<8x32x8xf32, #tpu.memory_space<vmem>>, vector<1x32x8xf32>
    %123 = vector.shape_cast %122 : vector<1x32x8xf32> to vector<32x8xf32>
    %cst_91 = arith.constant dense<0.000000e+00> : vector<16x8xf32>
    %124 = tpu.matmul %39, %123, %cst_91 {dimension_numbers = #tpu.dot_dimension_numbers<[1], [0], [0], [1], [0, 0, 1, 1], [], []>} : vector<16x32xf32>, vector<32x8xf32>, vector<16x8xf32> -> vector<16x8xf32>
    %cst_92 = arith.constant dense<0.000000e+00> : vector<16x16xf32>
    %125 = tpu.matmul %118, %121, %cst_92 {dimension_numbers = #tpu.dot_dimension_numbers<[1], [1], [0], [0], [0, 0, 1, 0], [], []>} : vector<16x8xf32>, vector<16x8xf32>, vector<16x16xf32> -> vector<16x16xf32>
    %cst_93 = arith.constant dense<0xFF800000> : vector<16xf32>
    %126 = vector.multi_reduction <maximumf>, %125, %cst_93 [1] : vector<16x16xf32> to vector<16xf32>
    %127 = vector.shape_cast %126 : vector<16xf32> to vector<16x1xf32>
    %128 = vector.broadcast %127 : vector<16x1xf32> to vector<16x16xf32>
    %129 = arith.subf %125, %128 : vector<16x16xf32>
    %130 = math.exp %129 : vector<16x16xf32>
    %cst_94 = arith.constant dense<0.000000e+00> : vector<16xf32>
    %131 = vector.multi_reduction <add>, %130, %cst_94 [1] : vector<16x16xf32> to vector<16xf32>
    %132 = vector.shape_cast %131 : vector<16xf32> to vector<16x1xf32>
    %133 = tpu.reciprocal %132 {approx = true} : vector<16x1xf32> -> vector<16x1xf32>
    %134 = vector.broadcast %133 : vector<16x1xf32> to vector<16x16xf32>
    %135 = arith.mulf %130, %134 : vector<16x16xf32>
    %cst_95 = arith.constant dense<0.000000e+00> : vector<16x8xf32>
    %136 = tpu.matmul %135, %124, %cst_95 {dimension_numbers = #tpu.dot_dimension_numbers<[1], [0], [0], [1], [0, 0, 1, 1], [], []>} : vector<16x16xf32>, vector<16x8xf32>, vector<16x8xf32> -> vector<16x8xf32>
    %c3_96 = arith.constant 3 : index
    %c0_97 = arith.constant 0 : index
    %c0_98 = arith.constant 0 : index
    %137 = vector.load %arg9[%c3_96, %c0_97, %c0_98] : memref<8x8x32xf32, #tpu.memory_space<vmem>>, vector<1x8x32xf32>
    %138 = vector.shape_cast %137 : vector<1x8x32xf32> to vector<8x32xf32>
    %cst_99 = arith.constant dense<0.000000e+00> : vector<16x32xf32>
    %139 = tpu.matmul %136, %138, %cst_99 {dimension_numbers = #tpu.dot_dimension_numbers<[1], [0], [0], [1], [0, 0, 1, 1], [], []>} : vector<16x8xf32>, vector<8x32xf32>, vector<16x32xf32> -> vector<16x32xf32>
    %140 = arith.addf %115, %139 : vector<16x32xf32>
    %c0_100 = arith.constant 0 : index
    %c0_101 = arith.constant 0 : index
    %c0_102 = arith.constant 0 : index
    %141 = vector.load %arg10[%c0_100, %c0_101, %c0_102] : memref<3x1x32xf32, #tpu.memory_space<vmem>>, vector<1x1x32xf32>
    %142 = vector.shape_cast %141 : vector<1x1x32xf32> to vector<1x32xf32>
    %143 = vector.broadcast %142 : vector<1x32xf32> to vector<16x32xf32>
    %144 = arith.addf %140, %143 : vector<16x32xf32>
    %145 = arith.addf %1, %144 : vector<16x32xf32>
    %c2_103 = arith.constant 2 : index
    %c0_104 = arith.constant 0 : index
    %c0_105 = arith.constant 0 : index
    %146 = vector.load %arg4[%c2_103, %c0_104, %c0_105] : memref<6x32x32xf32, #tpu.memory_space<vmem>>, vector<1x32x32xf32>
    %147 = vector.shape_cast %146 : vector<1x32x32xf32> to vector<32x32xf32>
    %cst_106 = arith.constant dense<0.000000e+00> : vector<1x32xf32>
    %148 = tpu.matmul %3, %147, %cst_106 {dimension_numbers = #tpu.dot_dimension_numbers<[1], [0], [0], [1], [0, 0, 1, 1], [], []>} : vector<1x32xf32>, vector<32x32xf32>, vector<1x32xf32> -> vector<1x32xf32>
    %c2_107 = arith.constant 2 : index
    %c0_108 = arith.constant 0 : index
    %c0_109 = arith.constant 0 : index
    %149 = vector.load %arg5[%c2_107, %c0_108, %c0_109] : memref<6x1x32xf32, #tpu.memory_space<vmem>>, vector<1x1x32xf32>
    %150 = vector.shape_cast %149 : vector<1x1x32xf32> to vector<1x32xf32>
    %151 = arith.addf %148, %150 : vector<1x32xf32>
    %c3_110 = arith.constant 3 : index
    %c0_111 = arith.constant 0 : index
    %c0_112 = arith.constant 0 : index
    %152 = vector.load %arg4[%c3_110, %c0_111, %c0_112] : memref<6x32x32xf32, #tpu.memory_space<vmem>>, vector<1x32x32xf32>
    %153 = vector.shape_cast %152 : vector<1x32x32xf32> to vector<32x32xf32>
    %cst_113 = arith.constant dense<0.000000e+00> : vector<1x32xf32>
    %154 = tpu.matmul %3, %153, %cst_113 {dimension_numbers = #tpu.dot_dimension_numbers<[1], [0], [0], [1], [0, 0, 1, 1], [], []>} : vector<1x32xf32>, vector<32x32xf32>, vector<1x32xf32> -> vector<1x32xf32>
    %c3_114 = arith.constant 3 : index
    %c0_115 = arith.constant 0 : index
    %c0_116 = arith.constant 0 : index
    %155 = vector.load %arg5[%c3_114, %c0_115, %c0_116] : memref<6x1x32xf32, #tpu.memory_space<vmem>>, vector<1x1x32xf32>
    %156 = vector.shape_cast %155 : vector<1x1x32xf32> to vector<1x32xf32>
    %157 = arith.addf %154, %156 : vector<1x32xf32>
    %cst_117 = arith.constant dense<0.000000e+00> : vector<16xf32>
    %158 = vector.multi_reduction <add>, %145, %cst_117 [1] : vector<16x32xf32> to vector<16xf32>
    %159 = vector.shape_cast %158 : vector<16xf32> to vector<16x1xf32>
    %cst_118 = arith.constant 3.200000e+01 : f32
    %160 = vector.broadcast %cst_118 : f32 to vector<16x1xf32>
    %161 = arith.divf %159, %160 : vector<16x1xf32>
    %162 = vector.broadcast %161 : vector<16x1xf32> to vector<16x32xf32>
    %163 = arith.subf %145, %162 : vector<16x32xf32>
    %164 = arith.mulf %163, %163 : vector<16x32xf32>
    %cst_119 = arith.constant dense<0.000000e+00> : vector<16xf32>
    %165 = vector.multi_reduction <add>, %164, %cst_119 [1] : vector<16x32xf32> to vector<16xf32>
    %166 = vector.shape_cast %165 : vector<16xf32> to vector<16x1xf32>
    %cst_120 = arith.constant 3.200000e+01 : f32
    %167 = vector.broadcast %cst_120 : f32 to vector<16x1xf32>
    %168 = arith.divf %166, %167 : vector<16x1xf32>
    %169 = vector.broadcast %161 : vector<16x1xf32> to vector<16x32xf32>
    %170 = arith.subf %145, %169 : vector<16x32xf32>
    %cst_121 = arith.constant 9.99999974E-6 : f32
    %171 = vector.broadcast %cst_121 : f32 to vector<16x1xf32>
    %172 = arith.addf %168, %171 : vector<16x1xf32>
    %173 = math.rsqrt %172 : vector<16x1xf32>
    %174 = vector.broadcast %173 : vector<16x1xf32> to vector<16x32xf32>
    %175 = arith.mulf %170, %174 : vector<16x32xf32>
    %176 = vector.broadcast %151 : vector<1x32xf32> to vector<16x32xf32>
    %177 = arith.mulf %175, %176 : vector<16x32xf32>
    %178 = vector.broadcast %157 : vector<1x32xf32> to vector<16x32xf32>
    %179 = arith.addf %177, %178 : vector<16x32xf32>
    %cst_122 = arith.constant 0.000000e+00 : f32
    %180 = vector.broadcast %cst_122 : f32 to vector<16x32xf32>
    %c4_123 = arith.constant 4 : index
    %c0_124 = arith.constant 0 : index
    %c0_125 = arith.constant 0 : index
    %181 = vector.load %arg6[%c4_123, %c0_124, %c0_125] : memref<8x32x8xf32, #tpu.memory_space<vmem>>, vector<1x32x8xf32>
    %182 = vector.shape_cast %181 : vector<1x32x8xf32> to vector<32x8xf32>
    %cst_126 = arith.constant dense<0.000000e+00> : vector<16x8xf32>
    %183 = tpu.matmul %179, %182, %cst_126 {dimension_numbers = #tpu.dot_dimension_numbers<[1], [0], [0], [1], [0, 0, 1, 1], [], []>} : vector<16x32xf32>, vector<32x8xf32>, vector<16x8xf32> -> vector<16x8xf32>
    %c0_127 = arith.constant 0 : index
    %c0_128 = arith.constant 0 : index
    %c0_129 = arith.constant 0 : index
    %184 = vector.load %arg8[%c0_127, %c0_128, %c0_129] : memref<8x16x8xf32, #tpu.memory_space<vmem>>, vector<1x16x8xf32>
    %185 = vector.shape_cast %184 : vector<1x16x8xf32> to vector<16x8xf32>
    %cst_130 = arith.constant dense<0.000000e+00> : vector<8x8xf32>
    %186 = tpu.matmul %5, %185, %cst_130 {dimension_numbers = #tpu.dot_dimension_numbers<[1], [0], [0], [1], [0, 0, 1, 1], [], []>} : vector<8x16xf32>, vector<16x8xf32>, vector<8x8xf32> -> vector<8x8xf32>
    %c4_131 = arith.constant 4 : index
    %c0_132 = arith.constant 0 : index
    %c0_133 = arith.constant 0 : index
    %187 = vector.load %arg8[%c4_131, %c0_132, %c0_133] : memref<8x16x8xf32, #tpu.memory_space<vmem>>, vector<1x16x8xf32>
    %188 = vector.shape_cast %187 : vector<1x16x8xf32> to vector<16x8xf32>
    %cst_134 = arith.constant dense<0.000000e+00> : vector<8x8xf32>
    %189 = tpu.matmul %5, %188, %cst_134 {dimension_numbers = #tpu.dot_dimension_numbers<[1], [0], [0], [1], [0, 0, 1, 1], [], []>} : vector<8x16xf32>, vector<16x8xf32>, vector<8x8xf32> -> vector<8x8xf32>
    %cst_135 = arith.constant dense<0.000000e+00> : vector<16x8xf32>
    %190 = tpu.matmul %183, %186, %cst_135 {dimension_numbers = #tpu.dot_dimension_numbers<[1], [1], [0], [0], [0, 0, 1, 0], [], []>} : vector<16x8xf32>, vector<8x8xf32>, vector<16x8xf32> -> vector<16x8xf32>
    %cst_136 = arith.constant dense<0xFF800000> : vector<16xf32>
    %191 = vector.multi_reduction <maximumf>, %190, %cst_136 [1] : vector<16x8xf32> to vector<16xf32>
    %192 = vector.shape_cast %191 : vector<16xf32> to vector<16x1xf32>
    %193 = vector.broadcast %192 : vector<16x1xf32> to vector<16x8xf32>
    %194 = arith.subf %190, %193 : vector<16x8xf32>
    %195 = math.exp %194 : vector<16x8xf32>
    %cst_137 = arith.constant dense<0.000000e+00> : vector<16xf32>
    %196 = vector.multi_reduction <add>, %195, %cst_137 [1] : vector<16x8xf32> to vector<16xf32>
    %197 = vector.shape_cast %196 : vector<16xf32> to vector<16x1xf32>
    %198 = tpu.reciprocal %197 {approx = true} : vector<16x1xf32> -> vector<16x1xf32>
    %199 = vector.broadcast %198 : vector<16x1xf32> to vector<16x8xf32>
    %200 = arith.mulf %195, %199 : vector<16x8xf32>
    %cst_138 = arith.constant dense<0.000000e+00> : vector<16x8xf32>
    %201 = tpu.matmul %200, %189, %cst_138 {dimension_numbers = #tpu.dot_dimension_numbers<[1], [0], [0], [1], [0, 0, 1, 1], [], []>} : vector<16x8xf32>, vector<8x8xf32>, vector<16x8xf32> -> vector<16x8xf32>
    %c4_139 = arith.constant 4 : index
    %c0_140 = arith.constant 0 : index
    %c0_141 = arith.constant 0 : index
    %202 = vector.load %arg9[%c4_139, %c0_140, %c0_141] : memref<8x8x32xf32, #tpu.memory_space<vmem>>, vector<1x8x32xf32>
    %203 = vector.shape_cast %202 : vector<1x8x32xf32> to vector<8x32xf32>
    %cst_142 = arith.constant dense<0.000000e+00> : vector<16x32xf32>
    %204 = tpu.matmul %201, %203, %cst_142 {dimension_numbers = #tpu.dot_dimension_numbers<[1], [0], [0], [1], [0, 0, 1, 1], [], []>} : vector<16x8xf32>, vector<8x32xf32>, vector<16x32xf32> -> vector<16x32xf32>
    %205 = arith.addf %180, %204 : vector<16x32xf32>
    %c5_143 = arith.constant 5 : index
    %c0_144 = arith.constant 0 : index
    %c0_145 = arith.constant 0 : index
    %206 = vector.load %arg6[%c5_143, %c0_144, %c0_145] : memref<8x32x8xf32, #tpu.memory_space<vmem>>, vector<1x32x8xf32>
    %207 = vector.shape_cast %206 : vector<1x32x8xf32> to vector<32x8xf32>
    %cst_146 = arith.constant dense<0.000000e+00> : vector<16x8xf32>
    %208 = tpu.matmul %179, %207, %cst_146 {dimension_numbers = #tpu.dot_dimension_numbers<[1], [0], [0], [1], [0, 0, 1, 1], [], []>} : vector<16x32xf32>, vector<32x8xf32>, vector<16x8xf32> -> vector<16x8xf32>
    %c1_147 = arith.constant 1 : index
    %c0_148 = arith.constant 0 : index
    %c0_149 = arith.constant 0 : index
    %209 = vector.load %arg8[%c1_147, %c0_148, %c0_149] : memref<8x16x8xf32, #tpu.memory_space<vmem>>, vector<1x16x8xf32>
    %210 = vector.shape_cast %209 : vector<1x16x8xf32> to vector<16x8xf32>
    %cst_150 = arith.constant dense<0.000000e+00> : vector<8x8xf32>
    %211 = tpu.matmul %5, %210, %cst_150 {dimension_numbers = #tpu.dot_dimension_numbers<[1], [0], [0], [1], [0, 0, 1, 1], [], []>} : vector<8x16xf32>, vector<16x8xf32>, vector<8x8xf32> -> vector<8x8xf32>
    %c5_151 = arith.constant 5 : index
    %c0_152 = arith.constant 0 : index
    %c0_153 = arith.constant 0 : index
    %212 = vector.load %arg8[%c5_151, %c0_152, %c0_153] : memref<8x16x8xf32, #tpu.memory_space<vmem>>, vector<1x16x8xf32>
    %213 = vector.shape_cast %212 : vector<1x16x8xf32> to vector<16x8xf32>
    %cst_154 = arith.constant dense<0.000000e+00> : vector<8x8xf32>
    %214 = tpu.matmul %5, %213, %cst_154 {dimension_numbers = #tpu.dot_dimension_numbers<[1], [0], [0], [1], [0, 0, 1, 1], [], []>} : vector<8x16xf32>, vector<16x8xf32>, vector<8x8xf32> -> vector<8x8xf32>
    %cst_155 = arith.constant dense<0.000000e+00> : vector<16x8xf32>
    %215 = tpu.matmul %208, %211, %cst_155 {dimension_numbers = #tpu.dot_dimension_numbers<[1], [1], [0], [0], [0, 0, 1, 0], [], []>} : vector<16x8xf32>, vector<8x8xf32>, vector<16x8xf32> -> vector<16x8xf32>
    %cst_156 = arith.constant dense<0xFF800000> : vector<16xf32>
    %216 = vector.multi_reduction <maximumf>, %215, %cst_156 [1] : vector<16x8xf32> to vector<16xf32>
    %217 = vector.shape_cast %216 : vector<16xf32> to vector<16x1xf32>
    %218 = vector.broadcast %217 : vector<16x1xf32> to vector<16x8xf32>
    %219 = arith.subf %215, %218 : vector<16x8xf32>
    %220 = math.exp %219 : vector<16x8xf32>
    %cst_157 = arith.constant dense<0.000000e+00> : vector<16xf32>
    %221 = vector.multi_reduction <add>, %220, %cst_157 [1] : vector<16x8xf32> to vector<16xf32>
    %222 = vector.shape_cast %221 : vector<16xf32> to vector<16x1xf32>
    %223 = tpu.reciprocal %222 {approx = true} : vector<16x1xf32> -> vector<16x1xf32>
    %224 = vector.broadcast %223 : vector<16x1xf32> to vector<16x8xf32>
    %225 = arith.mulf %220, %224 : vector<16x8xf32>
    %cst_158 = arith.constant dense<0.000000e+00> : vector<16x8xf32>
    %226 = tpu.matmul %225, %214, %cst_158 {dimension_numbers = #tpu.dot_dimension_numbers<[1], [0], [0], [1], [0, 0, 1, 1], [], []>} : vector<16x8xf32>, vector<8x8xf32>, vector<16x8xf32> -> vector<16x8xf32>
    %c5_159 = arith.constant 5 : index
    %c0_160 = arith.constant 0 : index
    %c0_161 = arith.constant 0 : index
    %227 = vector.load %arg9[%c5_159, %c0_160, %c0_161] : memref<8x8x32xf32, #tpu.memory_space<vmem>>, vector<1x8x32xf32>
    %228 = vector.shape_cast %227 : vector<1x8x32xf32> to vector<8x32xf32>
    %cst_162 = arith.constant dense<0.000000e+00> : vector<16x32xf32>
    %229 = tpu.matmul %226, %228, %cst_162 {dimension_numbers = #tpu.dot_dimension_numbers<[1], [0], [0], [1], [0, 0, 1, 1], [], []>} : vector<16x8xf32>, vector<8x32xf32>, vector<16x32xf32> -> vector<16x32xf32>
    %230 = arith.addf %205, %229 : vector<16x32xf32>
    %c6_163 = arith.constant 6 : index
    %c0_164 = arith.constant 0 : index
    %c0_165 = arith.constant 0 : index
    %231 = vector.load %arg6[%c6_163, %c0_164, %c0_165] : memref<8x32x8xf32, #tpu.memory_space<vmem>>, vector<1x32x8xf32>
    %232 = vector.shape_cast %231 : vector<1x32x8xf32> to vector<32x8xf32>
    %cst_166 = arith.constant dense<0.000000e+00> : vector<16x8xf32>
    %233 = tpu.matmul %179, %232, %cst_166 {dimension_numbers = #tpu.dot_dimension_numbers<[1], [0], [0], [1], [0, 0, 1, 1], [], []>} : vector<16x32xf32>, vector<32x8xf32>, vector<16x8xf32> -> vector<16x8xf32>
    %c2_167 = arith.constant 2 : index
    %c0_168 = arith.constant 0 : index
    %c0_169 = arith.constant 0 : index
    %234 = vector.load %arg8[%c2_167, %c0_168, %c0_169] : memref<8x16x8xf32, #tpu.memory_space<vmem>>, vector<1x16x8xf32>
    %235 = vector.shape_cast %234 : vector<1x16x8xf32> to vector<16x8xf32>
    %cst_170 = arith.constant dense<0.000000e+00> : vector<8x8xf32>
    %236 = tpu.matmul %5, %235, %cst_170 {dimension_numbers = #tpu.dot_dimension_numbers<[1], [0], [0], [1], [0, 0, 1, 1], [], []>} : vector<8x16xf32>, vector<16x8xf32>, vector<8x8xf32> -> vector<8x8xf32>
    %c6_171 = arith.constant 6 : index
    %c0_172 = arith.constant 0 : index
    %c0_173 = arith.constant 0 : index
    %237 = vector.load %arg8[%c6_171, %c0_172, %c0_173] : memref<8x16x8xf32, #tpu.memory_space<vmem>>, vector<1x16x8xf32>
    %238 = vector.shape_cast %237 : vector<1x16x8xf32> to vector<16x8xf32>
    %cst_174 = arith.constant dense<0.000000e+00> : vector<8x8xf32>
    %239 = tpu.matmul %5, %238, %cst_174 {dimension_numbers = #tpu.dot_dimension_numbers<[1], [0], [0], [1], [0, 0, 1, 1], [], []>} : vector<8x16xf32>, vector<16x8xf32>, vector<8x8xf32> -> vector<8x8xf32>
    %cst_175 = arith.constant dense<0.000000e+00> : vector<16x8xf32>
    %240 = tpu.matmul %233, %236, %cst_175 {dimension_numbers = #tpu.dot_dimension_numbers<[1], [1], [0], [0], [0, 0, 1, 0], [], []>} : vector<16x8xf32>, vector<8x8xf32>, vector<16x8xf32> -> vector<16x8xf32>
    %cst_176 = arith.constant dense<0xFF800000> : vector<16xf32>
    %241 = vector.multi_reduction <maximumf>, %240, %cst_176 [1] : vector<16x8xf32> to vector<16xf32>
    %242 = vector.shape_cast %241 : vector<16xf32> to vector<16x1xf32>
    %243 = vector.broadcast %242 : vector<16x1xf32> to vector<16x8xf32>
    %244 = arith.subf %240, %243 : vector<16x8xf32>
    %245 = math.exp %244 : vector<16x8xf32>
    %cst_177 = arith.constant dense<0.000000e+00> : vector<16xf32>
    %246 = vector.multi_reduction <add>, %245, %cst_177 [1] : vector<16x8xf32> to vector<16xf32>
    %247 = vector.shape_cast %246 : vector<16xf32> to vector<16x1xf32>
    %248 = tpu.reciprocal %247 {approx = true} : vector<16x1xf32> -> vector<16x1xf32>
    %249 = vector.broadcast %248 : vector<16x1xf32> to vector<16x8xf32>
    %250 = arith.mulf %245, %249 : vector<16x8xf32>
    %cst_178 = arith.constant dense<0.000000e+00> : vector<16x8xf32>
    %251 = tpu.matmul %250, %239, %cst_178 {dimension_numbers = #tpu.dot_dimension_numbers<[1], [0], [0], [1], [0, 0, 1, 1], [], []>} : vector<16x8xf32>, vector<8x8xf32>, vector<16x8xf32> -> vector<16x8xf32>
    %c6_179 = arith.constant 6 : index
    %c0_180 = arith.constant 0 : index
    %c0_181 = arith.constant 0 : index
    %252 = vector.load %arg9[%c6_179, %c0_180, %c0_181] : memref<8x8x32xf32, #tpu.memory_space<vmem>>, vector<1x8x32xf32>
    %253 = vector.shape_cast %252 : vector<1x8x32xf32> to vector<8x32xf32>
    %cst_182 = arith.constant dense<0.000000e+00> : vector<16x32xf32>
    %254 = tpu.matmul %251, %253, %cst_182 {dimension_numbers = #tpu.dot_dimension_numbers<[1], [0], [0], [1], [0, 0, 1, 1], [], []>} : vector<16x8xf32>, vector<8x32xf32>, vector<16x32xf32> -> vector<16x32xf32>
    %255 = arith.addf %230, %254 : vector<16x32xf32>
    %c7_183 = arith.constant 7 : index
    %c0_184 = arith.constant 0 : index
    %c0_185 = arith.constant 0 : index
    %256 = vector.load %arg6[%c7_183, %c0_184, %c0_185] : memref<8x32x8xf32, #tpu.memory_space<vmem>>, vector<1x32x8xf32>
    %257 = vector.shape_cast %256 : vector<1x32x8xf32> to vector<32x8xf32>
    %cst_186 = arith.constant dense<0.000000e+00> : vector<16x8xf32>
    %258 = tpu.matmul %179, %257, %cst_186 {dimension_numbers = #tpu.dot_dimension_numbers<[1], [0], [0], [1], [0, 0, 1, 1], [], []>} : vector<16x32xf32>, vector<32x8xf32>, vector<16x8xf32> -> vector<16x8xf32>
    %c3_187 = arith.constant 3 : index
    %c0_188 = arith.constant 0 : index
    %c0_189 = arith.constant 0 : index
    %259 = vector.load %arg8[%c3_187, %c0_188, %c0_189] : memref<8x16x8xf32, #tpu.memory_space<vmem>>, vector<1x16x8xf32>
    %260 = vector.shape_cast %259 : vector<1x16x8xf32> to vector<16x8xf32>
    %cst_190 = arith.constant dense<0.000000e+00> : vector<8x8xf32>
    %261 = tpu.matmul %5, %260, %cst_190 {dimension_numbers = #tpu.dot_dimension_numbers<[1], [0], [0], [1], [0, 0, 1, 1], [], []>} : vector<8x16xf32>, vector<16x8xf32>, vector<8x8xf32> -> vector<8x8xf32>
    %c7_191 = arith.constant 7 : index
    %c0_192 = arith.constant 0 : index
    %c0_193 = arith.constant 0 : index
    %262 = vector.load %arg8[%c7_191, %c0_192, %c0_193] : memref<8x16x8xf32, #tpu.memory_space<vmem>>, vector<1x16x8xf32>
    %263 = vector.shape_cast %262 : vector<1x16x8xf32> to vector<16x8xf32>
    %cst_194 = arith.constant dense<0.000000e+00> : vector<8x8xf32>
    %264 = tpu.matmul %5, %263, %cst_194 {dimension_numbers = #tpu.dot_dimension_numbers<[1], [0], [0], [1], [0, 0, 1, 1], [], []>} : vector<8x16xf32>, vector<16x8xf32>, vector<8x8xf32> -> vector<8x8xf32>
    %cst_195 = arith.constant dense<0.000000e+00> : vector<16x8xf32>
    %265 = tpu.matmul %258, %261, %cst_195 {dimension_numbers = #tpu.dot_dimension_numbers<[1], [1], [0], [0], [0, 0, 1, 0], [], []>} : vector<16x8xf32>, vector<8x8xf32>, vector<16x8xf32> -> vector<16x8xf32>
    %cst_196 = arith.constant dense<0xFF800000> : vector<16xf32>
    %266 = vector.multi_reduction <maximumf>, %265, %cst_196 [1] : vector<16x8xf32> to vector<16xf32>
    %267 = vector.shape_cast %266 : vector<16xf32> to vector<16x1xf32>
    %268 = vector.broadcast %267 : vector<16x1xf32> to vector<16x8xf32>
    %269 = arith.subf %265, %268 : vector<16x8xf32>
    %270 = math.exp %269 : vector<16x8xf32>
    %cst_197 = arith.constant dense<0.000000e+00> : vector<16xf32>
    %271 = vector.multi_reduction <add>, %270, %cst_197 [1] : vector<16x8xf32> to vector<16xf32>
    %272 = vector.shape_cast %271 : vector<16xf32> to vector<16x1xf32>
    %273 = tpu.reciprocal %272 {approx = true} : vector<16x1xf32> -> vector<16x1xf32>
    %274 = vector.broadcast %273 : vector<16x1xf32> to vector<16x8xf32>
    %275 = arith.mulf %270, %274 : vector<16x8xf32>
    %cst_198 = arith.constant dense<0.000000e+00> : vector<16x8xf32>
    %276 = tpu.matmul %275, %264, %cst_198 {dimension_numbers = #tpu.dot_dimension_numbers<[1], [0], [0], [1], [0, 0, 1, 1], [], []>} : vector<16x8xf32>, vector<8x8xf32>, vector<16x8xf32> -> vector<16x8xf32>
    %c7_199 = arith.constant 7 : index
    %c0_200 = arith.constant 0 : index
    %c0_201 = arith.constant 0 : index
    %277 = vector.load %arg9[%c7_199, %c0_200, %c0_201] : memref<8x8x32xf32, #tpu.memory_space<vmem>>, vector<1x8x32xf32>
    %278 = vector.shape_cast %277 : vector<1x8x32xf32> to vector<8x32xf32>
    %cst_202 = arith.constant dense<0.000000e+00> : vector<16x32xf32>
    %279 = tpu.matmul %276, %278, %cst_202 {dimension_numbers = #tpu.dot_dimension_numbers<[1], [0], [0], [1], [0, 0, 1, 1], [], []>} : vector<16x8xf32>, vector<8x32xf32>, vector<16x32xf32> -> vector<16x32xf32>
    %280 = arith.addf %255, %279 : vector<16x32xf32>
    %c1_203 = arith.constant 1 : index
    %c0_204 = arith.constant 0 : index
    %c0_205 = arith.constant 0 : index
    %281 = vector.load %arg10[%c1_203, %c0_204, %c0_205] : memref<3x1x32xf32, #tpu.memory_space<vmem>>, vector<1x1x32xf32>
    %282 = vector.shape_cast %281 : vector<1x1x32xf32> to vector<1x32xf32>
    %283 = vector.broadcast %282 : vector<1x32xf32> to vector<16x32xf32>
    %284 = arith.addf %280, %283 : vector<16x32xf32>
    %285 = arith.addf %145, %284 : vector<16x32xf32>
    %c4_206 = arith.constant 4 : index
    %c0_207 = arith.constant 0 : index
    %c0_208 = arith.constant 0 : index
    %286 = vector.load %arg4[%c4_206, %c0_207, %c0_208] : memref<6x32x32xf32, #tpu.memory_space<vmem>>, vector<1x32x32xf32>
    %287 = vector.shape_cast %286 : vector<1x32x32xf32> to vector<32x32xf32>
    %cst_209 = arith.constant dense<0.000000e+00> : vector<1x32xf32>
    %288 = tpu.matmul %3, %287, %cst_209 {dimension_numbers = #tpu.dot_dimension_numbers<[1], [0], [0], [1], [0, 0, 1, 1], [], []>} : vector<1x32xf32>, vector<32x32xf32>, vector<1x32xf32> -> vector<1x32xf32>
    %c4_210 = arith.constant 4 : index
    %c0_211 = arith.constant 0 : index
    %c0_212 = arith.constant 0 : index
    %289 = vector.load %arg5[%c4_210, %c0_211, %c0_212] : memref<6x1x32xf32, #tpu.memory_space<vmem>>, vector<1x1x32xf32>
    %290 = vector.shape_cast %289 : vector<1x1x32xf32> to vector<1x32xf32>
    %291 = arith.addf %288, %290 : vector<1x32xf32>
    %c5_213 = arith.constant 5 : index
    %c0_214 = arith.constant 0 : index
    %c0_215 = arith.constant 0 : index
    %292 = vector.load %arg4[%c5_213, %c0_214, %c0_215] : memref<6x32x32xf32, #tpu.memory_space<vmem>>, vector<1x32x32xf32>
    %293 = vector.shape_cast %292 : vector<1x32x32xf32> to vector<32x32xf32>
    %cst_216 = arith.constant dense<0.000000e+00> : vector<1x32xf32>
    %294 = tpu.matmul %3, %293, %cst_216 {dimension_numbers = #tpu.dot_dimension_numbers<[1], [0], [0], [1], [0, 0, 1, 1], [], []>} : vector<1x32xf32>, vector<32x32xf32>, vector<1x32xf32> -> vector<1x32xf32>
    %c5_217 = arith.constant 5 : index
    %c0_218 = arith.constant 0 : index
    %c0_219 = arith.constant 0 : index
    %295 = vector.load %arg5[%c5_217, %c0_218, %c0_219] : memref<6x1x32xf32, #tpu.memory_space<vmem>>, vector<1x1x32xf32>
    %296 = vector.shape_cast %295 : vector<1x1x32xf32> to vector<1x32xf32>
    %297 = arith.addf %294, %296 : vector<1x32xf32>
    %cst_220 = arith.constant dense<0.000000e+00> : vector<16xf32>
    %298 = vector.multi_reduction <add>, %285, %cst_220 [1] : vector<16x32xf32> to vector<16xf32>
    %299 = vector.shape_cast %298 : vector<16xf32> to vector<16x1xf32>
    %cst_221 = arith.constant 3.200000e+01 : f32
    %300 = vector.broadcast %cst_221 : f32 to vector<16x1xf32>
    %301 = arith.divf %299, %300 : vector<16x1xf32>
    %302 = vector.broadcast %301 : vector<16x1xf32> to vector<16x32xf32>
    %303 = arith.subf %285, %302 : vector<16x32xf32>
    %304 = arith.mulf %303, %303 : vector<16x32xf32>
    %cst_222 = arith.constant dense<0.000000e+00> : vector<16xf32>
    %305 = vector.multi_reduction <add>, %304, %cst_222 [1] : vector<16x32xf32> to vector<16xf32>
    %306 = vector.shape_cast %305 : vector<16xf32> to vector<16x1xf32>
    %cst_223 = arith.constant 3.200000e+01 : f32
    %307 = vector.broadcast %cst_223 : f32 to vector<16x1xf32>
    %308 = arith.divf %306, %307 : vector<16x1xf32>
    %309 = vector.broadcast %301 : vector<16x1xf32> to vector<16x32xf32>
    %310 = arith.subf %285, %309 : vector<16x32xf32>
    %cst_224 = arith.constant 9.99999974E-6 : f32
    %311 = vector.broadcast %cst_224 : f32 to vector<16x1xf32>
    %312 = arith.addf %308, %311 : vector<16x1xf32>
    %313 = math.rsqrt %312 : vector<16x1xf32>
    %314 = vector.broadcast %313 : vector<16x1xf32> to vector<16x32xf32>
    %315 = arith.mulf %310, %314 : vector<16x32xf32>
    %316 = vector.broadcast %291 : vector<1x32xf32> to vector<16x32xf32>
    %317 = arith.mulf %315, %316 : vector<16x32xf32>
    %318 = vector.broadcast %297 : vector<1x32xf32> to vector<16x32xf32>
    %319 = arith.addf %317, %318 : vector<16x32xf32>
    %c0_225 = arith.constant 0 : index
    %c0_226 = arith.constant 0 : index
    %c0_227 = arith.constant 0 : index
    %320 = vector.load %arg11[%c0_225, %c0_226, %c0_227] : memref<2x32x128xf32, #tpu.memory_space<vmem>>, vector<1x32x128xf32>
    %321 = vector.shape_cast %320 : vector<1x32x128xf32> to vector<32x128xf32>
    %cst_228 = arith.constant dense<0.000000e+00> : vector<16x128xf32>
    %322 = tpu.matmul %319, %321, %cst_228 {dimension_numbers = #tpu.dot_dimension_numbers<[1], [0], [0], [1], [0, 0, 1, 1], [], []>} : vector<16x32xf32>, vector<32x128xf32>, vector<16x128xf32> -> vector<16x128xf32>
    %c0_229 = arith.constant 0 : index
    %c0_230 = arith.constant 0 : index
    %c0_231 = arith.constant 0 : index
    %323 = vector.load %arg12[%c0_229, %c0_230, %c0_231] : memref<2x1x128xf32, #tpu.memory_space<vmem>>, vector<1x1x128xf32>
    %324 = vector.shape_cast %323 : vector<1x1x128xf32> to vector<1x128xf32>
    %325 = vector.broadcast %324 : vector<1x128xf32> to vector<16x128xf32>
    %326 = arith.addf %322, %325 : vector<16x128xf32>
    %c1_232 = arith.constant 1 : index
    %c0_233 = arith.constant 0 : index
    %c0_234 = arith.constant 0 : index
    %327 = vector.load %arg11[%c1_232, %c0_233, %c0_234] : memref<2x32x128xf32, #tpu.memory_space<vmem>>, vector<1x32x128xf32>
    %328 = vector.shape_cast %327 : vector<1x32x128xf32> to vector<32x128xf32>
    %cst_235 = arith.constant dense<0.000000e+00> : vector<16x128xf32>
    %329 = tpu.matmul %319, %328, %cst_235 {dimension_numbers = #tpu.dot_dimension_numbers<[1], [0], [0], [1], [0, 0, 1, 1], [], []>} : vector<16x32xf32>, vector<32x128xf32>, vector<16x128xf32> -> vector<16x128xf32>
    %c1_236 = arith.constant 1 : index
    %c0_237 = arith.constant 0 : index
    %c0_238 = arith.constant 0 : index
    %330 = vector.load %arg12[%c1_236, %c0_237, %c0_238] : memref<2x1x128xf32, #tpu.memory_space<vmem>>, vector<1x1x128xf32>
    %331 = vector.shape_cast %330 : vector<1x1x128xf32> to vector<1x128xf32>
    %332 = vector.broadcast %331 : vector<1x128xf32> to vector<16x128xf32>
    %333 = arith.addf %329, %332 : vector<16x128xf32>
    %cst_239 = arith.constant 5.000000e-01 : f32
    %334 = vector.broadcast %cst_239 : f32 to vector<16x128xf32>
    %335 = arith.mulf %334, %333 : vector<16x128xf32>
    %cst_240 = arith.constant 0.707106769 : f32
    %336 = vector.broadcast %cst_240 : f32 to vector<16x128xf32>
    %337 = arith.mulf %333, %336 : vector<16x128xf32>
    %338 = math.erf %337 : vector<16x128xf32>
    %cst_241 = arith.constant 1.000000e+00 : f32
    %339 = vector.broadcast %cst_241 : f32 to vector<16x128xf32>
    %340 = arith.addf %339, %338 : vector<16x128xf32>
    %341 = arith.mulf %335, %340 : vector<16x128xf32>
    %342 = arith.mulf %326, %341 : vector<16x128xf32>
    %c0_242 = arith.constant 0 : index
    %c0_243 = arith.constant 0 : index
    %343 = vector.load %arg13[%c0_242, %c0_243] : memref<128x32xf32, #tpu.memory_space<vmem>>, vector<128x32xf32>
    %cst_244 = arith.constant dense<0.000000e+00> : vector<16x32xf32>
    %344 = tpu.matmul %342, %343, %cst_244 {dimension_numbers = #tpu.dot_dimension_numbers<[1], [0], [0], [1], [0, 0, 1, 1], [], []>} : vector<16x128xf32>, vector<128x32xf32>, vector<16x32xf32> -> vector<16x32xf32>
    %345 = arith.addf %285, %344 : vector<16x32xf32>
    %c2_245 = arith.constant 2 : index
    %c0_246 = arith.constant 0 : index
    %c0_247 = arith.constant 0 : index
    %346 = vector.load %arg10[%c2_245, %c0_246, %c0_247] : memref<3x1x32xf32, #tpu.memory_space<vmem>>, vector<1x1x32xf32>
    %347 = vector.shape_cast %346 : vector<1x1x32xf32> to vector<1x32xf32>
    %348 = vector.broadcast %347 : vector<1x32xf32> to vector<16x32xf32>
    %349 = arith.addf %345, %348 : vector<16x32xf32>
    %c0_248 = arith.constant 0 : index
    %c0_249 = arith.constant 0 : index
    %c0_250 = arith.constant 0 : index
    %350 = vector.load %arg14[%c0_248, %c0_249, %c0_250] : memref<2x16x32xf32, #tpu.memory_space<vmem>>, vector<1x16x32xf32>
    %351 = vector.shape_cast %350 : vector<1x16x32xf32> to vector<16x32xf32>
    %352 = vector.shape_cast %349 : vector<16x32xf32> to vector<1x16x32xf32>
    tpu.vector_store %arg14[%c0_248, %c0_249, %c0_250], %352 {strides = array<i32>} : memref<2x16x32xf32, #tpu.memory_space<vmem>>, vector<1x16x32xf32>,
    %c1_251 = arith.constant 1 : index
    %c0_252 = arith.constant 0 : index
    %c0_253 = arith.constant 0 : index
    %353 = vector.load %arg1[%c1_251, %c0_252, %c0_253] : memref<2x16x32xf32, #tpu.memory_space<vmem>>, vector<1x16x32xf32>
    %354 = vector.shape_cast %353 : vector<1x16x32xf32> to vector<16x32xf32>
    %c1_254 = arith.constant 1 : index
    %c0_255 = arith.constant 0 : index
    %c0_256 = arith.constant 0 : index
    %355 = vector.load %arg2[%c1_254, %c0_255, %c0_256] : memref<2x1x32xf32, #tpu.memory_space<vmem>>, vector<1x1x32xf32>
    %356 = vector.shape_cast %355 : vector<1x1x32xf32> to vector<1x32xf32>
    %c1_257 = arith.constant 1 : index
    %c0_258 = arith.constant 0 : index
    %c0_259 = arith.constant 0 : index
    %357 = vector.load %arg3[%c1_257, %c0_258, %c0_259] : memref<2x8x16xf32, #tpu.memory_space<vmem>>, vector<1x8x16xf32>
    %358 = vector.shape_cast %357 : vector<1x8x16xf32> to vector<8x16xf32>
    %c0_260 = arith.constant 0 : index
    %c0_261 = arith.constant 0 : index
    %c0_262 = arith.constant 0 : index
    %359 = vector.load %arg4[%c0_260, %c0_261, %c0_262] : memref<6x32x32xf32, #tpu.memory_space<vmem>>, vector<1x32x32xf32>
    %360 = vector.shape_cast %359 : vector<1x32x32xf32> to vector<32x32xf32>
    %cst_263 = arith.constant dense<0.000000e+00> : vector<1x32xf32>
    %361 = tpu.matmul %356, %360, %cst_263 {dimension_numbers = #tpu.dot_dimension_numbers<[1], [0], [0], [1], [0, 0, 1, 1], [], []>} : vector<1x32xf32>, vector<32x32xf32>, vector<1x32xf32> -> vector<1x32xf32>
    %c0_264 = arith.constant 0 : index
    %c0_265 = arith.constant 0 : index
    %c0_266 = arith.constant 0 : index
    %362 = vector.load %arg5[%c0_264, %c0_265, %c0_266] : memref<6x1x32xf32, #tpu.memory_space<vmem>>, vector<1x1x32xf32>
    %363 = vector.shape_cast %362 : vector<1x1x32xf32> to vector<1x32xf32>
    %364 = arith.addf %361, %363 : vector<1x32xf32>
    %c1_267 = arith.constant 1 : index
    %c0_268 = arith.constant 0 : index
    %c0_269 = arith.constant 0 : index
    %365 = vector.load %arg4[%c1_267, %c0_268, %c0_269] : memref<6x32x32xf32, #tpu.memory_space<vmem>>, vector<1x32x32xf32>
    %366 = vector.shape_cast %365 : vector<1x32x32xf32> to vector<32x32xf32>
    %cst_270 = arith.constant dense<0.000000e+00> : vector<1x32xf32>
    %367 = tpu.matmul %356, %366, %cst_270 {dimension_numbers = #tpu.dot_dimension_numbers<[1], [0], [0], [1], [0, 0, 1, 1], [], []>} : vector<1x32xf32>, vector<32x32xf32>, vector<1x32xf32> -> vector<1x32xf32>
    %c1_271 = arith.constant 1 : index
    %c0_272 = arith.constant 0 : index
    %c0_273 = arith.constant 0 : index
    %368 = vector.load %arg5[%c1_271, %c0_272, %c0_273] : memref<6x1x32xf32, #tpu.memory_space<vmem>>, vector<1x1x32xf32>
    %369 = vector.shape_cast %368 : vector<1x1x32xf32> to vector<1x32xf32>
    %370 = arith.addf %367, %369 : vector<1x32xf32>
    %cst_274 = arith.constant dense<0.000000e+00> : vector<16xf32>
    %371 = vector.multi_reduction <add>, %354, %cst_274 [1] : vector<16x32xf32> to vector<16xf32>
    %372 = vector.shape_cast %371 : vector<16xf32> to vector<16x1xf32>
    %cst_275 = arith.constant 3.200000e+01 : f32
    %373 = vector.broadcast %cst_275 : f32 to vector<16x1xf32>
    %374 = arith.divf %372, %373 : vector<16x1xf32>
    %375 = vector.broadcast %374 : vector<16x1xf32> to vector<16x32xf32>
    %376 = arith.subf %354, %375 : vector<16x32xf32>
    %377 = arith.mulf %376, %376 : vector<16x32xf32>
    %cst_276 = arith.constant dense<0.000000e+00> : vector<16xf32>
    %378 = vector.multi_reduction <add>, %377, %cst_276 [1] : vector<16x32xf32> to vector<16xf32>
    %379 = vector.shape_cast %378 : vector<16xf32> to vector<16x1xf32>
    %cst_277 = arith.constant 3.200000e+01 : f32
    %380 = vector.broadcast %cst_277 : f32 to vector<16x1xf32>
    %381 = arith.divf %379, %380 : vector<16x1xf32>
    %382 = vector.broadcast %374 : vector<16x1xf32> to vector<16x32xf32>
    %383 = arith.subf %354, %382 : vector<16x32xf32>
    %cst_278 = arith.constant 9.99999974E-6 : f32
    %384 = vector.broadcast %cst_278 : f32 to vector<16x1xf32>
    %385 = arith.addf %381, %384 : vector<16x1xf32>
    %386 = math.rsqrt %385 : vector<16x1xf32>
    %387 = vector.broadcast %386 : vector<16x1xf32> to vector<16x32xf32>
    %388 = arith.mulf %383, %387 : vector<16x32xf32>
    %389 = vector.broadcast %364 : vector<1x32xf32> to vector<16x32xf32>
    %390 = arith.mulf %388, %389 : vector<16x32xf32>
    %391 = vector.broadcast %370 : vector<1x32xf32> to vector<16x32xf32>
    %392 = arith.addf %390, %391 : vector<16x32xf32>
    %cst_279 = arith.constant 0.000000e+00 : f32
    %393 = vector.broadcast %cst_279 : f32 to vector<16x32xf32>
    %c0_280 = arith.constant 0 : index
    %c0_281 = arith.constant 0 : index
    %c0_282 = arith.constant 0 : index
    %394 = vector.load %arg6[%c0_280, %c0_281, %c0_282] : memref<8x32x8xf32, #tpu.memory_space<vmem>>, vector<1x32x8xf32>
    %395 = vector.shape_cast %394 : vector<1x32x8xf32> to vector<32x8xf32>
    %cst_283 = arith.constant dense<0.000000e+00> : vector<16x8xf32>
    %396 = tpu.matmul %392, %395, %cst_283 {dimension_numbers = #tpu.dot_dimension_numbers<[1], [0], [0], [1], [0, 0, 1, 1], [], []>} : vector<16x32xf32>, vector<32x8xf32>, vector<16x8xf32> -> vector<16x8xf32>
    %c0_284 = arith.constant 0 : index
    %c0_285 = arith.constant 0 : index
    %c0_286 = arith.constant 0 : index
    %397 = vector.load %arg7[%c0_284, %c0_285, %c0_286] : memref<8x32x8xf32, #tpu.memory_space<vmem>>, vector<1x32x8xf32>
    %398 = vector.shape_cast %397 : vector<1x32x8xf32> to vector<32x8xf32>
    %cst_287 = arith.constant dense<0.000000e+00> : vector<16x8xf32>
    %399 = tpu.matmul %392, %398, %cst_287 {dimension_numbers = #tpu.dot_dimension_numbers<[1], [0], [0], [1], [0, 0, 1, 1], [], []>} : vector<16x32xf32>, vector<32x8xf32>, vector<16x8xf32> -> vector<16x8xf32>
    %c4_288 = arith.constant 4 : index
    %c0_289 = arith.constant 0 : index
    %c0_290 = arith.constant 0 : index
    %400 = vector.load %arg7[%c4_288, %c0_289, %c0_290] : memref<8x32x8xf32, #tpu.memory_space<vmem>>, vector<1x32x8xf32>
    %401 = vector.shape_cast %400 : vector<1x32x8xf32> to vector<32x8xf32>
    %cst_291 = arith.constant dense<0.000000e+00> : vector<16x8xf32>
    %402 = tpu.matmul %392, %401, %cst_291 {dimension_numbers = #tpu.dot_dimension_numbers<[1], [0], [0], [1], [0, 0, 1, 1], [], []>} : vector<16x32xf32>, vector<32x8xf32>, vector<16x8xf32> -> vector<16x8xf32>
    %cst_292 = arith.constant dense<0.000000e+00> : vector<16x16xf32>
    %403 = tpu.matmul %396, %399, %cst_292 {dimension_numbers = #tpu.dot_dimension_numbers<[1], [1], [0], [0], [0, 0, 1, 0], [], []>} : vector<16x8xf32>, vector<16x8xf32>, vector<16x16xf32> -> vector<16x16xf32>
    %cst_293 = arith.constant dense<0xFF800000> : vector<16xf32>
    %404 = vector.multi_reduction <maximumf>, %403, %cst_293 [1] : vector<16x16xf32> to vector<16xf32>
    %405 = vector.shape_cast %404 : vector<16xf32> to vector<16x1xf32>
    %406 = vector.broadcast %405 : vector<16x1xf32> to vector<16x16xf32>
    %407 = arith.subf %403, %406 : vector<16x16xf32>
    %408 = math.exp %407 : vector<16x16xf32>
    %cst_294 = arith.constant dense<0.000000e+00> : vector<16xf32>
    %409 = vector.multi_reduction <add>, %408, %cst_294 [1] : vector<16x16xf32> to vector<16xf32>
    %410 = vector.shape_cast %409 : vector<16xf32> to vector<16x1xf32>
    %411 = tpu.reciprocal %410 {approx = true} : vector<16x1xf32> -> vector<16x1xf32>
    %412 = vector.broadcast %411 : vector<16x1xf32> to vector<16x16xf32>
    %413 = arith.mulf %408, %412 : vector<16x16xf32>
    %cst_295 = arith.constant dense<0.000000e+00> : vector<16x8xf32>
    %414 = tpu.matmul %413, %402, %cst_295 {dimension_numbers = #tpu.dot_dimension_numbers<[1], [0], [0], [1], [0, 0, 1, 1], [], []>} : vector<16x16xf32>, vector<16x8xf32>, vector<16x8xf32> -> vector<16x8xf32>
    %c0_296 = arith.constant 0 : index
    %c0_297 = arith.constant 0 : index
    %c0_298 = arith.constant 0 : index
    %415 = vector.load %arg9[%c0_296, %c0_297, %c0_298] : memref<8x8x32xf32, #tpu.memory_space<vmem>>, vector<1x8x32xf32>
    %416 = vector.shape_cast %415 : vector<1x8x32xf32> to vector<8x32xf32>
    %cst_299 = arith.constant dense<0.000000e+00> : vector<16x32xf32>
    %417 = tpu.matmul %414, %416, %cst_299 {dimension_numbers = #tpu.dot_dimension_numbers<[1], [0], [0], [1], [0, 0, 1, 1], [], []>} : vector<16x8xf32>, vector<8x32xf32>, vector<16x32xf32> -> vector<16x32xf32>
    %418 = arith.addf %393, %417 : vector<16x32xf32>
    %c1_300 = arith.constant 1 : index
    %c0_301 = arith.constant 0 : index
    %c0_302 = arith.constant 0 : index
    %419 = vector.load %arg6[%c1_300, %c0_301, %c0_302] : memref<8x32x8xf32, #tpu.memory_space<vmem>>, vector<1x32x8xf32>
    %420 = vector.shape_cast %419 : vector<1x32x8xf32> to vector<32x8xf32>
    %cst_303 = arith.constant dense<0.000000e+00> : vector<16x8xf32>
    %421 = tpu.matmul %392, %420, %cst_303 {dimension_numbers = #tpu.dot_dimension_numbers<[1], [0], [0], [1], [0, 0, 1, 1], [], []>} : vector<16x32xf32>, vector<32x8xf32>, vector<16x8xf32> -> vector<16x8xf32>
    %c1_304 = arith.constant 1 : index
    %c0_305 = arith.constant 0 : index
    %c0_306 = arith.constant 0 : index
    %422 = vector.load %arg7[%c1_304, %c0_305, %c0_306] : memref<8x32x8xf32, #tpu.memory_space<vmem>>, vector<1x32x8xf32>
    %423 = vector.shape_cast %422 : vector<1x32x8xf32> to vector<32x8xf32>
    %cst_307 = arith.constant dense<0.000000e+00> : vector<16x8xf32>
    %424 = tpu.matmul %392, %423, %cst_307 {dimension_numbers = #tpu.dot_dimension_numbers<[1], [0], [0], [1], [0, 0, 1, 1], [], []>} : vector<16x32xf32>, vector<32x8xf32>, vector<16x8xf32> -> vector<16x8xf32>
    %c5_308 = arith.constant 5 : index
    %c0_309 = arith.constant 0 : index
    %c0_310 = arith.constant 0 : index
    %425 = vector.load %arg7[%c5_308, %c0_309, %c0_310] : memref<8x32x8xf32, #tpu.memory_space<vmem>>, vector<1x32x8xf32>
    %426 = vector.shape_cast %425 : vector<1x32x8xf32> to vector<32x8xf32>
    %cst_311 = arith.constant dense<0.000000e+00> : vector<16x8xf32>
    %427 = tpu.matmul %392, %426, %cst_311 {dimension_numbers = #tpu.dot_dimension_numbers<[1], [0], [0], [1], [0, 0, 1, 1], [], []>} : vector<16x32xf32>, vector<32x8xf32>, vector<16x8xf32> -> vector<16x8xf32>
    %cst_312 = arith.constant dense<0.000000e+00> : vector<16x16xf32>
    %428 = tpu.matmul %421, %424, %cst_312 {dimension_numbers = #tpu.dot_dimension_numbers<[1], [1], [0], [0], [0, 0, 1, 0], [], []>} : vector<16x8xf32>, vector<16x8xf32>, vector<16x16xf32> -> vector<16x16xf32>
    %cst_313 = arith.constant dense<0xFF800000> : vector<16xf32>
    %429 = vector.multi_reduction <maximumf>, %428, %cst_313 [1] : vector<16x16xf32> to vector<16xf32>
    %430 = vector.shape_cast %429 : vector<16xf32> to vector<16x1xf32>
    %431 = vector.broadcast %430 : vector<16x1xf32> to vector<16x16xf32>
    %432 = arith.subf %428, %431 : vector<16x16xf32>
    %433 = math.exp %432 : vector<16x16xf32>
    %cst_314 = arith.constant dense<0.000000e+00> : vector<16xf32>
    %434 = vector.multi_reduction <add>, %433, %cst_314 [1] : vector<16x16xf32> to vector<16xf32>
    %435 = vector.shape_cast %434 : vector<16xf32> to vector<16x1xf32>
    %436 = tpu.reciprocal %435 {approx = true} : vector<16x1xf32> -> vector<16x1xf32>
    %437 = vector.broadcast %436 : vector<16x1xf32> to vector<16x16xf32>
    %438 = arith.mulf %433, %437 : vector<16x16xf32>
    %cst_315 = arith.constant dense<0.000000e+00> : vector<16x8xf32>
    %439 = tpu.matmul %438, %427, %cst_315 {dimension_numbers = #tpu.dot_dimension_numbers<[1], [0], [0], [1], [0, 0, 1, 1], [], []>} : vector<16x16xf32>, vector<16x8xf32>, vector<16x8xf32> -> vector<16x8xf32>
    %c1_316 = arith.constant 1 : index
    %c0_317 = arith.constant 0 : index
    %c0_318 = arith.constant 0 : index
    %440 = vector.load %arg9[%c1_316, %c0_317, %c0_318] : memref<8x8x32xf32, #tpu.memory_space<vmem>>, vector<1x8x32xf32>
    %441 = vector.shape_cast %440 : vector<1x8x32xf32> to vector<8x32xf32>
    %cst_319 = arith.constant dense<0.000000e+00> : vector<16x32xf32>
    %442 = tpu.matmul %439, %441, %cst_319 {dimension_numbers = #tpu.dot_dimension_numbers<[1], [0], [0], [1], [0, 0, 1, 1], [], []>} : vector<16x8xf32>, vector<8x32xf32>, vector<16x32xf32> -> vector<16x32xf32>
    %443 = arith.addf %418, %442 : vector<16x32xf32>
    %c2_320 = arith.constant 2 : index
    %c0_321 = arith.constant 0 : index
    %c0_322 = arith.constant 0 : index
    %444 = vector.load %arg6[%c2_320, %c0_321, %c0_322] : memref<8x32x8xf32, #tpu.memory_space<vmem>>, vector<1x32x8xf32>
    %445 = vector.shape_cast %444 : vector<1x32x8xf32> to vector<32x8xf32>
    %cst_323 = arith.constant dense<0.000000e+00> : vector<16x8xf32>
    %446 = tpu.matmul %392, %445, %cst_323 {dimension_numbers = #tpu.dot_dimension_numbers<[1], [0], [0], [1], [0, 0, 1, 1], [], []>} : vector<16x32xf32>, vector<32x8xf32>, vector<16x8xf32> -> vector<16x8xf32>
    %c2_324 = arith.constant 2 : index
    %c0_325 = arith.constant 0 : index
    %c0_326 = arith.constant 0 : index
    %447 = vector.load %arg7[%c2_324, %c0_325, %c0_326] : memref<8x32x8xf32, #tpu.memory_space<vmem>>, vector<1x32x8xf32>
    %448 = vector.shape_cast %447 : vector<1x32x8xf32> to vector<32x8xf32>
    %cst_327 = arith.constant dense<0.000000e+00> : vector<16x8xf32>
    %449 = tpu.matmul %392, %448, %cst_327 {dimension_numbers = #tpu.dot_dimension_numbers<[1], [0], [0], [1], [0, 0, 1, 1], [], []>} : vector<16x32xf32>, vector<32x8xf32>, vector<16x8xf32> -> vector<16x8xf32>
    %c6_328 = arith.constant 6 : index
    %c0_329 = arith.constant 0 : index
    %c0_330 = arith.constant 0 : index
    %450 = vector.load %arg7[%c6_328, %c0_329, %c0_330] : memref<8x32x8xf32, #tpu.memory_space<vmem>>, vector<1x32x8xf32>
    %451 = vector.shape_cast %450 : vector<1x32x8xf32> to vector<32x8xf32>
    %cst_331 = arith.constant dense<0.000000e+00> : vector<16x8xf32>
    %452 = tpu.matmul %392, %451, %cst_331 {dimension_numbers = #tpu.dot_dimension_numbers<[1], [0], [0], [1], [0, 0, 1, 1], [], []>} : vector<16x32xf32>, vector<32x8xf32>, vector<16x8xf32> -> vector<16x8xf32>
    %cst_332 = arith.constant dense<0.000000e+00> : vector<16x16xf32>
    %453 = tpu.matmul %446, %449, %cst_332 {dimension_numbers = #tpu.dot_dimension_numbers<[1], [1], [0], [0], [0, 0, 1, 0], [], []>} : vector<16x8xf32>, vector<16x8xf32>, vector<16x16xf32> -> vector<16x16xf32>
    %cst_333 = arith.constant dense<0xFF800000> : vector<16xf32>
    %454 = vector.multi_reduction <maximumf>, %453, %cst_333 [1] : vector<16x16xf32> to vector<16xf32>
    %455 = vector.shape_cast %454 : vector<16xf32> to vector<16x1xf32>
    %456 = vector.broadcast %455 : vector<16x1xf32> to vector<16x16xf32>
    %457 = arith.subf %453, %456 : vector<16x16xf32>
    %458 = math.exp %457 : vector<16x16xf32>
    %cst_334 = arith.constant dense<0.000000e+00> : vector<16xf32>
    %459 = vector.multi_reduction <add>, %458, %cst_334 [1] : vector<16x16xf32> to vector<16xf32>
    %460 = vector.shape_cast %459 : vector<16xf32> to vector<16x1xf32>
    %461 = tpu.reciprocal %460 {approx = true} : vector<16x1xf32> -> vector<16x1xf32>
    %462 = vector.broadcast %461 : vector<16x1xf32> to vector<16x16xf32>
    %463 = arith.mulf %458, %462 : vector<16x16xf32>
    %cst_335 = arith.constant dense<0.000000e+00> : vector<16x8xf32>
    %464 = tpu.matmul %463, %452, %cst_335 {dimension_numbers = #tpu.dot_dimension_numbers<[1], [0], [0], [1], [0, 0, 1, 1], [], []>} : vector<16x16xf32>, vector<16x8xf32>, vector<16x8xf32> -> vector<16x8xf32>
    %c2_336 = arith.constant 2 : index
    %c0_337 = arith.constant 0 : index
    %c0_338 = arith.constant 0 : index
    %465 = vector.load %arg9[%c2_336, %c0_337, %c0_338] : memref<8x8x32xf32, #tpu.memory_space<vmem>>, vector<1x8x32xf32>
    %466 = vector.shape_cast %465 : vector<1x8x32xf32> to vector<8x32xf32>
    %cst_339 = arith.constant dense<0.000000e+00> : vector<16x32xf32>
    %467 = tpu.matmul %464, %466, %cst_339 {dimension_numbers = #tpu.dot_dimension_numbers<[1], [0], [0], [1], [0, 0, 1, 1], [], []>} : vector<16x8xf32>, vector<8x32xf32>, vector<16x32xf32> -> vector<16x32xf32>
    %468 = arith.addf %443, %467 : vector<16x32xf32>
    %c3_340 = arith.constant 3 : index
    %c0_341 = arith.constant 0 : index
    %c0_342 = arith.constant 0 : index
    %469 = vector.load %arg6[%c3_340, %c0_341, %c0_342] : memref<8x32x8xf32, #tpu.memory_space<vmem>>, vector<1x32x8xf32>
    %470 = vector.shape_cast %469 : vector<1x32x8xf32> to vector<32x8xf32>
    %cst_343 = arith.constant dense<0.000000e+00> : vector<16x8xf32>
    %471 = tpu.matmul %392, %470, %cst_343 {dimension_numbers = #tpu.dot_dimension_numbers<[1], [0], [0], [1], [0, 0, 1, 1], [], []>} : vector<16x32xf32>, vector<32x8xf32>, vector<16x8xf32> -> vector<16x8xf32>
    %c3_344 = arith.constant 3 : index
    %c0_345 = arith.constant 0 : index
    %c0_346 = arith.constant 0 : index
    %472 = vector.load %arg7[%c3_344, %c0_345, %c0_346] : memref<8x32x8xf32, #tpu.memory_space<vmem>>, vector<1x32x8xf32>
    %473 = vector.shape_cast %472 : vector<1x32x8xf32> to vector<32x8xf32>
    %cst_347 = arith.constant dense<0.000000e+00> : vector<16x8xf32>
    %474 = tpu.matmul %392, %473, %cst_347 {dimension_numbers = #tpu.dot_dimension_numbers<[1], [0], [0], [1], [0, 0, 1, 1], [], []>} : vector<16x32xf32>, vector<32x8xf32>, vector<16x8xf32> -> vector<16x8xf32>
    %c7_348 = arith.constant 7 : index
    %c0_349 = arith.constant 0 : index
    %c0_350 = arith.constant 0 : index
    %475 = vector.load %arg7[%c7_348, %c0_349, %c0_350] : memref<8x32x8xf32, #tpu.memory_space<vmem>>, vector<1x32x8xf32>
    %476 = vector.shape_cast %475 : vector<1x32x8xf32> to vector<32x8xf32>
    %cst_351 = arith.constant dense<0.000000e+00> : vector<16x8xf32>
    %477 = tpu.matmul %392, %476, %cst_351 {dimension_numbers = #tpu.dot_dimension_numbers<[1], [0], [0], [1], [0, 0, 1, 1], [], []>} : vector<16x32xf32>, vector<32x8xf32>, vector<16x8xf32> -> vector<16x8xf32>
    %cst_352 = arith.constant dense<0.000000e+00> : vector<16x16xf32>
    %478 = tpu.matmul %471, %474, %cst_352 {dimension_numbers = #tpu.dot_dimension_numbers<[1], [1], [0], [0], [0, 0, 1, 0], [], []>} : vector<16x8xf32>, vector<16x8xf32>, vector<16x16xf32> -> vector<16x16xf32>
    %cst_353 = arith.constant dense<0xFF800000> : vector<16xf32>
    %479 = vector.multi_reduction <maximumf>, %478, %cst_353 [1] : vector<16x16xf32> to vector<16xf32>
    %480 = vector.shape_cast %479 : vector<16xf32> to vector<16x1xf32>
    %481 = vector.broadcast %480 : vector<16x1xf32> to vector<16x16xf32>
    %482 = arith.subf %478, %481 : vector<16x16xf32>
    %483 = math.exp %482 : vector<16x16xf32>
    %cst_354 = arith.constant dense<0.000000e+00> : vector<16xf32>
    %484 = vector.multi_reduction <add>, %483, %cst_354 [1] : vector<16x16xf32> to vector<16xf32>
    %485 = vector.shape_cast %484 : vector<16xf32> to vector<16x1xf32>
    %486 = tpu.reciprocal %485 {approx = true} : vector<16x1xf32> -> vector<16x1xf32>
    %487 = vector.broadcast %486 : vector<16x1xf32> to vector<16x16xf32>
    %488 = arith.mulf %483, %487 : vector<16x16xf32>
    %cst_355 = arith.constant dense<0.000000e+00> : vector<16x8xf32>
    %489 = tpu.matmul %488, %477, %cst_355 {dimension_numbers = #tpu.dot_dimension_numbers<[1], [0], [0], [1], [0, 0, 1, 1], [], []>} : vector<16x16xf32>, vector<16x8xf32>, vector<16x8xf32> -> vector<16x8xf32>
    %c3_356 = arith.constant 3 : index
    %c0_357 = arith.constant 0 : index
    %c0_358 = arith.constant 0 : index
    %490 = vector.load %arg9[%c3_356, %c0_357, %c0_358] : memref<8x8x32xf32, #tpu.memory_space<vmem>>, vector<1x8x32xf32>
    %491 = vector.shape_cast %490 : vector<1x8x32xf32> to vector<8x32xf32>
    %cst_359 = arith.constant dense<0.000000e+00> : vector<16x32xf32>
    %492 = tpu.matmul %489, %491, %cst_359 {dimension_numbers = #tpu.dot_dimension_numbers<[1], [0], [0], [1], [0, 0, 1, 1], [], []>} : vector<16x8xf32>, vector<8x32xf32>, vector<16x32xf32> -> vector<16x32xf32>
    %493 = arith.addf %468, %492 : vector<16x32xf32>
    %c0_360 = arith.constant 0 : index
    %c0_361 = arith.constant 0 : index
    %c0_362 = arith.constant 0 : index
    %494 = vector.load %arg10[%c0_360, %c0_361, %c0_362] : memref<3x1x32xf32, #tpu.memory_space<vmem>>, vector<1x1x32xf32>
    %495 = vector.shape_cast %494 : vector<1x1x32xf32> to vector<1x32xf32>
    %496 = vector.broadcast %495 : vector<1x32xf32> to vector<16x32xf32>
    %497 = arith.addf %493, %496 : vector<16x32xf32>
    %498 = arith.addf %354, %497 : vector<16x32xf32>
    %c2_363 = arith.constant 2 : index
    %c0_364 = arith.constant 0 : index
    %c0_365 = arith.constant 0 : index
    %499 = vector.load %arg4[%c2_363, %c0_364, %c0_365] : memref<6x32x32xf32, #tpu.memory_space<vmem>>, vector<1x32x32xf32>
    %500 = vector.shape_cast %499 : vector<1x32x32xf32> to vector<32x32xf32>
    %cst_366 = arith.constant dense<0.000000e+00> : vector<1x32xf32>
    %501 = tpu.matmul %356, %500, %cst_366 {dimension_numbers = #tpu.dot_dimension_numbers<[1], [0], [0], [1], [0, 0, 1, 1], [], []>} : vector<1x32xf32>, vector<32x32xf32>, vector<1x32xf32> -> vector<1x32xf32>
    %c2_367 = arith.constant 2 : index
    %c0_368 = arith.constant 0 : index
    %c0_369 = arith.constant 0 : index
    %502 = vector.load %arg5[%c2_367, %c0_368, %c0_369] : memref<6x1x32xf32, #tpu.memory_space<vmem>>, vector<1x1x32xf32>
    %503 = vector.shape_cast %502 : vector<1x1x32xf32> to vector<1x32xf32>
    %504 = arith.addf %501, %503 : vector<1x32xf32>
    %c3_370 = arith.constant 3 : index
    %c0_371 = arith.constant 0 : index
    %c0_372 = arith.constant 0 : index
    %505 = vector.load %arg4[%c3_370, %c0_371, %c0_372] : memref<6x32x32xf32, #tpu.memory_space<vmem>>, vector<1x32x32xf32>
    %506 = vector.shape_cast %505 : vector<1x32x32xf32> to vector<32x32xf32>
    %cst_373 = arith.constant dense<0.000000e+00> : vector<1x32xf32>
    %507 = tpu.matmul %356, %506, %cst_373 {dimension_numbers = #tpu.dot_dimension_numbers<[1], [0], [0], [1], [0, 0, 1, 1], [], []>} : vector<1x32xf32>, vector<32x32xf32>, vector<1x32xf32> -> vector<1x32xf32>
    %c3_374 = arith.constant 3 : index
    %c0_375 = arith.constant 0 : index
    %c0_376 = arith.constant 0 : index
    %508 = vector.load %arg5[%c3_374, %c0_375, %c0_376] : memref<6x1x32xf32, #tpu.memory_space<vmem>>, vector<1x1x32xf32>
    %509 = vector.shape_cast %508 : vector<1x1x32xf32> to vector<1x32xf32>
    %510 = arith.addf %507, %509 : vector<1x32xf32>
    %cst_377 = arith.constant dense<0.000000e+00> : vector<16xf32>
    %511 = vector.multi_reduction <add>, %498, %cst_377 [1] : vector<16x32xf32> to vector<16xf32>
    %512 = vector.shape_cast %511 : vector<16xf32> to vector<16x1xf32>
    %cst_378 = arith.constant 3.200000e+01 : f32
    %513 = vector.broadcast %cst_378 : f32 to vector<16x1xf32>
    %514 = arith.divf %512, %513 : vector<16x1xf32>
    %515 = vector.broadcast %514 : vector<16x1xf32> to vector<16x32xf32>
    %516 = arith.subf %498, %515 : vector<16x32xf32>
    %517 = arith.mulf %516, %516 : vector<16x32xf32>
    %cst_379 = arith.constant dense<0.000000e+00> : vector<16xf32>
    %518 = vector.multi_reduction <add>, %517, %cst_379 [1] : vector<16x32xf32> to vector<16xf32>
    %519 = vector.shape_cast %518 : vector<16xf32> to vector<16x1xf32>
    %cst_380 = arith.constant 3.200000e+01 : f32
    %520 = vector.broadcast %cst_380 : f32 to vector<16x1xf32>
    %521 = arith.divf %519, %520 : vector<16x1xf32>
    %522 = vector.broadcast %514 : vector<16x1xf32> to vector<16x32xf32>
    %523 = arith.subf %498, %522 : vector<16x32xf32>
    %cst_381 = arith.constant 9.99999974E-6 : f32
    %524 = vector.broadcast %cst_381 : f32 to vector<16x1xf32>
    %525 = arith.addf %521, %524 : vector<16x1xf32>
    %526 = math.rsqrt %525 : vector<16x1xf32>
    %527 = vector.broadcast %526 : vector<16x1xf32> to vector<16x32xf32>
    %528 = arith.mulf %523, %527 : vector<16x32xf32>
    %529 = vector.broadcast %504 : vector<1x32xf32> to vector<16x32xf32>
    %530 = arith.mulf %528, %529 : vector<16x32xf32>
    %531 = vector.broadcast %510 : vector<1x32xf32> to vector<16x32xf32>
    %532 = arith.addf %530, %531 : vector<16x32xf32>
    %cst_382 = arith.constant 0.000000e+00 : f32
    %533 = vector.broadcast %cst_382 : f32 to vector<16x32xf32>
    %c4_383 = arith.constant 4 : index
    %c0_384 = arith.constant 0 : index
    %c0_385 = arith.constant 0 : index
    %534 = vector.load %arg6[%c4_383, %c0_384, %c0_385] : memref<8x32x8xf32, #tpu.memory_space<vmem>>, vector<1x32x8xf32>
    %535 = vector.shape_cast %534 : vector<1x32x8xf32> to vector<32x8xf32>
    %cst_386 = arith.constant dense<0.000000e+00> : vector<16x8xf32>
    %536 = tpu.matmul %532, %535, %cst_386 {dimension_numbers = #tpu.dot_dimension_numbers<[1], [0], [0], [1], [0, 0, 1, 1], [], []>} : vector<16x32xf32>, vector<32x8xf32>, vector<16x8xf32> -> vector<16x8xf32>
    %c0_387 = arith.constant 0 : index
    %c0_388 = arith.constant 0 : index
    %c0_389 = arith.constant 0 : index
    %537 = vector.load %arg8[%c0_387, %c0_388, %c0_389] : memref<8x16x8xf32, #tpu.memory_space<vmem>>, vector<1x16x8xf32>
    %538 = vector.shape_cast %537 : vector<1x16x8xf32> to vector<16x8xf32>
    %cst_390 = arith.constant dense<0.000000e+00> : vector<8x8xf32>
    %539 = tpu.matmul %358, %538, %cst_390 {dimension_numbers = #tpu.dot_dimension_numbers<[1], [0], [0], [1], [0, 0, 1, 1], [], []>} : vector<8x16xf32>, vector<16x8xf32>, vector<8x8xf32> -> vector<8x8xf32>
    %c4_391 = arith.constant 4 : index
    %c0_392 = arith.constant 0 : index
    %c0_393 = arith.constant 0 : index
    %540 = vector.load %arg8[%c4_391, %c0_392, %c0_393] : memref<8x16x8xf32, #tpu.memory_space<vmem>>, vector<1x16x8xf32>
    %541 = vector.shape_cast %540 : vector<1x16x8xf32> to vector<16x8xf32>
    %cst_394 = arith.constant dense<0.000000e+00> : vector<8x8xf32>
    %542 = tpu.matmul %358, %541, %cst_394 {dimension_numbers = #tpu.dot_dimension_numbers<[1], [0], [0], [1], [0, 0, 1, 1], [], []>} : vector<8x16xf32>, vector<16x8xf32>, vector<8x8xf32> -> vector<8x8xf32>
    %cst_395 = arith.constant dense<0.000000e+00> : vector<16x8xf32>
    %543 = tpu.matmul %536, %539, %cst_395 {dimension_numbers = #tpu.dot_dimension_numbers<[1], [1], [0], [0], [0, 0, 1, 0], [], []>} : vector<16x8xf32>, vector<8x8xf32>, vector<16x8xf32> -> vector<16x8xf32>
    %cst_396 = arith.constant dense<0xFF800000> : vector<16xf32>
    %544 = vector.multi_reduction <maximumf>, %543, %cst_396 [1] : vector<16x8xf32> to vector<16xf32>
    %545 = vector.shape_cast %544 : vector<16xf32> to vector<16x1xf32>
    %546 = vector.broadcast %545 : vector<16x1xf32> to vector<16x8xf32>
    %547 = arith.subf %543, %546 : vector<16x8xf32>
    %548 = math.exp %547 : vector<16x8xf32>
    %cst_397 = arith.constant dense<0.000000e+00> : vector<16xf32>
    %549 = vector.multi_reduction <add>, %548, %cst_397 [1] : vector<16x8xf32> to vector<16xf32>
    %550 = vector.shape_cast %549 : vector<16xf32> to vector<16x1xf32>
    %551 = tpu.reciprocal %550 {approx = true} : vector<16x1xf32> -> vector<16x1xf32>
    %552 = vector.broadcast %551 : vector<16x1xf32> to vector<16x8xf32>
    %553 = arith.mulf %548, %552 : vector<16x8xf32>
    %cst_398 = arith.constant dense<0.000000e+00> : vector<16x8xf32>
    %554 = tpu.matmul %553, %542, %cst_398 {dimension_numbers = #tpu.dot_dimension_numbers<[1], [0], [0], [1], [0, 0, 1, 1], [], []>} : vector<16x8xf32>, vector<8x8xf32>, vector<16x8xf32> -> vector<16x8xf32>
    %c4_399 = arith.constant 4 : index
    %c0_400 = arith.constant 0 : index
    %c0_401 = arith.constant 0 : index
    %555 = vector.load %arg9[%c4_399, %c0_400, %c0_401] : memref<8x8x32xf32, #tpu.memory_space<vmem>>, vector<1x8x32xf32>
    %556 = vector.shape_cast %555 : vector<1x8x32xf32> to vector<8x32xf32>
    %cst_402 = arith.constant dense<0.000000e+00> : vector<16x32xf32>
    %557 = tpu.matmul %554, %556, %cst_402 {dimension_numbers = #tpu.dot_dimension_numbers<[1], [0], [0], [1], [0, 0, 1, 1], [], []>} : vector<16x8xf32>, vector<8x32xf32>, vector<16x32xf32> -> vector<16x32xf32>
    %558 = arith.addf %533, %557 : vector<16x32xf32>
    %c5_403 = arith.constant 5 : index
    %c0_404 = arith.constant 0 : index
    %c0_405 = arith.constant 0 : index
    %559 = vector.load %arg6[%c5_403, %c0_404, %c0_405] : memref<8x32x8xf32, #tpu.memory_space<vmem>>, vector<1x32x8xf32>
    %560 = vector.shape_cast %559 : vector<1x32x8xf32> to vector<32x8xf32>
    %cst_406 = arith.constant dense<0.000000e+00> : vector<16x8xf32>
    %561 = tpu.matmul %532, %560, %cst_406 {dimension_numbers = #tpu.dot_dimension_numbers<[1], [0], [0], [1], [0, 0, 1, 1], [], []>} : vector<16x32xf32>, vector<32x8xf32>, vector<16x8xf32> -> vector<16x8xf32>
    %c1_407 = arith.constant 1 : index
    %c0_408 = arith.constant 0 : index
    %c0_409 = arith.constant 0 : index
    %562 = vector.load %arg8[%c1_407, %c0_408, %c0_409] : memref<8x16x8xf32, #tpu.memory_space<vmem>>, vector<1x16x8xf32>
    %563 = vector.shape_cast %562 : vector<1x16x8xf32> to vector<16x8xf32>
    %cst_410 = arith.constant dense<0.000000e+00> : vector<8x8xf32>
    %564 = tpu.matmul %358, %563, %cst_410 {dimension_numbers = #tpu.dot_dimension_numbers<[1], [0], [0], [1], [0, 0, 1, 1], [], []>} : vector<8x16xf32>, vector<16x8xf32>, vector<8x8xf32> -> vector<8x8xf32>
    %c5_411 = arith.constant 5 : index
    %c0_412 = arith.constant 0 : index
    %c0_413 = arith.constant 0 : index
    %565 = vector.load %arg8[%c5_411, %c0_412, %c0_413] : memref<8x16x8xf32, #tpu.memory_space<vmem>>, vector<1x16x8xf32>
    %566 = vector.shape_cast %565 : vector<1x16x8xf32> to vector<16x8xf32>
    %cst_414 = arith.constant dense<0.000000e+00> : vector<8x8xf32>
    %567 = tpu.matmul %358, %566, %cst_414 {dimension_numbers = #tpu.dot_dimension_numbers<[1], [0], [0], [1], [0, 0, 1, 1], [], []>} : vector<8x16xf32>, vector<16x8xf32>, vector<8x8xf32> -> vector<8x8xf32>
    %cst_415 = arith.constant dense<0.000000e+00> : vector<16x8xf32>
    %568 = tpu.matmul %561, %564, %cst_415 {dimension_numbers = #tpu.dot_dimension_numbers<[1], [1], [0], [0], [0, 0, 1, 0], [], []>} : vector<16x8xf32>, vector<8x8xf32>, vector<16x8xf32> -> vector<16x8xf32>
    %cst_416 = arith.constant dense<0xFF800000> : vector<16xf32>
    %569 = vector.multi_reduction <maximumf>, %568, %cst_416 [1] : vector<16x8xf32> to vector<16xf32>
    %570 = vector.shape_cast %569 : vector<16xf32> to vector<16x1xf32>
    %571 = vector.broadcast %570 : vector<16x1xf32> to vector<16x8xf32>
    %572 = arith.subf %568, %571 : vector<16x8xf32>
    %573 = math.exp %572 : vector<16x8xf32>
    %cst_417 = arith.constant dense<0.000000e+00> : vector<16xf32>
    %574 = vector.multi_reduction <add>, %573, %cst_417 [1] : vector<16x8xf32> to vector<16xf32>
    %575 = vector.shape_cast %574 : vector<16xf32> to vector<16x1xf32>
    %576 = tpu.reciprocal %575 {approx = true} : vector<16x1xf32> -> vector<16x1xf32>
    %577 = vector.broadcast %576 : vector<16x1xf32> to vector<16x8xf32>
    %578 = arith.mulf %573, %577 : vector<16x8xf32>
    %cst_418 = arith.constant dense<0.000000e+00> : vector<16x8xf32>
    %579 = tpu.matmul %578, %567, %cst_418 {dimension_numbers = #tpu.dot_dimension_numbers<[1], [0], [0], [1], [0, 0, 1, 1], [], []>} : vector<16x8xf32>, vector<8x8xf32>, vector<16x8xf32> -> vector<16x8xf32>
    %c5_419 = arith.constant 5 : index
    %c0_420 = arith.constant 0 : index
    %c0_421 = arith.constant 0 : index
    %580 = vector.load %arg9[%c5_419, %c0_420, %c0_421] : memref<8x8x32xf32, #tpu.memory_space<vmem>>, vector<1x8x32xf32>
    %581 = vector.shape_cast %580 : vector<1x8x32xf32> to vector<8x32xf32>
    %cst_422 = arith.constant dense<0.000000e+00> : vector<16x32xf32>
    %582 = tpu.matmul %579, %581, %cst_422 {dimension_numbers = #tpu.dot_dimension_numbers<[1], [0], [0], [1], [0, 0, 1, 1], [], []>} : vector<16x8xf32>, vector<8x32xf32>, vector<16x32xf32> -> vector<16x32xf32>
    %583 = arith.addf %558, %582 : vector<16x32xf32>
    %c6_423 = arith.constant 6 : index
    %c0_424 = arith.constant 0 : index
    %c0_425 = arith.constant 0 : index
    %584 = vector.load %arg6[%c6_423, %c0_424, %c0_425] : memref<8x32x8xf32, #tpu.memory_space<vmem>>, vector<1x32x8xf32>
    %585 = vector.shape_cast %584 : vector<1x32x8xf32> to vector<32x8xf32>
    %cst_426 = arith.constant dense<0.000000e+00> : vector<16x8xf32>
    %586 = tpu.matmul %532, %585, %cst_426 {dimension_numbers = #tpu.dot_dimension_numbers<[1], [0], [0], [1], [0, 0, 1, 1], [], []>} : vector<16x32xf32>, vector<32x8xf32>, vector<16x8xf32> -> vector<16x8xf32>
    %c2_427 = arith.constant 2 : index
    %c0_428 = arith.constant 0 : index
    %c0_429 = arith.constant 0 : index
    %587 = vector.load %arg8[%c2_427, %c0_428, %c0_429] : memref<8x16x8xf32, #tpu.memory_space<vmem>>, vector<1x16x8xf32>
    %588 = vector.shape_cast %587 : vector<1x16x8xf32> to vector<16x8xf32>
    %cst_430 = arith.constant dense<0.000000e+00> : vector<8x8xf32>
    %589 = tpu.matmul %358, %588, %cst_430 {dimension_numbers = #tpu.dot_dimension_numbers<[1], [0], [0], [1], [0, 0, 1, 1], [], []>} : vector<8x16xf32>, vector<16x8xf32>, vector<8x8xf32> -> vector<8x8xf32>
    %c6_431 = arith.constant 6 : index
    %c0_432 = arith.constant 0 : index
    %c0_433 = arith.constant 0 : index
    %590 = vector.load %arg8[%c6_431, %c0_432, %c0_433] : memref<8x16x8xf32, #tpu.memory_space<vmem>>, vector<1x16x8xf32>
    %591 = vector.shape_cast %590 : vector<1x16x8xf32> to vector<16x8xf32>
    %cst_434 = arith.constant dense<0.000000e+00> : vector<8x8xf32>
    %592 = tpu.matmul %358, %591, %cst_434 {dimension_numbers = #tpu.dot_dimension_numbers<[1], [0], [0], [1], [0, 0, 1, 1], [], []>} : vector<8x16xf32>, vector<16x8xf32>, vector<8x8xf32> -> vector<8x8xf32>
    %cst_435 = arith.constant dense<0.000000e+00> : vector<16x8xf32>
    %593 = tpu.matmul %586, %589, %cst_435 {dimension_numbers = #tpu.dot_dimension_numbers<[1], [1], [0], [0], [0, 0, 1, 0], [], []>} : vector<16x8xf32>, vector<8x8xf32>, vector<16x8xf32> -> vector<16x8xf32>
    %cst_436 = arith.constant dense<0xFF800000> : vector<16xf32>
    %594 = vector.multi_reduction <maximumf>, %593, %cst_436 [1] : vector<16x8xf32> to vector<16xf32>
    %595 = vector.shape_cast %594 : vector<16xf32> to vector<16x1xf32>
    %596 = vector.broadcast %595 : vector<16x1xf32> to vector<16x8xf32>
    %597 = arith.subf %593, %596 : vector<16x8xf32>
    %598 = math.exp %597 : vector<16x8xf32>
    %cst_437 = arith.constant dense<0.000000e+00> : vector<16xf32>
    %599 = vector.multi_reduction <add>, %598, %cst_437 [1] : vector<16x8xf32> to vector<16xf32>
    %600 = vector.shape_cast %599 : vector<16xf32> to vector<16x1xf32>
    %601 = tpu.reciprocal %600 {approx = true} : vector<16x1xf32> -> vector<16x1xf32>
    %602 = vector.broadcast %601 : vector<16x1xf32> to vector<16x8xf32>
    %603 = arith.mulf %598, %602 : vector<16x8xf32>
    %cst_438 = arith.constant dense<0.000000e+00> : vector<16x8xf32>
    %604 = tpu.matmul %603, %592, %cst_438 {dimension_numbers = #tpu.dot_dimension_numbers<[1], [0], [0], [1], [0, 0, 1, 1], [], []>} : vector<16x8xf32>, vector<8x8xf32>, vector<16x8xf32> -> vector<16x8xf32>
    %c6_439 = arith.constant 6 : index
    %c0_440 = arith.constant 0 : index
    %c0_441 = arith.constant 0 : index
    %605 = vector.load %arg9[%c6_439, %c0_440, %c0_441] : memref<8x8x32xf32, #tpu.memory_space<vmem>>, vector<1x8x32xf32>
    %606 = vector.shape_cast %605 : vector<1x8x32xf32> to vector<8x32xf32>
    %cst_442 = arith.constant dense<0.000000e+00> : vector<16x32xf32>
    %607 = tpu.matmul %604, %606, %cst_442 {dimension_numbers = #tpu.dot_dimension_numbers<[1], [0], [0], [1], [0, 0, 1, 1], [], []>} : vector<16x8xf32>, vector<8x32xf32>, vector<16x32xf32> -> vector<16x32xf32>
    %608 = arith.addf %583, %607 : vector<16x32xf32>
    %c7_443 = arith.constant 7 : index
    %c0_444 = arith.constant 0 : index
    %c0_445 = arith.constant 0 : index
    %609 = vector.load %arg6[%c7_443, %c0_444, %c0_445] : memref<8x32x8xf32, #tpu.memory_space<vmem>>, vector<1x32x8xf32>
    %610 = vector.shape_cast %609 : vector<1x32x8xf32> to vector<32x8xf32>
    %cst_446 = arith.constant dense<0.000000e+00> : vector<16x8xf32>
    %611 = tpu.matmul %532, %610, %cst_446 {dimension_numbers = #tpu.dot_dimension_numbers<[1], [0], [0], [1], [0, 0, 1, 1], [], []>} : vector<16x32xf32>, vector<32x8xf32>, vector<16x8xf32> -> vector<16x8xf32>
    %c3_447 = arith.constant 3 : index
    %c0_448 = arith.constant 0 : index
    %c0_449 = arith.constant 0 : index
    %612 = vector.load %arg8[%c3_447, %c0_448, %c0_449] : memref<8x16x8xf32, #tpu.memory_space<vmem>>, vector<1x16x8xf32>
    %613 = vector.shape_cast %612 : vector<1x16x8xf32> to vector<16x8xf32>
    %cst_450 = arith.constant dense<0.000000e+00> : vector<8x8xf32>
    %614 = tpu.matmul %358, %613, %cst_450 {dimension_numbers = #tpu.dot_dimension_numbers<[1], [0], [0], [1], [0, 0, 1, 1], [], []>} : vector<8x16xf32>, vector<16x8xf32>, vector<8x8xf32> -> vector<8x8xf32>
    %c7_451 = arith.constant 7 : index
    %c0_452 = arith.constant 0 : index
    %c0_453 = arith.constant 0 : index
    %615 = vector.load %arg8[%c7_451, %c0_452, %c0_453] : memref<8x16x8xf32, #tpu.memory_space<vmem>>, vector<1x16x8xf32>
    %616 = vector.shape_cast %615 : vector<1x16x8xf32> to vector<16x8xf32>
    %cst_454 = arith.constant dense<0.000000e+00> : vector<8x8xf32>
    %617 = tpu.matmul %358, %616, %cst_454 {dimension_numbers = #tpu.dot_dimension_numbers<[1], [0], [0], [1], [0, 0, 1, 1], [], []>} : vector<8x16xf32>, vector<16x8xf32>, vector<8x8xf32> -> vector<8x8xf32>
    %cst_455 = arith.constant dense<0.000000e+00> : vector<16x8xf32>
    %618 = tpu.matmul %611, %614, %cst_455 {dimension_numbers = #tpu.dot_dimension_numbers<[1], [1], [0], [0], [0, 0, 1, 0], [], []>} : vector<16x8xf32>, vector<8x8xf32>, vector<16x8xf32> -> vector<16x8xf32>
    %cst_456 = arith.constant dense<0xFF800000> : vector<16xf32>
    %619 = vector.multi_reduction <maximumf>, %618, %cst_456 [1] : vector<16x8xf32> to vector<16xf32>
    %620 = vector.shape_cast %619 : vector<16xf32> to vector<16x1xf32>
    %621 = vector.broadcast %620 : vector<16x1xf32> to vector<16x8xf32>
    %622 = arith.subf %618, %621 : vector<16x8xf32>
    %623 = math.exp %622 : vector<16x8xf32>
    %cst_457 = arith.constant dense<0.000000e+00> : vector<16xf32>
    %624 = vector.multi_reduction <add>, %623, %cst_457 [1] : vector<16x8xf32> to vector<16xf32>
    %625 = vector.shape_cast %624 : vector<16xf32> to vector<16x1xf32>
    %626 = tpu.reciprocal %625 {approx = true} : vector<16x1xf32> -> vector<16x1xf32>
    %627 = vector.broadcast %626 : vector<16x1xf32> to vector<16x8xf32>
    %628 = arith.mulf %623, %627 : vector<16x8xf32>
    %cst_458 = arith.constant dense<0.000000e+00> : vector<16x8xf32>
    %629 = tpu.matmul %628, %617, %cst_458 {dimension_numbers = #tpu.dot_dimension_numbers<[1], [0], [0], [1], [0, 0, 1, 1], [], []>} : vector<16x8xf32>, vector<8x8xf32>, vector<16x8xf32> -> vector<16x8xf32>
    %c7_459 = arith.constant 7 : index
    %c0_460 = arith.constant 0 : index
    %c0_461 = arith.constant 0 : index
    %630 = vector.load %arg9[%c7_459, %c0_460, %c0_461] : memref<8x8x32xf32, #tpu.memory_space<vmem>>, vector<1x8x32xf32>
    %631 = vector.shape_cast %630 : vector<1x8x32xf32> to vector<8x32xf32>
    %cst_462 = arith.constant dense<0.000000e+00> : vector<16x32xf32>
    %632 = tpu.matmul %629, %631, %cst_462 {dimension_numbers = #tpu.dot_dimension_numbers<[1], [0], [0], [1], [0, 0, 1, 1], [], []>} : vector<16x8xf32>, vector<8x32xf32>, vector<16x32xf32> -> vector<16x32xf32>
    %633 = arith.addf %608, %632 : vector<16x32xf32>
    %c1_463 = arith.constant 1 : index
    %c0_464 = arith.constant 0 : index
    %c0_465 = arith.constant 0 : index
    %634 = vector.load %arg10[%c1_463, %c0_464, %c0_465] : memref<3x1x32xf32, #tpu.memory_space<vmem>>, vector<1x1x32xf32>
    %635 = vector.shape_cast %634 : vector<1x1x32xf32> to vector<1x32xf32>
    %636 = vector.broadcast %635 : vector<1x32xf32> to vector<16x32xf32>
    %637 = arith.addf %633, %636 : vector<16x32xf32>
    %638 = arith.addf %498, %637 : vector<16x32xf32>
    %c4_466 = arith.constant 4 : index
    %c0_467 = arith.constant 0 : index
    %c0_468 = arith.constant 0 : index
    %639 = vector.load %arg4[%c4_466, %c0_467, %c0_468] : memref<6x32x32xf32, #tpu.memory_space<vmem>>, vector<1x32x32xf32>
    %640 = vector.shape_cast %639 : vector<1x32x32xf32> to vector<32x32xf32>
    %cst_469 = arith.constant dense<0.000000e+00> : vector<1x32xf32>
    %641 = tpu.matmul %356, %640, %cst_469 {dimension_numbers = #tpu.dot_dimension_numbers<[1], [0], [0], [1], [0, 0, 1, 1], [], []>} : vector<1x32xf32>, vector<32x32xf32>, vector<1x32xf32> -> vector<1x32xf32>
    %c4_470 = arith.constant 4 : index
    %c0_471 = arith.constant 0 : index
    %c0_472 = arith.constant 0 : index
    %642 = vector.load %arg5[%c4_470, %c0_471, %c0_472] : memref<6x1x32xf32, #tpu.memory_space<vmem>>, vector<1x1x32xf32>
    %643 = vector.shape_cast %642 : vector<1x1x32xf32> to vector<1x32xf32>
    %644 = arith.addf %641, %643 : vector<1x32xf32>
    %c5_473 = arith.constant 5 : index
    %c0_474 = arith.constant 0 : index
    %c0_475 = arith.constant 0 : index
    %645 = vector.load %arg4[%c5_473, %c0_474, %c0_475] : memref<6x32x32xf32, #tpu.memory_space<vmem>>, vector<1x32x32xf32>
    %646 = vector.shape_cast %645 : vector<1x32x32xf32> to vector<32x32xf32>
    %cst_476 = arith.constant dense<0.000000e+00> : vector<1x32xf32>
    %647 = tpu.matmul %356, %646, %cst_476 {dimension_numbers = #tpu.dot_dimension_numbers<[1], [0], [0], [1], [0, 0, 1, 1], [], []>} : vector<1x32xf32>, vector<32x32xf32>, vector<1x32xf32> -> vector<1x32xf32>
    %c5_477 = arith.constant 5 : index
    %c0_478 = arith.constant 0 : index
    %c0_479 = arith.constant 0 : index
    %648 = vector.load %arg5[%c5_477, %c0_478, %c0_479] : memref<6x1x32xf32, #tpu.memory_space<vmem>>, vector<1x1x32xf32>
    %649 = vector.shape_cast %648 : vector<1x1x32xf32> to vector<1x32xf32>
    %650 = arith.addf %647, %649 : vector<1x32xf32>
    %cst_480 = arith.constant dense<0.000000e+00> : vector<16xf32>
    %651 = vector.multi_reduction <add>, %638, %cst_480 [1] : vector<16x32xf32> to vector<16xf32>
    %652 = vector.shape_cast %651 : vector<16xf32> to vector<16x1xf32>
    %cst_481 = arith.constant 3.200000e+01 : f32
    %653 = vector.broadcast %cst_481 : f32 to vector<16x1xf32>
    %654 = arith.divf %652, %653 : vector<16x1xf32>
    %655 = vector.broadcast %654 : vector<16x1xf32> to vector<16x32xf32>
    %656 = arith.subf %638, %655 : vector<16x32xf32>
    %657 = arith.mulf %656, %656 : vector<16x32xf32>
    %cst_482 = arith.constant dense<0.000000e+00> : vector<16xf32>
    %658 = vector.multi_reduction <add>, %657, %cst_482 [1] : vector<16x32xf32> to vector<16xf32>
    %659 = vector.shape_cast %658 : vector<16xf32> to vector<16x1xf32>
    %cst_483 = arith.constant 3.200000e+01 : f32
    %660 = vector.broadcast %cst_483 : f32 to vector<16x1xf32>
    %661 = arith.divf %659, %660 : vector<16x1xf32>
    %662 = vector.broadcast %654 : vector<16x1xf32> to vector<16x32xf32>
    %663 = arith.subf %638, %662 : vector<16x32xf32>
    %cst_484 = arith.constant 9.99999974E-6 : f32
    %664 = vector.broadcast %cst_484 : f32 to vector<16x1xf32>
    %665 = arith.addf %661, %664 : vector<16x1xf32>
    %666 = math.rsqrt %665 : vector<16x1xf32>
    %667 = vector.broadcast %666 : vector<16x1xf32> to vector<16x32xf32>
    %668 = arith.mulf %663, %667 : vector<16x32xf32>
    %669 = vector.broadcast %644 : vector<1x32xf32> to vector<16x32xf32>
    %670 = arith.mulf %668, %669 : vector<16x32xf32>
    %671 = vector.broadcast %650 : vector<1x32xf32> to vector<16x32xf32>
    %672 = arith.addf %670, %671 : vector<16x32xf32>
    %c0_485 = arith.constant 0 : index
    %c0_486 = arith.constant 0 : index
    %c0_487 = arith.constant 0 : index
    %673 = vector.load %arg11[%c0_485, %c0_486, %c0_487] : memref<2x32x128xf32, #tpu.memory_space<vmem>>, vector<1x32x128xf32>
    %674 = vector.shape_cast %673 : vector<1x32x128xf32> to vector<32x128xf32>
    %cst_488 = arith.constant dense<0.000000e+00> : vector<16x128xf32>
    %675 = tpu.matmul %672, %674, %cst_488 {dimension_numbers = #tpu.dot_dimension_numbers<[1], [0], [0], [1], [0, 0, 1, 1], [], []>} : vector<16x32xf32>, vector<32x128xf32>, vector<16x128xf32> -> vector<16x128xf32>
    %c0_489 = arith.constant 0 : index
    %c0_490 = arith.constant 0 : index
    %c0_491 = arith.constant 0 : index
    %676 = vector.load %arg12[%c0_489, %c0_490, %c0_491] : memref<2x1x128xf32, #tpu.memory_space<vmem>>, vector<1x1x128xf32>
    %677 = vector.shape_cast %676 : vector<1x1x128xf32> to vector<1x128xf32>
    %678 = vector.broadcast %677 : vector<1x128xf32> to vector<16x128xf32>
    %679 = arith.addf %675, %678 : vector<16x128xf32>
    %c1_492 = arith.constant 1 : index
    %c0_493 = arith.constant 0 : index
    %c0_494 = arith.constant 0 : index
    %680 = vector.load %arg11[%c1_492, %c0_493, %c0_494] : memref<2x32x128xf32, #tpu.memory_space<vmem>>, vector<1x32x128xf32>
    %681 = vector.shape_cast %680 : vector<1x32x128xf32> to vector<32x128xf32>
    %cst_495 = arith.constant dense<0.000000e+00> : vector<16x128xf32>
    %682 = tpu.matmul %672, %681, %cst_495 {dimension_numbers = #tpu.dot_dimension_numbers<[1], [0], [0], [1], [0, 0, 1, 1], [], []>} : vector<16x32xf32>, vector<32x128xf32>, vector<16x128xf32> -> vector<16x128xf32>
    %c1_496 = arith.constant 1 : index
    %c0_497 = arith.constant 0 : index
    %c0_498 = arith.constant 0 : index
    %683 = vector.load %arg12[%c1_496, %c0_497, %c0_498] : memref<2x1x128xf32, #tpu.memory_space<vmem>>, vector<1x1x128xf32>
    %684 = vector.shape_cast %683 : vector<1x1x128xf32> to vector<1x128xf32>
    %685 = vector.broadcast %684 : vector<1x128xf32> to vector<16x128xf32>
    %686 = arith.addf %682, %685 : vector<16x128xf32>
    %cst_499 = arith.constant 5.000000e-01 : f32
    %687 = vector.broadcast %cst_499 : f32 to vector<16x128xf32>
    %688 = arith.mulf %687, %686 : vector<16x128xf32>
    %cst_500 = arith.constant 0.707106769 : f32
    %689 = vector.broadcast %cst_500 : f32 to vector<16x128xf32>
    %690 = arith.mulf %686, %689 : vector<16x128xf32>
    %691 = math.erf %690 : vector<16x128xf32>
    %cst_501 = arith.constant 1.000000e+00 : f32
    %692 = vector.broadcast %cst_501 : f32 to vector<16x128xf32>
    %693 = arith.addf %692, %691 : vector<16x128xf32>
    %694 = arith.mulf %688, %693 : vector<16x128xf32>
    %695 = arith.mulf %679, %694 : vector<16x128xf32>
    %c0_502 = arith.constant 0 : index
    %c0_503 = arith.constant 0 : index
    %696 = vector.load %arg13[%c0_502, %c0_503] : memref<128x32xf32, #tpu.memory_space<vmem>>, vector<128x32xf32>
    %cst_504 = arith.constant dense<0.000000e+00> : vector<16x32xf32>
    %697 = tpu.matmul %695, %696, %cst_504 {dimension_numbers = #tpu.dot_dimension_numbers<[1], [0], [0], [1], [0, 0, 1, 1], [], []>} : vector<16x128xf32>, vector<128x32xf32>, vector<16x32xf32> -> vector<16x32xf32>
    %698 = arith.addf %638, %697 : vector<16x32xf32>
    %c2_505 = arith.constant 2 : index
    %c0_506 = arith.constant 0 : index
    %c0_507 = arith.constant 0 : index
    %699 = vector.load %arg10[%c2_505, %c0_506, %c0_507] : memref<3x1x32xf32, #tpu.memory_space<vmem>>, vector<1x1x32xf32>
    %700 = vector.shape_cast %699 : vector<1x1x32xf32> to vector<1x32xf32>
    %701 = vector.broadcast %700 : vector<1x32xf32> to vector<16x32xf32>
    %702 = arith.addf %698, %701 : vector<16x32xf32>
    %c1_508 = arith.constant 1 : index
    %c0_509 = arith.constant 0 : index
    %c0_510 = arith.constant 0 : index
    %703 = vector.load %arg14[%c1_508, %c0_509, %c0_510] : memref<2x16x32xf32, #tpu.memory_space<vmem>>, vector<1x16x32xf32>
    %704 = vector.shape_cast %703 : vector<1x16x32xf32> to vector<16x32xf32>
    %705 = vector.shape_cast %702 : vector<16x32xf32> to vector<1x16x32xf32>
    tpu.vector_store %arg14[%c1_508, %c0_509, %c0_510], %705 {strides = array<i32>} : memref<2x16x32xf32, #tpu.memory_space<vmem>>, vector<1x16x32xf32>,
    return
  }
  func.func @transform_0(%arg0: i32) -> (i32, i32, i32) {
    %c0_i32 = arith.constant 0 : i32
    %c0_i32_0 = arith.constant 0 : i32
    %c0_i32_1 = arith.constant 0 : i32
    return %arg0, %c0_i32, %c0_i32_0 : i32, i32, i32
  }
  func.func @transform_1(%arg0: i32) -> (i32, i32, i32) {
    %c0_i32 = arith.constant 0 : i32
    %c0_i32_0 = arith.constant 0 : i32
    %c0_i32_1 = arith.constant 0 : i32
    return %arg0, %c0_i32, %c0_i32_0 : i32, i32, i32
  }
  func.func @transform_2(%arg0: i32) -> (i32, i32, i32) {
    %c0_i32 = arith.constant 0 : i32
    %c0_i32_0 = arith.constant 0 : i32
    %c0_i32_1 = arith.constant 0 : i32
    return %arg0, %c0_i32, %c0_i32_0 : i32, i32, i32
  }
  func.func @transform_3(%arg0: i32) -> (i32, i32, i32) {
    %c0_i32 = arith.constant 0 : i32
    %c0_i32_0 = arith.constant 0 : i32
    %c0_i32_1 = arith.constant 0 : i32
    %c0_i32_2 = arith.constant 0 : i32
    return %c0_i32, %c0_i32_0, %c0_i32_1 : i32, i32, i32
  }
  func.func @transform_4(%arg0: i32) -> (i32, i32, i32) {
    %c0_i32 = arith.constant 0 : i32
    %c0_i32_0 = arith.constant 0 : i32
    %c0_i32_1 = arith.constant 0 : i32
    %c0_i32_2 = arith.constant 0 : i32
    return %c0_i32, %c0_i32_0, %c0_i32_1 : i32, i32, i32
  }
  func.func @transform_5(%arg0: i32) -> (i32, i32, i32) {
    %c0_i32 = arith.constant 0 : i32
    %c0_i32_0 = arith.constant 0 : i32
    %c0_i32_1 = arith.constant 0 : i32
    %c0_i32_2 = arith.constant 0 : i32
    return %c0_i32, %c0_i32_0, %c0_i32_1 : i32, i32, i32
  }
  func.func @transform_6(%arg0: i32) -> (i32, i32, i32) {
    %c0_i32 = arith.constant 0 : i32
    %c0_i32_0 = arith.constant 0 : i32
    %c0_i32_1 = arith.constant 0 : i32
    %c0_i32_2 = arith.constant 0 : i32
    return %c0_i32, %c0_i32_0, %c0_i32_1 : i32, i32, i32
  }
  func.func @transform_7(%arg0: i32) -> (i32, i32, i32) {
    %c0_i32 = arith.constant 0 : i32
    %c0_i32_0 = arith.constant 0 : i32
    %c0_i32_1 = arith.constant 0 : i32
    %c0_i32_2 = arith.constant 0 : i32
    return %c0_i32, %c0_i32_0, %c0_i32_1 : i32, i32, i32
  }
  func.func @transform_8(%arg0: i32) -> (i32, i32, i32) {
    %c0_i32 = arith.constant 0 : i32
    %c0_i32_0 = arith.constant 0 : i32
    %c0_i32_1 = arith.constant 0 : i32
    %c0_i32_2 = arith.constant 0 : i32
    return %c0_i32, %c0_i32_0, %c0_i32_1 : i32, i32, i32
  }
  func.func @transform_9(%arg0: i32) -> (i32, i32, i32) {
    %c0_i32 = arith.constant 0 : i32
    %c0_i32_0 = arith.constant 0 : i32
    %c0_i32_1 = arith.constant 0 : i32
    %c0_i32_2 = arith.constant 0 : i32
    return %c0_i32, %c0_i32_0, %c0_i32_1 : i32, i32, i32
  }
  func.func @transform_10(%arg0: i32) -> (i32, i32, i32) {
    %c0_i32 = arith.constant 0 : i32
    %c0_i32_0 = arith.constant 0 : i32
    %c0_i32_1 = arith.constant 0 : i32
    %c0_i32_2 = arith.constant 0 : i32
    return %c0_i32, %c0_i32_0, %c0_i32_1 : i32, i32, i32
  }
  func.func @transform_11(%arg0: i32) -> (i32, i32, i32) {
    %c0_i32 = arith.constant 0 : i32
    %c0_i32_0 = arith.constant 0 : i32
    %c0_i32_1 = arith.constant 0 : i32
    %c0_i32_2 = arith.constant 0 : i32
    return %c0_i32, %c0_i32_0, %c0_i32_1 : i32, i32, i32
  }
  func.func @transform_12(%arg0: i32) -> (i32, i32) {
    %c0_i32 = arith.constant 0 : i32
    %c0_i32_0 = arith.constant 0 : i32
    %c0_i32_1 = arith.constant 0 : i32
    return %c0_i32, %c0_i32_0 : i32, i32
  }
  func.func @transform_13(%arg0: i32) -> (i32, i32, i32) {
    %c0_i32 = arith.constant 0 : i32
    %c0_i32_0 = arith.constant 0 : i32
    %c0_i32_1 = arith.constant 0 : i32
    return %arg0, %c0_i32, %c0_i32_0 : i32, i32, i32
  }
}

</mosaic_0001>

<bundles_post_ra>
// kernel: basic_transformer_block.1
= control target key start
LH: loop header
LB: loop body
LE: loop exit
PB: predicated region body
PF: predicated region fallthrough
CT: control target
= control target key end

     0   :  { %18 = vsyncpa [#allocation3], 0  ;;  %s14374_s0 = inlined_call_operand.hbm [shape: f32[2,16,32], index: 0, kind: input, shape index: {}, may-alias: {0,13}]   ;;  %s14375_s1 = inlined_call_operand.vmem [shape: f32[2,1,32], index: 1, kind: input, shape index: {}]   ;;  %s14376_s2 = inlined_call_operand.vmem [shape: f32[2,8,16], index: 2, kind: input, shape index: {}]   ;;  %s14377_s3 = inlined_call_operand.vmem [shape: f32[6,32,32], index: 3, kind: input, shape index: {}]   ;;  %s14378_s4 = inlined_call_operand.vmem [shape: f32[6,1,32], index: 4, kind: input, shape index: {}]   ;;  %s14379_s5 = inlined_call_operand.vmem [shape: f32[8,32,8], index: 5, kind: input, shape index: {}]   ;;  %s14380_s6 = inlined_call_operand.vmem [shape: f32[8,32,8], index: 6, kind: input, shape index: {}]   ;;  %s14381_s7 = inlined_call_operand.vmem [shape: f32[8,16,8], index: 7, kind: input, shape index: {}]   ;;  %s14382_s8 = inlined_call_operand.vmem [shape: f32[8,8,32], index: 8, kind: input, shape index: {}]   ;;  %s14383_s9 = inlined_call_operand.vmem [shape: f32[3,1,32], index: 9, kind: input, shape index: {}]   ;;  %s14384_s10 = inlined_call_operand.vmem [shape: f32[2,32,128], index: 10, kind: input, shape index: {}]   ;;  %s14385_s11 = inlined_call_operand.vmem [shape: f32[2,1,128], index: 11, kind: input, shape index: {}]   ;;  %s14386_s12 = inlined_call_operand.vmem [shape: f32[128,32], index: 12, kind: input, shape index: {}]   ;;  %s14387_s13 = inlined_call_operand.hbm [shape: f32[2,16,32], index: 13, kind: output, shape index: {}, may-alias: {0,13}]  }
   0x1   :  { %19 = vsyncpa [#allocation4], 0  ;;  %s12701_s25 = smov [#allocation2]   ;;  %s12653_s29 = scalar_lea.hbm %s14374_s0, 512 }
   0x2   :  { %s25_s26 = sshll.u32 %s12701_s25, 4  ;;  %p12654_p0 = scmp.ne.s32.totalorder %s14374_s0, %s12653_s29  ;;  %s26_s26 = int_to_ptr.vmem [resolvable:$true] %s25_s26 }
   0x3   :  { %p12657_p1 = scmp.lt.u32.totalorder %s12653_s29, %s14374_s0 }
   0x5   :  { %p12659_p2 = pnand %p12657_p1, %p12654_p0 }
   0x7   :  { %12662 = shalt.err (!%p12659_p2)
}
   0x8   :  { %s12663_s17 = scalar_lea.vmem %s26_s26, 512  ;;  %p12668_p4 = scmp.lt.s32.totalorder %s26_s26, %s26_s26 }
   0x9   :  { %p12664_p3 = scmp.ne.s32.totalorder %s26_s26, %s12663_s17  ;;  %p12669_p5 = scmp.lt.s32.totalorder %s12663_s17, %s12663_s17 }
   0xb   :  { %p12670_p6 = por %p12669_p5, %p12668_p4 }
   0xd   :  { %p12671_p7 = pnand %p12670_p6, %p12664_p3 }
   0xf   :  { %12674 = shalt.err (!%p12671_p7)
}
  0x10   :  { %s12702_s18 = smov 128   ;;  %s12703_s19 = smov 8  }
  0x11   :  { %31 = dma.hbm_to_vmem [thread:$0]  %s14374_s0, 512, %s26_s26, [#allocation3], %s12702_s18, %s12702_s18, %s12703_s19  }
  0x12   :  { %12697 = dma.done.wait [#allocation3], 512  }
  0x13   :  { %12698 = vsyncadd [#allocation3], 4294966784  ;;  %v12704_v0 = vmov 0.0|0.0   ;;  %vm12705_vm0 = vmmov 0   ;;  %v12706_v1 = vmov 0.0   ;;  %vm68_vm1 = vcmask 261120  }
  0x14   :  { %11906 = vmatprep.subr.bf16.mxu0 %v12704_v0  ;;  %10932 = vmatprep.mubr.msk.f32.mxu0 %vm12705_vm0, %v12706_v1  ;;  %v12796_v2 = vld [vmem:[#allocation2] sm:$0xff]  ;;  %v12798_v3 = vld [vmem:[#allocation2 + $0x8] sm:$0xff]  ;;  %v65_v7 = vld [vmem:[%s14377_s3 + $0x10] sm:$0xff]  ;;  %v246_v52 = vlaneseq  ;;  %vm502_vm2 = vcmask 64512   ;;  %vm590_vm4 = vcmask 130048  }
  0x15   :  { %v63_v4 = vld [vmem:[%s14377_s3] sm:$0xff]  ;;  %v219_v5 = vsel %vm68_vm1, %v12796_v2, 0.0  ;;  %v64_v6 = vld [vmem:[%s14377_s3 + $0x8] sm:$0xff]  ;;  %v66_v8 = vld [vmem:[%s14377_s3 + $0x18] sm:$0xff]  ;;  %v222_v10 = vsel %vm68_vm1, %v12798_v3, 0.0 }
  0x16   :  { %220 = vadd.xlane.f32.xlu0 %v219_v5  ;;  %v11907_v9 = vpack.c.bf16 %v64_v6, %v63_v4  ;;  %v11910_v11 = vpack.c.bf16 %v66_v8, %v65_v7  ;;  %v9955_v12 = vld [vmem:[%s14377_s3 + $0x20] sm:$0xff]  ;;  %v9956_v13 = vld [vmem:[%s14377_s3 + $0x28] sm:$0xff]  ;;  %v9957_v16 = vld [vmem:[%s14377_s3 + $0x30] sm:$0xff]  ;;  %v247_v55 = vshrl.u32 %v246_v52, 7 }
  0x17   :  { %v12826_v14 = vld [vmem:[%s14375_s1] sm:$0x1]  ;;  %v11913_v15 = vpack.c.bf16 %v9956_v13, %v9955_v12  ;;  %v9958_v17 = vld [vmem:[%s14377_s3 + $0x38] sm:$0xff]  ;;  %v259_v30 = vld [vmem:[%s14379_s5 + $0x8] sm:$0xff] }
  0x18   :  { %11908 = vmatpush3.bf16.msra.mxu0 %v11907_v9  ;;  %v11916_v18 = vpack.c.bf16 %v9958_v17, %v9957_v16  ;;  %v258_v29 = vld [vmem:[%s14379_s5] sm:$0xff]  ;;  %v344_v33 = vld [vmem:[%s14380_s6 + $0x8] sm:$0xff]  ;;  %v260_v35 = vld [vmem:[%s14379_s5 + $0x10] sm:$0xff]  ;;  %v12882_v59 = vsub.s32 0, %v247_v55 }
  0x19   :  { %11909 = vmatprep.subr.bf16.mxu0 %v12704_v0  ;;  %v11918_v31 = vpack.c.bf16 %v259_v30, %v258_v29  ;;  %v343_v32 = vld [vmem:[%s14380_s6] sm:$0xff]  ;;  %v261_v36 = vld [vmem:[%s14379_s5 + $0x18] sm:$0xff]  ;;  %v345_v38 = vld [vmem:[%s14380_s6 + $0x10] sm:$0xff] }
  0x1a   :  { %223 = vadd.xlane.f32.xlu0 %v222_v10  ;;  %v11926_v34 = vpack.c.bf16 %v344_v33, %v343_v32  ;;  %v11922_v37 = vpack.c.bf16 %v261_v36, %v260_v35  ;;  %v346_v39 = vld [vmem:[%s14380_s6 + $0x18] sm:$0xff]  ;;  %v9965_v41 = vld [vmem:[%s14380_s6 + $0x80] sm:$0xff]  ;;  %v9966_v42 = vld [vmem:[%s14380_s6 + $0x88] sm:$0xff] }
  0x1b   :  { %v11930_v40 = vpack.c.bf16 %v346_v39, %v345_v38  ;;  %v11934_v43 = vpack.c.bf16 %v9966_v42, %v9965_v41  ;;  %v67_v56 = vld [vmem:[%s14378_s4] sm:$0x1]  ;;  %v9959_v57 = vld [vmem:[%s14378_s4 + $0x1] sm:$0x1]  ;;  %v9967_v9 = vld [vmem:[%s14380_s6 + $0x90] sm:$0xff] }
  0x1c   :  { %11911 = vmatpush3.bf16.msra.mxu0 %v11910_v11  ;;  %11927 = vmatprep.subr.bf16.mxu1 %v11926_v34  ;;  %v9968_v10 = vld [vmem:[%s14380_s6 + $0x98] sm:$0xff]  ;;  %v9978_v16 = vld [vmem:[%s14379_s5 + $0x28] sm:$0xff]  ;;  %vm12916_vm3 = vmpackc.low %vm502_vm2, %vm502_vm2 }
  0x1d   :  { %11912 = vmatprep.subr.bf16.mxu0 %v12704_v0  ;;  %11929 = vmatpush3.bf16.msra.mxu1 %v11926_v34  ;;  %v11938_v13 = vpack.c.bf16 %v9968_v10, %v9967_v9  ;;  %v9989_v30 = vld [vmem:[%s14380_s6 + $0xa0] sm:$0xff]  ;;  %v9991_v33 = vld [vmem:[%s14380_s6 + $0xb0] sm:$0xff]  ;;  %v9992_v34 = vld [vmem:[%s14380_s6 + $0xb8] sm:$0xff] }
  0x1e   :  { %11931 = vmatprep.subr.bf16.mxu1 %v11930_v40  ;;  %v11972_v35 = vpack.c.bf16 %v9992_v34, %v9991_v33  ;;  %v10006_v36 = vld [vmem:[%s14379_s5 + $0x40] sm:$0xff]  ;;  %v10008_v39 = vld [vmem:[%s14379_s5 + $0x50] sm:$0xff] }
  0x1f   :  { %10933 = vmatmul.mubr.msk.f32.vlgmr.msra.gmra.mrb[0].mxu0 %vm68_vm1, %v12826_v14  ;;  %v10018_v42 = vld [vmem:[%s14380_s6 + $0xc0] sm:$0xff] }
  0x20   :  { %11914 = vmatpush3.bf16.msra.mxu0 %v11913_v15  ;;  %10943 = vmatprep.mubr.msk.f32.mxu0 %vm12705_vm0, %v12706_v1  ;;  %v9977_v15 = vld [vmem:[%s14379_s5 + $0x20] sm:$0xff] }
  0x21   :  { %11915 = vmatprep.subr.bf16.mxu0 %v12704_v0  ;;  %11933 = vmatpush3.bf16.msra.mxu1 %v11930_v40  ;;  %v10009_v40 = vld [vmem:[%s14379_s5 + $0x58] sm:$0xff] }
  0x22   :  { %v11990_v41 = vpack.c.bf16 %v10009_v40, %v10008_v39 }
  0x24   :  { %11917 = vmatpush3.bf16.msra.mxu0 %v11916_v18 }
  0x25   :  { %11919 = vmatprep.subr.bf16.mxu0 %v11918_v31 }
  0x27   :  { %10944 = vmatmul.mubr.msk.f32.vlgmr.msra.gmra.mrb[2].mxu0 %vm68_vm1, %v12826_v14 }
  0x28   :  { %11921 = vmatpush3.bf16.msra.mxu0 %v11918_v31  ;;  %v9990_v31 = vld [vmem:[%s14380_s6 + $0xa8] sm:$0xff] }
  0x29   :  { %11923 = vmatprep.subr.bf16.mxu0 %v11922_v37  ;;  %v11968_v32 = vpack.c.bf16 %v9990_v31, %v9989_v30 }
  0x2c   :  { %11925 = vmatpush3.bf16.msra.mxu0 %v11922_v37  ;;  %v10007_v37 = vld [vmem:[%s14379_s5 + $0x48] sm:$0xff] }
  0x2d   :  { %11935 = vmatprep.subr.bf16.mxu0 %v11934_v43  ;;  %v11986_v38 = vpack.c.bf16 %v10007_v37, %v10006_v36 }
  0xa3   :  { %v221_v19 = vpop.xlane.xlu0 %220 }
  0xa4   :  { %v226_v20 = vmul.f32 0.03125, %v221_v19 }
  0xa6   :  { %v228_v21 = vsub.f32 %v12796_v2, %v226_v20 }
  0xa7   :  { %v224_v22 = vpop.xlane.xlu0 %223 }
  0xa8   :  { %v227_v23 = vmul.f32 0.03125, %v224_v22  ;;  %v230_v24 = vmul.f32 %v228_v21, %v228_v21 }
  0xaa   :  { %v229_v25 = vsub.f32 %v12798_v3, %v227_v23  ;;  %v232_v26 = vsel %vm68_vm1, %v230_v24, 0.0  ;;  %v11952_v23 = vpack.c.bf16 %v9978_v16, %v9977_v15  ;;  %v9979_v24 = vld [vmem:[%s14379_s5 + $0x30] sm:$0xff]  ;;  %v9983_v16 = vld [vmem:[%s14380_s6 + $0x20] sm:$0xff] }
  0xab   :  { %233 = vadd.xlane.f32.xlu1 %v232_v26 }
  0xac   :  { %v231_v27 = vmul.f32 %v229_v25, %v229_v25 }
  0xae   :  { %v235_v28 = vsel %vm68_vm1, %v231_v27, 0.0 }
  0xaf   :  { %236 = vadd.xlane.f32.xlu1 %v235_v28 }
  0xf2   :  { %v138_v44 = vpop.f32.mrb[0].mxu0 }
  0xf3   :  { %v10934_v45 = vpop.f32.mrb[1].mxu0  ;;  %v139_v58 = vadd.f32 %v138_v44, %v67_v56 }
  0xf4   :  { %v10020_v45 = vld [vmem:[%s14380_s6 + $0xd0] sm:$0xff] }
  0xf5   :  { %v249_v63 = vrot.slane %v139_v58, %v12882_v59 }
  0xfa   :  { %v215_v46 = vpop.f32.mrb[2].mxu0 }
  0xfb   :  { %v10945_v47 = vpop.f32.mrb[3].mxu0  ;;  %v216_v60 = vadd.f32 %v9959_v57, %v215_v46  ;;  %v10021_v46 = vld [vmem:[%s14380_s6 + $0xd8] sm:$0xff] }
  0xfc   :  { %v12006_v47 = vpack.c.bf16 %v10021_v46, %v10020_v45 }
  0xfd   :  { %v255_v4 = vrot.slane %v216_v60, %v12882_v59 }
 0x138   :  { %v234_v48 = vpop.xlane.xlu1 %233 }
 0x139   :  { %v238_v49 = vmul.f32 0.03125, %v234_v48 }
 0x13b   :  { %v240_v50 = vadd.f32 1e-05, %v238_v49 }
 0x13c   :  { %v237_v51 = vpop.xlane.xlu1 %236 }
 0x13d   :  { %12489 = vrsqrt.f32 %v240_v50  ;;  %v239_v53 = vmul.f32 0.03125, %v237_v51 }
 0x13f   :  { %v241_v54 = vadd.f32 1e-05, %v239_v53 }
 0x141   :  { %12491 = vrsqrt.f32 %v241_v54 }
 0x147   :  { %v12490_v61 = vpop.eup %12489 }
 0x148   :  { %v244_v62 = vmul.f32 %v12490_v61, %v228_v21 }
 0x14a   :  { %v250_v5 = vmul.f32 %v249_v63, %v244_v62 }
 0x14b   :  { %v12492_v6 = vpop.eup %12491 }
 0x14c   :  { %v245_v7 = vmul.f32 %v12492_v6, %v229_v25  ;;  %v12886_v8 = vadd.f32 %v255_v4, %v250_v5  ;;  %v9980_v25 = vld [vmem:[%s14379_s5 + $0x38] sm:$0xff] }
 0x14d   :  { %v11956_v29 = vpack.c.bf16 %v9980_v25, %v9979_v24  ;;  %v9986_v24 = vld [vmem:[%s14380_s6 + $0x38] sm:$0xff] }
 0x14e   :  { %v251_v11 = vmul.f32 %v249_v63, %v245_v7  ;;  %10954 = vmatprep.mubr.msk.f32.mxu0 %vm68_vm1, %v12886_v8  ;;  %10965 = vmatprep.mubr.msk.f32.mxu1 %vm68_vm1, %v12886_v8 }
 0x150   :  { %v12898_v12 = vadd.f32 %v255_v4, %v251_v11 }
 0x152   :  { %10955 = vmatmul.mubr.msk.f32.vlgmr.msra.gmra.mrb[4].mxu0 %vm68_vm1, %v12898_v12  ;;  %10966 = vmatmul.mubr.msk.f32.vlgmr.msra.gmra.mrb[0].mxu1 %vm68_vm1, %v12898_v12 }
 0x153   :  { %11937 = vmatpush3.bf16.msra.mxu0 %v11934_v43  ;;  %10976 = vmatprep.mubr.msk.f32.mxu0 %vm68_vm1, %v12886_v8  ;;  %v10019_v43 = vld [vmem:[%s14380_s6 + $0xc8] sm:$0xff] }
 0x154   :  { %11939 = vmatprep.subr.bf16.mxu0 %v11938_v13  ;;  %v12002_v44 = vpack.c.bf16 %v10019_v43, %v10018_v42 }
 0x157   :  { %11941 = vmatpush3.bf16.msra.mxu0 %v11938_v13 }
 0x15a   :  { %10977 = vmatmul.mubr.msk.f32.vlgmr.msra.gmra.mrb[6].mxu0 %vm68_vm1, %v12898_v12 }
 0x225   :  { %v10956_v17 = vpop.f32.mrb[4].mxu0  ;;  %v10967_v18 = vpop.f32.mrb[0].mxu1 }
 0x226   :  { %v334_v19 = vpop.f32.mrb[5].mxu0  ;;  %v413_v20 = vpop.f32.mrb[1].mxu1 }
 0x227   :  { %v11942_v22 = vpack.c.bf16 %v10967_v18, %v413_v20  ;;  %10983 = vmatprep.mubr.msk.f32.mxu1 %vm502_vm2, %v334_v19 }
 0x229   :  { %11944 = vmatprep.subr.msk.bf16.mxu1 %vm12916_vm3, %v11942_v22 }
 0x22a   :  { %11947 = vmatpush3.bf16.xpose.msk.msra.mxu1 %vm12916_vm3, %v11942_v22 }
 0x22b   :  { %11953 = vmatprep.subr.bf16.mxu1 %v11952_v23 }
 0x22d   :  { %v10978_v26 = vpop.f32.mrb[6].mxu0 }
 0x22e   :  { %v493_v27 = vpop.f32.mrb[7].mxu0 }
 0x22f   :  { %v11948_v28 = vpack.c.bf16 %v10978_v26, %v493_v27 }
 0x231   :  { %11949 = vmatprep.subr.bf16.mxu0 %v11948_v28  ;;  %10984 = vmatmul.mubr.msk.f32.vlgmr.msra.gmra.mrb[2].mxu1 %vm502_vm2, %v10956_v17  ;;  %v9984_v17 = vld [vmem:[%s14380_s6 + $0x28] sm:$0xff] }
 0x232   :  { %11951 = vmatpush3.bf16.msra.mxu0 %v11948_v28  ;;  %11955 = vmatpush3.bf16.msra.mxu1 %v11952_v23  ;;  %v11960_v18 = vpack.c.bf16 %v9984_v17, %v9983_v16  ;;  %v9985_v23 = vld [vmem:[%s14380_s6 + $0x30] sm:$0xff] }
 0x233   :  { %11001 = vmatprep.mubr.msk.f32.mxu1 %vm68_vm1, %v12886_v8  ;;  %11957 = vmatprep.subr.bf16.mxu1 %v11956_v29  ;;  %v11964_v28 = vpack.c.bf16 %v9986_v24, %v9985_v23 }
 0x234   :  { %11961 = vmatprep.subr.bf16.mxu0 %v11960_v18 }
 0x236   :  { %11959 = vmatpush3.bf16.msra.mxu1 %v11956_v29 }
 0x237   :  { %11969 = vmatprep.subr.bf16.mxu1 %v11968_v32 }
 0x239   :  { %11002 = vmatmul.mubr.msk.f32.vlgmr.msra.gmra.mrb[4].mxu1 %vm68_vm1, %v12898_v12 }
 0x23a   :  { %11971 = vmatpush3.bf16.msra.mxu1 %v11968_v32  ;;  %11023 = vmatprep.mubr.msk.f32.mxu1 %vm68_vm1, %v12886_v8 }
 0x23b   :  { %11973 = vmatprep.subr.bf16.mxu1 %v11972_v35 }
 0x23e   :  { %11975 = vmatpush3.bf16.msra.mxu1 %v11972_v35 }
 0x23f   :  { %11987 = vmatprep.subr.bf16.mxu1 %v11986_v38 }
 0x241   :  { %11024 = vmatmul.mubr.msk.f32.vlgmr.msra.gmra.mrb[6].mxu1 %vm68_vm1, %v12898_v12 }
 0x242   :  { %11989 = vmatpush3.bf16.msra.mxu1 %v11986_v38  ;;  %11058 = vmatprep.mubr.msk.f32.mxu1 %vm68_vm1, %v12886_v8 }
 0x243   :  { %11991 = vmatprep.subr.bf16.mxu1 %v11990_v41 }
 0x246   :  { %11993 = vmatpush3.bf16.msra.mxu1 %v11990_v41 }
 0x247   :  { %12003 = vmatprep.subr.bf16.mxu1 %v12002_v44 }
 0x249   :  { %11059 = vmatmul.mubr.msk.f32.vlgmr.msra.gmra.mrb[8].mxu1 %vm68_vm1, %v12898_v12 }
 0x24a   :  { %12005 = vmatpush3.bf16.msra.mxu1 %v12002_v44  ;;  %11080 = vmatprep.mubr.msk.f32.mxu1 %vm68_vm1, %v12886_v8 }
 0x24b   :  { %12007 = vmatprep.subr.bf16.mxu1 %v12006_v47 }
 0x24e   :  { %12009 = vmatpush3.bf16.msra.mxu1 %v12006_v47 }
 0x251   :  { %11081 = vmatmul.mubr.msk.f32.vlgmr.msra.gmra.mrb[10].mxu1 %vm68_vm1, %v12898_v12 }
 0x304   :  { %v10985_v48 = vpop.f32.mrb[2].mxu1 }
 0x305   :  { %v581_v49 = vpop.f32.mrb[3].mxu1  ;;  %v594_v50 = vsel %vm590_vm4, %v10985_v48, -inf }
 0x306   :  { %595 = vmax.xlane.f32.xlu1 %v594_v50  ;;  %v591_v51 = vsel %vm590_vm4, %v581_v49, -inf }
 0x307   :  { %592 = vmax.xlane.f32.xlu0 %v591_v51 }
 0x30c   :  { %v11003_v52 = vpop.f32.mrb[4].mxu1 }
 0x30d   :  { %v766_v53 = vpop.f32.mrb[5].mxu1 }
 0x314   :  { %v11025_v54 = vpop.f32.mrb[6].mxu1 }
 0x315   :  { %v926_v55 = vpop.f32.mrb[7].mxu1 }
 0x316   :  { %v11982_v56 = vpack.c.bf16 %v11025_v54, %v926_v55  ;;  %v694_v55 = vld [vmem:[%s14382_s8] sm:$0xff] }
 0x31c   :  { %v12986_v57 = vpop.f32.mrb[8].mxu1 }
 0x31d   :  { %v12988_v58 = vpop.f32.mrb[9].mxu1 }
 0x324   :  { %v11082_v60 = vpop.f32.mrb[10].mxu1 }
 0x325   :  { %v1520_v61 = vpop.f32.mrb[11].mxu1 }
 0x326   :  { %v12016_v62 = vpack.c.bf16 %v11082_v60, %v1520_v61  ;;  %v10013_v60 = vld [vmem:[%s14380_s6 + $0x48] sm:$0xff] }
 0x328   :  { %12017 = vmatprep.subr.bf16.mxu1 %v12016_v62 }
 0x329   :  { %12019 = vmatpush3.bf16.msra.mxu1 %v12016_v62 }
 0x393   :  { %v596_v63 = vpop.xlane.xlu1 %595 }
 0x394   :  { %v598_v4 = vsub.f32 %v10985_v48, %v596_v63  ;;  %v593_v5 = vpop.xlane.xlu0 %592  ;;  %v10001_v48 = vld [vmem:[%s14382_s8 + $0x8] sm:$0xff] }
 0x395   :  { %v597_v6 = vsub.f32 %v581_v49, %v593_v5  ;;  %v10015_v5 = vld [vmem:[%s14380_s6 + $0x58] sm:$0xff] }
 0x396   :  { %v601_v7 = vmul.f32 1.442695, %v598_v4  ;;  %v10014_v4 = vld [vmem:[%s14380_s6 + $0x50] sm:$0xff] }
 0x397   :  { %v599_v9 = vmul.f32 1.442695, %v597_v6  ;;  %v11998_v6 = vpack.c.bf16 %v10015_v5, %v10014_v4 }
 0x398   :  { %12493 = vpow2.f32 %v601_v7 }
 0x399   :  { %12495 = vpow2.f32 %v599_v9 }
 0x3a2   :  { %v12494_v10 = vpop.eup %12493 }
 0x3a3   :  { %v12496_v11 = vpop.eup %12495  ;;  %v606_v13 = vsel %vm590_vm4, %v12494_v10, 0.0 }
 0x3a4   :  { %607 = vadd.xlane.f32.xlu1 %v606_v13  ;;  %v603_v15 = vsel %vm590_vm4, %v12496_v11, 0.0 }
 0x3a5   :  { %604 = vadd.xlane.f32.xlu0 %v603_v15 }
 0x431   :  { %v608_v19 = vpop.xlane.xlu1 %607 }
 0x432   :  { %12497 = vrcp.f32 %v608_v19  ;;  %v605_v20 = vpop.xlane.xlu0 %604 }
 0x433   :  { %12499 = vrcp.f32 %v605_v20 }
 0x43c   :  { %v12498_v22 = vpop.eup %12497 }
 0x43d   :  { %v12500_v25 = vpop.eup %12499  ;;  %v612_v27 = vmul.f32 %v12498_v22, %v12494_v10 }
 0x43e   :  { %v611_v26 = vmul.f32 %v12500_v25, %v12496_v11 }
 0x440   :  { %10990 = vmatprep.mubr.msk.f32.mxu0 %vm590_vm4, %v611_v26  ;;  %v10033_v26 = vld [vmem:[%s14379_s5 + $0x60] sm:$0xff] }
 0x441   :  { %10991 = vmatmul.mubr.msk.f32.vlgmr.msra.gmra.mrb[8].mxu0 %vm590_vm4, %v612_v27  ;;  %v10034_v27 = vld [vmem:[%s14379_s5 + $0x68] sm:$0xff] }
 0x442   :  { %11963 = vmatpush3.bf16.msra.mxu0 %v11960_v18  ;;  %11012 = vmatprep.mubr.msk.f32.mxu0 %vm68_vm1, %v12886_v8 }
 0x443   :  { %11965 = vmatprep.subr.bf16.mxu0 %v11964_v28 }
 0x446   :  { %11967 = vmatpush3.bf16.msra.mxu0 %v11964_v28  ;;  %v12020_v28 = vpack.c.bf16 %v10034_v27, %v10033_v26  ;;  %v10061_v27 = vld [vmem:[%s14377_s3 + $0x40] sm:$0xff] }
 0x448   :  { %12021 = vmatprep.subr.bf16.mxu1 %v12020_v28 }
 0x449   :  { %11013 = vmatmul.mubr.msk.f32.vlgmr.msra.gmra.mrb[10].mxu0 %vm68_vm1, %v12898_v12 }
 0x44a   :  { %11030 = vmatprep.mubr.msk.f32.mxu0 %vm502_vm2, %v766_v53 }
 0x514   :  { %v10992_v29 = vpop.f32.mrb[8].mxu0 }
 0x515   :  { %v685_v30 = vpop.f32.mrb[9].mxu0 }
 0x51c   :  { %v11014_v31 = vpop.f32.mrb[10].mxu0 }
 0x51d   :  { %v846_v32 = vpop.f32.mrb[11].mxu0 }
 0x51e   :  { %v11976_v33 = vpack.c.bf16 %v11014_v31, %v846_v32 }
 0x520   :  { %11978 = vmatprep.subr.msk.bf16.mxu0 %vm12916_vm3, %v11976_v33 }
 0x521   :  { %11981 = vmatpush3.bf16.xpose.msk.msra.mxu0 %vm12916_vm3, %v11976_v33  ;;  %v10035_v33 = vld [vmem:[%s14379_s5 + $0x70] sm:$0xff] }
 0x522   :  { %11983 = vmatprep.subr.bf16.mxu0 %v11982_v56 }
 0x528   :  { %11031 = vmatmul.mubr.msk.f32.vlgmr.msra.gmra.mrb[12].mxu0 %vm502_vm2, %v11003_v52 }
 0x529   :  { %11985 = vmatpush3.bf16.msra.mxu0 %v11982_v56  ;;  %v10012_v56 = vld [vmem:[%s14380_s6 + $0x40] sm:$0xff] }
 0x52a   :  { %11040 = vmatprep.subr.mxu0 %v10001_v48  ;;  %v11994_v63 = vpack.c.bf16 %v10013_v60, %v10012_v56 }
 0x5fb   :  { %v11032_v34 = vpop.f32.mrb[12].mxu0 }
 0x5fc   :  { %v1013_v35 = vpop.f32.mrb[13].mxu0  ;;  %v1025_v36 = vsel %vm590_vm4, %v11032_v34, -inf }
 0x5fd   :  { %1026 = vmax.xlane.f32.xlu1 %v1025_v36  ;;  %v1022_v37 = vsel %vm590_vm4, %v1013_v35, -inf }
 0x5fe   :  { %1023 = vmax.xlane.f32.xlu0 %v1022_v37 }
 0x68a   :  { %v1027_v38 = vpop.xlane.xlu1 %1026 }
 0x68b   :  { %v1029_v39 = vsub.f32 %v11032_v34, %v1027_v38  ;;  %v1024_v40 = vpop.xlane.xlu0 %1023  ;;  %v10036_v34 = vld [vmem:[%s14379_s5 + $0x78] sm:$0xff] }
 0x68c   :  { %v1028_v41 = vsub.f32 %v1013_v35, %v1024_v40  ;;  %v12024_v38 = vpack.c.bf16 %v10036_v34, %v10035_v33  ;;  %v10046_v40 = vld [vmem:[%s14380_s6 + $0xe8] sm:$0xff]  ;;  %v10064_v33 = vld [vmem:[%s14377_s3 + $0x58] sm:$0xff] }
 0x68d   :  { %v1032_v42 = vmul.f32 1.442695, %v1029_v39  ;;  %v10045_v39 = vld [vmem:[%s14380_s6 + $0xe0] sm:$0xff] }
 0x68e   :  { %v1030_v43 = vmul.f32 1.442695, %v1028_v41  ;;  %v12036_v41 = vpack.c.bf16 %v10046_v40, %v10045_v39  ;;  %v10060_v39 = vld [vmem:[%s14383_s9] ss:$0 sm:$0xff] }
 0x68f   :  { %12501 = vpow2.f32 %v1032_v42  ;;  %v10047_v42 = vld [vmem:[%s14380_s6 + $0xf0] sm:$0xff] }
 0x690   :  { %12503 = vpow2.f32 %v1030_v43  ;;  %v10048_v43 = vld [vmem:[%s14380_s6 + $0xf8] sm:$0xff] }
 0x699   :  { %v12502_v44 = vpop.eup %12501 }
 0x69a   :  { %v12504_v45 = vpop.eup %12503  ;;  %v1037_v46 = vsel %vm590_vm4, %v12502_v44, 0.0 }
 0x69b   :  { %1038 = vadd.xlane.f32.xlu1 %v1037_v46  ;;  %v1034_v47 = vsel %vm590_vm4, %v12504_v45, 0.0  ;;  %v10040_v46 = vld [vmem:[%s14380_s6 + $0x68] sm:$0xff] }
 0x69c   :  { %1035 = vadd.xlane.f32.xlu0 %v1034_v47 }
 0x728   :  { %v1039_v49 = vpop.xlane.xlu1 %1038 }
 0x729   :  { %12505 = vrcp.f32 %v1039_v49  ;;  %v1036_v50 = vpop.xlane.xlu0 %1035  ;;  %v10042_v49 = vld [vmem:[%s14380_s6 + $0x78] sm:$0xff] }
 0x72a   :  { %12507 = vrcp.f32 %v1036_v50 }
 0x733   :  { %v12506_v51 = vpop.eup %12505 }
 0x734   :  { %v12508_v52 = vpop.eup %12507  ;;  %v1043_v54 = vmul.f32 %v12506_v51, %v12502_v44  ;;  %v12040_v44 = vpack.c.bf16 %v10048_v43, %v10047_v42 }
 0x735   :  { %v1042_v53 = vmul.f32 %v12508_v52, %v12504_v45  ;;  %v10039_v45 = vld [vmem:[%s14380_s6 + $0x60] sm:$0xff] }
 0x736   :  { %v12028_v47 = vpack.c.bf16 %v10040_v46, %v10039_v45 }
 0x737   :  { %11037 = vmatprep.mubr.msk.f32.mxu0 %vm590_vm4, %v1042_v53 }
 0x738   :  { %11038 = vmatmul.mubr.msk.f32.vlgmr.msra.gmra.mrb[14].mxu0 %vm590_vm4, %v1043_v54 }
 0x739   :  { %11041 = vmatpush3.msra.mxu0 %v10001_v48  ;;  %v10041_v48 = vld [vmem:[%s14380_s6 + $0x70] sm:$0xff] }
 0x73a   :  { %11045 = vmatprep.subr.mxu0 %v694_v55  ;;  %v12032_v52 = vpack.c.bf16 %v10042_v49, %v10041_v48 }
 0x80b   :  { %v11039_v61 = vpop.f32.mrb[14].mxu0 }
 0x80c   :  { %v1116_v62 = vpop.f32.mrb[15].mxu0 }
 0x80d   :  { %11042 = vmatprep.mubr.msk.f32.mxu0 %vm502_vm2, %v1116_v62 }
 0x80e   :  { %11043 = vmatmul.mubr.msk.f32.vlgmr.msra.gmra.mrb[16].mxu0 %vm502_vm2, %v11039_v61 }
 0x80f   :  { %11046 = vmatpush3.msra.mxu0 %v694_v55  ;;  %11047 = vmatprep.mubr.msk.f32.mxu0 %vm502_vm2, %v685_v30 }
 0x810   :  { %11995 = vmatprep.subr.bf16.mxu0 %v11994_v63 }
 0x816   :  { %11048 = vmatmul.mubr.msk.f32.vlgmr.msra.gmra.mrb[16].mxu0 %vm502_vm2, %v10992_v29  ;;  %v10030_v29 = vld [vmem:[%s14382_s8 + $0x10] sm:$0xff] }
 0x817   :  { %11997 = vmatpush3.bf16.msra.mxu0 %v11994_v63  ;;  %11069 = vmatprep.mubr.msk.f32.mxu0 %vm68_vm1, %v12886_v8 }
 0x818   :  { %11999 = vmatprep.subr.bf16.mxu0 %v11998_v6 }
 0x81b   :  { %12001 = vmatpush3.bf16.msra.mxu0 %v11998_v6 }
 0x81e   :  { %11070 = vmatmul.mubr.msk.f32.vlgmr.msra.gmra.mrb[18].mxu0 %vm68_vm1, %v12898_v12 }
 0x81f   :  { %11087 = vmatprep.mubr.msk.f32.mxu0 %vm502_vm2, %v12988_v58 }
 0x8f1   :  { %v11071_v7 = vpop.f32.mrb[18].mxu0 }
 0x8f2   :  { %v1440_v9 = vpop.f32.mrb[19].mxu0 }
 0x8f3   :  { %v12010_v10 = vpack.c.bf16 %v11071_v7, %v1440_v9 }
 0x8f5   :  { %12012 = vmatprep.subr.msk.bf16.mxu0 %vm12916_vm3, %v12010_v10 }
 0x8f6   :  { %12015 = vmatpush3.bf16.xpose.msk.msra.mxu0 %vm12916_vm3, %v12010_v10 }
 0x8f7   :  { %11097 = vmatprep.subr.mxu0 %v10030_v29 }
 0x8fd   :  { %11088 = vmatmul.mubr.msk.f32.vlgmr.msra.gmra.mrb[20].mxu0 %vm502_vm2, %v12986_v57 }
 0x8fe   :  { %11098 = vmatpush3.msra.mxu0 %v10030_v29  ;;  %v10067_v29 = vld [vmem:[%s14377_s3 + $0x60] sm:$0xff] }
 0x8ff   :  { %12029 = vmatprep.subr.bf16.mxu0 %v12028_v47 }
 0x9d0   :  { %v11089_v11 = vpop.f32.mrb[20].mxu0 }
 0x9d1   :  { %v1607_v13 = vpop.f32.mrb[21].mxu0  ;;  %v1619_v15 = vsel %vm590_vm4, %v11089_v11, -inf }
 0x9d2   :  { %1620 = vmax.xlane.f32.xlu1 %v1619_v15  ;;  %v1616_v16 = vsel %vm590_vm4, %v1607_v13, -inf }
 0x9d3   :  { %1617 = vmax.xlane.f32.xlu0 %v1616_v16 }
 0xa5f   :  { %v1621_v58 = vpop.xlane.xlu1 %1620 }
 0xa60   :  { %v1623_v17 = vsub.f32 %v11089_v11, %v1621_v58  ;;  %v1618_v18 = vpop.xlane.xlu0 %1617 }
 0xa61   :  { %v1622_v19 = vsub.f32 %v1607_v13, %v1618_v18  ;;  %v10057_v18 = vld [vmem:[%s14382_s8 + $0x18] sm:$0xff] }
 0xa62   :  { %v1626_v20 = vmul.f32 1.442695, %v1623_v17 }
 0xa63   :  { %v1624_v22 = vmul.f32 1.442695, %v1622_v19 }
 0xa64   :  { %12509 = vpow2.f32 %v1626_v20 }
 0xa65   :  { %12511 = vpow2.f32 %v1624_v22 }
 0xa6e   :  { %v12510_v23 = vpop.eup %12509 }
 0xa6f   :  { %v12512_v24 = vpop.eup %12511  ;;  %v1631_v57 = vsel %vm590_vm4, %v12510_v23, 0.0 }
 0xa70   :  { %1632 = vadd.xlane.f32.xlu1 %v1631_v57  ;;  %v1628_v25 = vsel %vm590_vm4, %v12512_v24, 0.0 }
 0xa71   :  { %1629 = vadd.xlane.f32.xlu0 %v1628_v25 }
 0xafd   :  { %v1633_v30 = vpop.xlane.xlu1 %1632 }
 0xafe   :  { %12513 = vrcp.f32 %v1633_v30  ;;  %v1630_v31 = vpop.xlane.xlu0 %1629 }
 0xaff   :  { %12515 = vrcp.f32 %v1630_v31  ;;  %v10068_v31 = vld [vmem:[%s14377_s3 + $0x68] sm:$0xff] }
 0xb00   :  { %v12061_v34 = vpack.c.bf16 %v10068_v31, %v10067_v29 }
 0xb08   :  { %v12514_v32 = vpop.eup %12513 }
 0xb09   :  { %v12516_v35 = vpop.eup %12515  ;;  %v1637_v37 = vmul.f32 %v12514_v32, %v12510_v23  ;;  %v10063_v32 = vld [vmem:[%s14377_s3 + $0x50] sm:$0xff] }
 0xb0a   :  { %v1636_v36 = vmul.f32 %v12516_v35, %v12512_v24  ;;  %v10069_v35 = vld [vmem:[%s14377_s3 + $0x70] sm:$0xff] }
 0xb0c   :  { %11094 = vmatprep.mubr.msk.f32.mxu1 %vm590_vm4, %v1636_v36  ;;  %v10070_v36 = vld [vmem:[%s14377_s3 + $0x78] sm:$0xff] }
 0xb0d   :  { %11095 = vmatmul.mubr.msk.f32.vlgmr.msra.gmra.mrb[12].mxu1 %vm590_vm4, %v1637_v37  ;;  %v12058_v37 = vpack.c.bf16 %v10064_v33, %v10063_v32 }
 0xb0e   :  { %12023 = vmatpush3.bf16.msra.mxu1 %v12020_v28  ;;  %11110 = vmatprep.mubr.msk.f32.mxu1 %vm68_vm1, %v12886_v8  ;;  %v10062_v28 = vld [vmem:[%s14377_s3 + $0x48] sm:$0xff] }
 0xb0f   :  { %12025 = vmatprep.subr.bf16.mxu1 %v12024_v38  ;;  %v12055_v30 = vpack.c.bf16 %v10062_v28, %v10061_v27 }
 0xb12   :  { %12027 = vmatpush3.bf16.msra.mxu1 %v12024_v38  ;;  %v12064_v38 = vpack.c.bf16 %v10070_v36, %v10069_v35  ;;  %v10090_v35 = vld [vmem:[%s14379_s5 + $0xa8] sm:$0xff] }
 0xb13   :  { %12037 = vmatprep.subr.bf16.mxu1 %v12036_v41 }
 0xb15   :  { %11111 = vmatmul.mubr.msk.f32.vlgmr.msra.gmra.mrb[14].mxu1 %vm68_vm1, %v12898_v12 }
 0xb16   :  { %12039 = vmatpush3.bf16.msra.mxu1 %v12036_v41  ;;  %11132 = vmatprep.mubr.msk.f32.mxu1 %vm68_vm1, %v12886_v8 }
 0xb17   :  { %12041 = vmatprep.subr.bf16.mxu1 %v12040_v44 }
 0xb1a   :  { %12043 = vmatpush3.bf16.msra.mxu1 %v12040_v44 }
 0xb1d   :  { %11133 = vmatmul.mubr.msk.f32.vlgmr.msra.gmra.mrb[16].mxu1 %vm68_vm1, %v12898_v12 }
 0xbe0   :  { %v11096_v50 = vpop.f32.mrb[12].mxu1 }
 0xbe1   :  { %v1710_v51 = vpop.f32.mrb[13].mxu1 }
 0xbe2   :  { %11099 = vmatprep.mubr.msk.f32.mxu0 %vm502_vm2, %v1710_v51 }
 0xbe3   :  { %11100 = vmatmul.mubr.msk.f32.vlgmr.msra.gmra.mrb[16].mxu0 %vm502_vm2, %v11096_v50 }
 0xbe4   :  { %12031 = vmatpush3.bf16.msra.mxu0 %v12028_v47  ;;  %11121 = vmatprep.mubr.msk.f32.mxu0 %vm68_vm1, %v12886_v8 }
 0xbe5   :  { %12033 = vmatprep.subr.bf16.mxu0 %v12032_v52 }
 0xbe8   :  { %v11112_v53 = vpop.f32.mrb[14].mxu1  ;;  %12035 = vmatpush3.bf16.msra.mxu0 %v12032_v52 }
 0xbe9   :  { %v1875_v54 = vpop.f32.mrb[15].mxu1 }
 0xbeb   :  { %11122 = vmatmul.mubr.msk.f32.vlgmr.msra.gmra.mrb[22].mxu0 %vm68_vm1, %v12898_v12 }
 0xbec   :  { %11139 = vmatprep.mubr.msk.f32.mxu0 %vm502_vm2, %v1875_v54 }
 0xbf0   :  { %v11134_v55 = vpop.f32.mrb[16].mxu1 }
 0xbf1   :  { %v2035_v56 = vpop.f32.mrb[17].mxu1 }
 0xbf2   :  { %v12050_v60 = vpack.c.bf16 %v11134_v55, %v2035_v56 }
 0xbf4   :  { %12051 = vmatprep.subr.bf16.mxu1 %v12050_v60 }
 0xbf5   :  { %12053 = vmatpush3.bf16.msra.mxu1 %v12050_v60  ;;  %v10073_v60 = vld [vmem:[%s14379_s5 + $0x80] sm:$0xff] }
 0xbf6   :  { %12054 = vmatprep.subr.bf16.mxu1 %v12704_v0 }
 0xcbe   :  { %v11123_v61 = vpop.f32.mrb[22].mxu0 }
 0xcbf   :  { %v1955_v62 = vpop.f32.mrb[23].mxu0 }
 0xcc0   :  { %v12044_v63 = vpack.c.bf16 %v11123_v61, %v1955_v62  ;;  %v10074_v61 = vld [vmem:[%s14379_s5 + $0x88] sm:$0xff] }
 0xcc1   :  { %v12066_v62 = vpack.c.bf16 %v10074_v61, %v10073_v60 }
 0xcc2   :  { %12046 = vmatprep.subr.msk.bf16.mxu0 %vm12916_vm3, %v12044_v63 }
 0xcc3   :  { %12049 = vmatpush3.bf16.xpose.msk.msra.mxu0 %vm12916_vm3, %v12044_v63 }
 0xcc4   :  { %11149 = vmatprep.subr.mxu0 %v10057_v18 }
 0xcca   :  { %11140 = vmatmul.mubr.msk.f32.vlgmr.msra.gmra.mrb[24].mxu0 %vm502_vm2, %v11112_v53 }
 0xccb   :  { %11150 = vmatpush3.msra.mxu0 %v10057_v18  ;;  %v10065_v18 = vld [vmem:[%s14378_s4 + $0x2] sm:$0x1] }
 0xccc   :  { %12060 = vmatprep.subr.bf16.mxu0 %v12704_v0 }
 0xd9d   :  { %v11141_v8 = vpop.f32.mrb[24].mxu0 }
 0xd9e   :  { %v2122_v12 = vpop.f32.mrb[25].mxu0  ;;  %v2134_v4 = vsel %vm590_vm4, %v11141_v8, -inf }
 0xd9f   :  { %2135 = vmax.xlane.f32.xlu1 %v2134_v4  ;;  %v2131_v5 = vsel %vm590_vm4, %v2122_v12, -inf }
 0xda0   :  { %2132 = vmax.xlane.f32.xlu0 %v2131_v5 }
 0xe2c   :  { %v2136_v6 = vpop.xlane.xlu1 %2135 }
 0xe2d   :  { %v2138_v7 = vsub.f32 %v11141_v8, %v2136_v6  ;;  %v2133_v9 = vpop.xlane.xlu0 %2132  ;;  %v2608_v8 = vld [vmem:[%s14381_s7] sm:$0xff]  ;;  %v10075_v6 = vld [vmem:[%s14379_s5 + $0x90] sm:$0xff] }
 0xe2e   :  { %v2137_v10 = vsub.f32 %v2122_v12, %v2133_v9  ;;  %v2609_v12 = vld [vmem:[%s14381_s7 + $0x8] sm:$0xff] }
 0xe2f   :  { %v2141_v11 = vmul.f32 1.442695, %v2138_v7  ;;  %v12075_v5 = vpack.c.bf16 %v2609_v12, %v2608_v8  ;;  %v10076_v7 = vld [vmem:[%s14379_s5 + $0x98] sm:$0xff] }
 0xe30   :  { %v2139_v13 = vmul.f32 1.442695, %v2137_v10  ;;  %v12070_v9 = vpack.c.bf16 %v10076_v7, %v10075_v6  ;;  %v13209_v10 = vld [vmem:[%s14376_s2] sm:$0xff]  ;;  %v10096_v6 = vld [vmem:[%s14381_s7 + $0x18] sm:$0xff] }
 0xe31   :  { %12517 = vpow2.f32 %v2141_v11 }
 0xe32   :  { %12519 = vpow2.f32 %v2139_v13 }
 0xe3b   :  { %v12518_v15 = vpop.eup %12517 }
 0xe3c   :  { %v12520_v16 = vpop.eup %12519  ;;  %v2146_v58 = vsel %vm590_vm4, %v12518_v15, 0.0 }
 0xe3d   :  { %2147 = vadd.xlane.f32.xlu1 %v2146_v58  ;;  %v2143_v17 = vsel %vm590_vm4, %v12520_v16, 0.0 }
 0xe3e   :  { %2144 = vadd.xlane.f32.xlu0 %v2143_v17 }
 0xeca   :  { %v2148_v19 = vpop.xlane.xlu1 %2147 }
 0xecb   :  { %12521 = vrcp.f32 %v2148_v19  ;;  %v2145_v20 = vpop.xlane.xlu0 %2144  ;;  %v10071_v19 = vld [vmem:[%s14378_s4 + $0x3] sm:$0x1] }
 0xecc   :  { %12523 = vrcp.f32 %v2145_v20 }
 0xed5   :  { %v12522_v22 = vpop.eup %12521 }
 0xed6   :  { %v12524_v23 = vpop.eup %12523  ;;  %v2152_v57 = vmul.f32 %v12522_v22, %v12518_v15 }
 0xed7   :  { %v2151_v24 = vmul.f32 %v12524_v23, %v12520_v16 }
 0xed9   :  { %11146 = vmatprep.mubr.msk.f32.mxu1 %vm590_vm4, %v2151_v24 }
 0xeda   :  { %11147 = vmatmul.mubr.msk.f32.vlgmr.msra.gmra.mrb[18].mxu1 %vm590_vm4, %v2152_v57 }
 0xedb   :  { %11162 = vmatprep.mubr.msk.f32.mxu1 %vm12705_vm0, %v12706_v1  ;;  %12056 = vmatpush3.bf16.msra.mxu1 %v12055_v30 }
 0xedc   :  { %12057 = vmatprep.subr.bf16.mxu1 %v12704_v0 }
 0xedf   :  { %12059 = vmatpush3.bf16.msra.mxu1 %v12058_v37  ;;  %v10091_v37 = vld [vmem:[%s14379_s5 + $0xb0] sm:$0xff] }
 0xee0   :  { %12067 = vmatprep.subr.bf16.mxu1 %v12066_v62 }
 0xee2   :  { %11163 = vmatmul.mubr.msk.f32.vlgmr.msra.gmra.mrb[20].mxu1 %vm68_vm1, %v12826_v14 }
 0xee3   :  { %12069 = vmatpush3.bf16.msra.mxu1 %v12066_v62 }
 0xee4   :  { %12071 = vmatprep.subr.bf16.mxu1 %v12070_v9 }
 0xee7   :  { %12073 = vmatpush3.bf16.msra.mxu1 %v12070_v9 }
 0xee8   :  { %12077 = vmatprep.subr.bf16.mxu1 %v12704_v0 }
 0xfad   :  { %v11148_v25 = vpop.f32.mrb[18].mxu1 }
 0xfae   :  { %v2225_v26 = vpop.f32.mrb[19].mxu1 }
 0xfaf   :  { %11151 = vmatprep.mubr.msk.f32.mxu0 %vm502_vm2, %v2225_v26 }
 0xfb0   :  { %11152 = vmatmul.mubr.msk.f32.vlgmr.msra.gmra.mrb[16].mxu0 %vm502_vm2, %v11148_v25 }
 0xfb1   :  { %11173 = vmatprep.mubr.msk.f32.mxu0 %vm12705_vm0, %v12706_v1  ;;  %12062 = vmatpush3.bf16.msra.mxu0 %v12061_v34  ;;  %v10089_v34 = vld [vmem:[%s14379_s5 + $0xa0] sm:$0xff] }
 0xfb2   :  { %12063 = vmatprep.subr.bf16.mxu0 %v12704_v0  ;;  %v12080_v36 = vpack.c.bf16 %v10090_v35, %v10089_v34 }
 0xfb5   :  { %12065 = vmatpush3.bf16.msra.mxu0 %v12064_v38  ;;  %v2403_v55 = vpop.f32.mrb[20].mxu1  ;;  %v10092_v38 = vld [vmem:[%s14379_s5 + $0xb8] sm:$0xff] }
 0xfb6   :  { %12074 = vmatprep.subr.bf16.mxu0 %v12704_v0  ;;  %v11164_v56 = vpop.f32.mrb[21].mxu1  ;;  %v2404_v20 = vadd.f32 %v10065_v18, %v2403_v55 }
 0xfb8   :  { %11174 = vmatmul.mubr.msk.f32.vlgmr.msra.gmra.mrb[26].mxu0 %vm68_vm1, %v12826_v14  ;;  %v2513_v23 = vrot.slane %v2404_v20, %v12882_v59  ;;  %v10099_v20 = vld [vmem:[%s14381_s7 + $0x58] sm:$0xff] }
 0xfb9   :  { %11191 = vmatprep.mubr.msk.f32.mxu0 %vm12705_vm0, %v12706_v1  ;;  %12076 = vmatpush3.bf16.msra.mxu0 %v12075_v5  ;;  %v10095_v5 = vld [vmem:[%s14381_s7 + $0x10] sm:$0xff] }
 0xfbc   :  { %11192 = vmatmul.mubr.msk.f32.vlgmr.msra.gmra.mrb[28].mxu0 %vm590_vm4, %v13209_v10 }
0x1083   :  { %v11153_v40 = vpop.f32.mrb[16].mxu0 }
0x1084   :  { %v2327_v41 = vadd.f32 %v11153_v40, %v10060_v39  ;;  %v2308_v42 = vpop.f32.mrb[17].mxu0 }
0x1085   :  { %v2326_v43 = vadd.f32 %v10060_v39, %v2308_v42  ;;  %v10080_v42 = vld [vmem:[%s14381_s7 + $0x40] sm:$0xff] }
0x1086   :  { %v13175_v44 = vadd.f32 %v2327_v41, %v12798_v3  ;;  %v12084_v41 = vpack.c.bf16 %v10092_v38, %v10091_v37 }
0x1087   :  { %v13178_v45 = vadd.f32 %v2326_v43, %v12796_v2  ;;  %v10081_v43 = vld [vmem:[%s14381_s7 + $0x48] sm:$0xff] }
0x1088   :  { %v2487_v14 = vsel %vm68_vm1, %v13175_v44, 0.0 }
0x1089   :  { %2488 = vadd.xlane.f32.xlu1 %v2487_v14  ;;  %v2484_v46 = vsel %vm68_vm1, %v13178_v45, 0.0  ;;  %v12078_v14 = vpack.c.bf16 %v10081_v43, %v10080_v42  ;;  %v10106_v43 = vld [vmem:[%s14382_s8 + $0x28] sm:$0xff] }
0x108a   :  { %2485 = vadd.xlane.f32.xlu0 %v2484_v46 }
0x108b   :  { %v2480_v63 = vpop.f32.mrb[26].mxu0 }
0x108c   :  { %v11175_v4 = vpop.f32.mrb[27].mxu0  ;;  %v2481_v22 = vadd.f32 %v10071_v19, %v2480_v63  ;;  %v10098_v19 = vld [vmem:[%s14381_s7 + $0x50] sm:$0xff] }
0x108e   :  { %v2519_v26 = vrot.slane %v2481_v22, %v12882_v59  ;;  %v12092_v22 = vpack.c.bf16 %v10099_v20, %v10098_v19 }
0x108f   :  { %v2679_v32 = vpop.f32.mrb[28].mxu0 }
0x1090   :  { %v11193_v33 = vpop.f32.mrb[29].mxu0  ;;  %11201 = vmatprep.subr.msk.mxu0 %vm502_vm2, %v2679_v32 }
0x1091   :  { %11202 = vmatpush3.xpose.msk.msra.mxu0 %vm502_vm2, %v2679_v32 }
0x1092   :  { %12081 = vmatprep.subr.bf16.mxu0 %v12080_v36 }
0x1116   :  { %v2489_v47 = vpop.xlane.xlu1 %2488 }
0x1117   :  { %v2491_v48 = vmul.f32 0.03125, %v2489_v47  ;;  %v2486_v49 = vpop.xlane.xlu0 %2485 }
0x1118   :  { %v2490_v50 = vmul.f32 0.03125, %v2486_v49 }
0x1119   :  { %v2493_v51 = vsub.f32 %v13175_v44, %v2491_v48 }
0x111a   :  { %v2492_v3 = vsub.f32 %v13178_v45, %v2490_v50 }
0x111b   :  { %v2495_v52 = vmul.f32 %v2493_v51, %v2493_v51 }
0x111c   :  { %v2494_v53 = vmul.f32 %v2492_v3, %v2492_v3 }
0x111d   :  { %v2499_v2 = vsel %vm68_vm1, %v2495_v52, 0.0 }
0x111e   :  { %2500 = vadd.xlane.f32.xlu1 %v2499_v2  ;;  %v2496_v54 = vsel %vm68_vm1, %v2494_v53, 0.0 }
0x111f   :  { %2497 = vadd.xlane.f32.xlu0 %v2496_v54 }
0x11ab   :  { %v2501_v11 = vpop.xlane.xlu1 %2500 }
0x11ac   :  { %v2503_v13 = vmul.f32 0.03125, %v2501_v11  ;;  %v2498_v15 = vpop.xlane.xlu0 %2497 }
0x11ad   :  { %v2502_v16 = vmul.f32 0.03125, %v2498_v15 }
0x11ae   :  { %v2505_v58 = vadd.f32 1e-05, %v2503_v13  ;;  %v12089_v13 = vpack.c.bf16 %v10096_v6, %v10095_v5 }
0x11af   :  { %v2504_v17 = vadd.f32 1e-05, %v2502_v16 }
0x11b0   :  { %12525 = vrsqrt.f32 %v2505_v58 }
0x11b1   :  { %12527 = vrsqrt.f32 %v2504_v17 }
0x11ba   :  { %v12526_v24 = vpop.eup %12525 }
0x11bb   :  { %v12528_v57 = vpop.eup %12527  ;;  %v2509_v25 = vmul.f32 %v12526_v24, %v2493_v51 }
0x11bc   :  { %v2508_v27 = vmul.f32 %v12528_v57, %v2492_v3 }
0x11bd   :  { %v2515_v28 = vmul.f32 %v2513_v23, %v2509_v25 }
0x11be   :  { %v2514_v29 = vmul.f32 %v2513_v23, %v2508_v27 }
0x11bf   :  { %v13222_v30 = vadd.f32 %v2519_v26, %v2515_v28 }
0x11c0   :  { %v13224_v31 = vadd.f32 %v2519_v26, %v2514_v29 }
0x11c2   :  { %11184 = vmatprep.mubr.msk.f32.mxu1 %vm68_vm1, %v13224_v31 }
0x11c3   :  { %11185 = vmatmul.mubr.msk.f32.vlgmr.msra.gmra.mrb[22].mxu1 %vm68_vm1, %v13222_v30 }
0x11c4   :  { %11198 = vmatprep.mubr.msk.f32.mxu1 %vm12705_vm0, %v12706_v1  ;;  %12079 = vmatpush3.bf16.msra.mxu1 %v12078_v14 }
0x11c7   :  { %11199 = vmatmul.mubr.msk.f32.vlgmr.msra.gmra.mrb[24].mxu1 %vm590_vm4, %v13209_v10 }
0x1296   :  { %v11186_v39 = vpop.f32.mrb[22].mxu1 }
0x1297   :  { %v2599_v40 = vpop.f32.mrb[23].mxu1 }
0x1298   :  { %11203 = vmatprep.mubr.msk.f32.mxu0 %vm502_vm2, %v2599_v40  ;;  %v10111_v40 = vld [vmem:[%s14379_s5 + $0xc0] sm:$0xff] }
0x1299   :  { %11204 = vmatmul.mubr.msk.f32.vlgmr.msra.gmra.mrb[30].mxu0 %vm502_vm2, %v11186_v39 }
0x129a   :  { %12083 = vmatpush3.bf16.msra.mxu0 %v12080_v36  ;;  %11219 = vmatprep.mubr.msk.f32.mxu0 %vm68_vm1, %v13224_v31  ;;  %v2752_v63 = vpop.f32.mrb[24].mxu1 }
0x129b   :  { %12085 = vmatprep.subr.bf16.mxu0 %v12084_v41  ;;  %v11200_v8 = vpop.f32.mrb[25].mxu1  ;;  %11206 = vmatprep.subr.mxu1 %v2752_v63 }
0x129c   :  { %11207 = vmatpush3.msra.mxu1 %v2752_v63 }
0x129d   :  { %12088 = vmatprep.subr.bf16.mxu1 %v12704_v0 }
0x129e   :  { %12087 = vmatpush3.bf16.msra.mxu0 %v12084_v41  ;;  %v10112_v41 = vld [vmem:[%s14379_s5 + $0xc8] sm:$0xff] }
0x129f   :  { %v12094_v42 = vpack.c.bf16 %v10112_v41, %v10111_v40  ;;  %v10137_v40 = vld [vmem:[%s14381_s7 + $0x30] sm:$0xff]  ;;  %v10138_v41 = vld [vmem:[%s14381_s7 + $0x38] sm:$0xff] }
0x12a1   :  { %11220 = vmatmul.mubr.msk.f32.vlgmr.msra.gmra.mrb[32].mxu0 %vm68_vm1, %v13222_v30 }
0x136c   :  { %v11205_v46 = vpop.f32.mrb[30].mxu0 }
0x136d   :  { %v2831_v47 = vpop.f32.mrb[31].mxu0  ;;  %v2843_v48 = vsel %vm502_vm2, %v11205_v46, -inf }
0x136e   :  { %2844 = vmax.xlane.f32.xlu1 %v2843_v48  ;;  %v2840_v49 = vsel %vm502_vm2, %v2831_v47, -inf  ;;  %v10113_v48 = vld [vmem:[%s14379_s5 + $0xd0] sm:$0xff] }
0x136f   :  { %2841 = vmax.xlane.f32.xlu0 %v2840_v49  ;;  %v10114_v49 = vld [vmem:[%s14379_s5 + $0xd8] sm:$0xff] }
0x1374   :  { %v11221_v50 = vpop.f32.mrb[32].mxu0 }
0x1375   :  { %v3016_v51 = vpop.f32.mrb[33].mxu0 }
0x1376   :  { %11238 = vmatprep.mubr.msk.f32.mxu0 %vm502_vm2, %v3016_v51 }
0x13fb   :  { %v2845_v3 = vpop.xlane.xlu1 %2844 }
0x13fc   :  { %v2847_v52 = vsub.f32 %v11205_v46, %v2845_v3  ;;  %v2842_v53 = vpop.xlane.xlu0 %2841 }
0x13fd   :  { %v2846_v2 = vsub.f32 %v2831_v47, %v2842_v53  ;;  %v10088_v53 = vld [vmem:[%s14382_s8 + $0x20] sm:$0xff] }
0x13fe   :  { %v2850_v54 = vmul.f32 1.442695, %v2847_v52  ;;  %v12098_v52 = vpack.c.bf16 %v10114_v49, %v10113_v48  ;;  %v10140_v48 = vld [vmem:[%s14381_s7 + $0x70] sm:$0xff]  ;;  %v10141_v49 = vld [vmem:[%s14381_s7 + $0x78] sm:$0xff] }
0x13ff   :  { %v2848_v55 = vmul.f32 1.442695, %v2846_v2 }
0x1400   :  { %12529 = vpow2.f32 %v2850_v54 }
0x1401   :  { %12531 = vpow2.f32 %v2848_v55  ;;  %v10117_v55 = vld [vmem:[%s14381_s7 + $0x20] sm:$0xff] }
0x140a   :  { %v12530_v56 = vpop.eup %12529 }
0x140b   :  { %v12532_v60 = vpop.eup %12531  ;;  %v2855_v61 = vsel %vm502_vm2, %v12530_v56, 0.0 }
0x140c   :  { %2856 = vadd.xlane.f32.xlu1 %v2855_v61  ;;  %v2852_v62 = vsel %vm502_vm2, %v12532_v60, 0.0 }
0x140d   :  { %2853 = vadd.xlane.f32.xlu0 %v2852_v62 }
0x1499   :  { %v2857_v12 = vpop.xlane.xlu1 %2856 }
0x149a   :  { %12533 = vrcp.f32 %v2857_v12  ;;  %v2854_v4 = vpop.xlane.xlu0 %2853  ;;  %v10120_v12 = vld [vmem:[%s14381_s7 + $0x60] sm:$0xff] }
0x149b   :  { %12535 = vrcp.f32 %v2854_v4  ;;  %v10121_v4 = vld [vmem:[%s14381_s7 + $0x68] sm:$0xff] }
0x149c   :  { %v12106_v5 = vpack.c.bf16 %v10121_v4, %v10120_v12 }
0x14a4   :  { %v12534_v7 = vpop.eup %12533 }
0x14a5   :  { %v12536_v9 = vpop.eup %12535  ;;  %v2861_v15 = vmul.f32 %v12534_v7, %v12530_v56  ;;  %v10118_v56 = vld [vmem:[%s14381_s7 + $0x28] sm:$0xff] }
0x14a6   :  { %v2860_v11 = vmul.f32 %v12536_v9, %v12532_v60  ;;  %v12103_v61 = vpack.c.bf16 %v10118_v56, %v10117_v55 }
0x14a8   :  { %11208 = vmatprep.mubr.msk.f32.mxu1 %vm502_vm2, %v2860_v11 }
0x14a9   :  { %11209 = vmatmul.mubr.msk.f32.vlgmr.msra.gmra.mrb[26].mxu1 %vm502_vm2, %v2861_v15 }
0x14aa   :  { %12090 = vmatpush3.bf16.msra.mxu1 %v12089_v13  ;;  %11226 = vmatprep.mubr.msk.f32.mxu1 %vm12705_vm0, %v12706_v1 }
0x14ab   :  { %12091 = vmatprep.subr.bf16.mxu1 %v12704_v0 }
0x14ad   :  { %11227 = vmatmul.mubr.msk.f32.vlgmr.msra.gmra.mrb[28].mxu1 %vm590_vm4, %v13209_v10 }
0x14ae   :  { %11233 = vmatprep.mubr.msk.f32.mxu1 %vm12705_vm0, %v12706_v1  ;;  %12093 = vmatpush3.bf16.msra.mxu1 %v12092_v22 }
0x14b1   :  { %11234 = vmatmul.mubr.msk.f32.vlgmr.msra.gmra.mrb[30].mxu1 %vm590_vm4, %v13209_v10 }
0x157c   :  { %v13281_v16 = vpop.f32.mrb[26].mxu1 }
0x157d   :  { %v13283_v58 = vpop.f32.mrb[27].mxu1 }
0x1580   :  { %v3094_v17 = vpop.f32.mrb[28].mxu1 }
0x1581   :  { %v11228_v18 = vpop.f32.mrb[29].mxu1  ;;  %11236 = vmatprep.subr.msk.mxu0 %vm502_vm2, %v3094_v17 }
0x1582   :  { %11237 = vmatpush3.xpose.msk.msra.mxu0 %vm502_vm2, %v3094_v17 }
0x1583   :  { %11246 = vmatprep.subr.mxu0 %v10106_v43 }
0x1584   :  { %v3167_v38 = vpop.f32.mrb[30].mxu1 }
0x1585   :  { %11239 = vmatmul.mubr.msk.f32.vlgmr.msra.gmra.mrb[34].mxu0 %vm502_vm2, %v11221_v50  ;;  %v11235_v39 = vpop.f32.mrb[31].mxu1  ;;  %11241 = vmatprep.subr.mxu1 %v3167_v38 }
0x1586   :  { %11242 = vmatpush3.msra.mxu1 %v3167_v38  ;;  %11247 = vmatpush3.msra.mxu0 %v10106_v43  ;;  %v12117_v43 = vpack.c.bf16 %v10138_v41, %v10137_v40 }
0x1587   :  { %12095 = vmatprep.subr.bf16.mxu1 %v12094_v42  ;;  %11251 = vmatprep.subr.mxu0 %v10088_v53 }
0x1658   :  { %v11240_v23 = vpop.f32.mrb[34].mxu0 }
0x1659   :  { %v3246_v24 = vpop.f32.mrb[35].mxu0  ;;  %v3258_v57 = vsel %vm502_vm2, %v11240_v23, -inf }
0x165a   :  { %3259 = vmax.xlane.f32.xlu1 %v3258_v57  ;;  %v3255_v25 = vsel %vm502_vm2, %v3246_v24, -inf }
0x165b   :  { %3256 = vmax.xlane.f32.xlu0 %v3255_v25  ;;  %v10131_v25 = vld [vmem:[%s14379_s5 + $0xe0] sm:$0xff] }
0x16e7   :  { %v3260_v26 = vpop.xlane.xlu1 %3259 }
0x16e8   :  { %v3262_v27 = vsub.f32 %v11240_v23, %v3260_v26  ;;  %v3257_v28 = vpop.xlane.xlu0 %3256  ;;  %v10132_v26 = vld [vmem:[%s14379_s5 + $0xe8] sm:$0xff] }
0x16e9   :  { %v3261_v29 = vsub.f32 %v3246_v24, %v3257_v28  ;;  %v10128_v28 = vld [vmem:[%s14382_s8 + $0x30] sm:$0xff] }
0x16ea   :  { %v3265_v32 = vmul.f32 1.442695, %v3262_v27  ;;  %v12108_v27 = vpack.c.bf16 %v10132_v26, %v10131_v25  ;;  %v10161_v25 = vld [vmem:[%s14377_s3 + $0xb0] sm:$0xff]  ;;  %v10162_v26 = vld [vmem:[%s14377_s3 + $0xb8] sm:$0xff] }
0x16eb   :  { %v3263_v33 = vmul.f32 1.442695, %v3261_v29 }
0x16ec   :  { %12537 = vpow2.f32 %v3265_v32 }
0x16ed   :  { %12539 = vpow2.f32 %v3263_v33 }
0x16f6   :  { %v12538_v34 = vpop.eup %12537 }
0x16f7   :  { %v12540_v35 = vpop.eup %12539  ;;  %v3270_v36 = vsel %vm502_vm2, %v12538_v34, 0.0 }
0x16f8   :  { %3271 = vadd.xlane.f32.xlu1 %v3270_v36  ;;  %v3267_v37 = vsel %vm502_vm2, %v12540_v35, 0.0 }
0x16f9   :  { %3268 = vadd.xlane.f32.xlu0 %v3267_v37 }
0x1785   :  { %v3272_v14 = vpop.xlane.xlu1 %3271 }
0x1786   :  { %12541 = vrcp.f32 %v3272_v14  ;;  %v3269_v46 = vpop.xlane.xlu0 %3268 }
0x1787   :  { %12543 = vrcp.f32 %v3269_v46 }
0x1790   :  { %v12542_v47 = vpop.eup %12541 }
0x1791   :  { %v12544_v50 = vpop.eup %12543  ;;  %v3276_v3 = vmul.f32 %v12542_v47, %v12538_v34  ;;  %v10133_v34 = vld [vmem:[%s14379_s5 + $0xf0] sm:$0xff] }
0x1792   :  { %v3275_v51 = vmul.f32 %v12544_v50, %v12540_v35  ;;  %v10134_v35 = vld [vmem:[%s14379_s5 + $0xf8] sm:$0xff]  ;;  %v12120_v50 = vpack.c.bf16 %v10141_v49, %v10140_v48  ;;  %v5020_v48 = vld [vmem:[#allocation2 + $0x10] sm:$0xff] }
0x1793   :  { %v12112_v39 = vpack.c.bf16 %v10134_v35, %v10133_v34 }
0x1794   :  { %11243 = vmatprep.mubr.msk.f32.mxu1 %vm502_vm2, %v3275_v51 }
0x1795   :  { %11244 = vmatmul.mubr.msk.f32.vlgmr.msra.gmra.mrb[32].mxu1 %vm502_vm2, %v3276_v3 }
0x1796   :  { %12097 = vmatpush3.bf16.msra.mxu1 %v12094_v42  ;;  %11264 = vmatprep.mubr.msk.f32.mxu1 %vm68_vm1, %v13224_v31 }
0x1797   :  { %12099 = vmatprep.subr.bf16.mxu1 %v12098_v52 }
0x179a   :  { %12101 = vmatpush3.bf16.msra.mxu1 %v12098_v52 }
0x179b   :  { %12105 = vmatprep.subr.bf16.mxu1 %v12704_v0 }
0x179d   :  { %11265 = vmatmul.mubr.msk.f32.vlgmr.msra.gmra.mrb[34].mxu1 %vm68_vm1, %v13222_v30 }
0x179e   :  { %11278 = vmatprep.mubr.msk.f32.mxu1 %vm12705_vm0, %v12706_v1  ;;  %12107 = vmatpush3.bf16.msra.mxu1 %v12106_v5  ;;  %v10148_v5 = vld [vmem:[%s14382_s8 + $0x38] sm:$0xff] }
0x17a1   :  { %11279 = vmatmul.mubr.msk.f32.vlgmr.msra.gmra.mrb[36].mxu1 %vm590_vm4, %v13209_v10 }
0x1868   :  { %v11245_v2 = vpop.f32.mrb[32].mxu1 }
0x1869   :  { %v3349_v54 = vpop.f32.mrb[33].mxu1 }
0x186a   :  { %11248 = vmatprep.mubr.msk.f32.mxu0 %vm502_vm2, %v3349_v54 }
0x186b   :  { %11249 = vmatmul.mubr.msk.f32.vlgmr.msra.gmra.mrb[36].mxu0 %vm502_vm2, %v11245_v2 }
0x186c   :  { %11252 = vmatpush3.msra.mxu0 %v10088_v53  ;;  %11253 = vmatprep.mubr.msk.f32.mxu0 %vm502_vm2, %v13283_v58 }
0x186d   :  { %12102 = vmatprep.subr.bf16.mxu0 %v12704_v0 }
0x1870   :  { %v11266_v60 = vpop.f32.mrb[34].mxu1 }
0x1871   :  { %v3593_v62 = vpop.f32.mrb[35].mxu1 }
0x1873   :  { %11254 = vmatmul.mubr.msk.f32.vlgmr.msra.gmra.mrb[36].mxu0 %vm502_vm2, %v13281_v16 }
0x1874   :  { %12104 = vmatpush3.bf16.msra.mxu0 %v12103_v61  ;;  %11271 = vmatprep.mubr.msk.f32.mxu0 %vm12705_vm0, %v12706_v1  ;;  %v3744_v24 = vpop.f32.mrb[36].mxu1 }
0x1875   :  { %v11280_v57 = vpop.f32.mrb[37].mxu1  ;;  %11286 = vmatprep.subr.mxu1 %v3744_v24 }
0x1876   :  { %11287 = vmatpush3.msra.mxu1 %v3744_v24  ;;  %v10156_v24 = vld [vmem:[%s14377_s3 + $0x98] sm:$0xff] }
0x1877   :  { %11272 = vmatmul.mubr.msk.f32.vlgmr.msra.gmra.mrb[38].mxu0 %vm590_vm4, %v13209_v10  ;;  %12109 = vmatprep.subr.bf16.mxu1 %v12108_v27 }
0x1878   :  { %11283 = vmatprep.mubr.msk.f32.mxu0 %vm502_vm2, %v3593_v62 }
0x194a   :  { %v3671_v63 = vpop.f32.mrb[38].mxu0 }
0x194b   :  { %v11273_v8 = vpop.f32.mrb[39].mxu0  ;;  %11281 = vmatprep.subr.msk.mxu0 %vm502_vm2, %v3671_v63 }
0x194c   :  { %11282 = vmatpush3.xpose.msk.msra.mxu0 %vm502_vm2, %v3671_v63 }
0x194d   :  { %11291 = vmatprep.subr.mxu0 %v10128_v28 }
0x194f   :  { %11284 = vmatmul.mubr.msk.f32.vlgmr.msra.gmra.mrb[40].mxu0 %vm502_vm2, %v11266_v60 }
0x1950   :  { %11292 = vmatpush3.msra.mxu0 %v10128_v28  ;;  %v12132_v28 = vpack.c.bf16 %v10162_v26, %v10161_v25 }
0x1951   :  { %12116 = vmatprep.subr.bf16.mxu0 %v12704_v0 }
0x1a22   :  { %v11285_v6 = vpop.f32.mrb[40].mxu0 }
0x1a23   :  { %v3823_v7 = vpop.f32.mrb[41].mxu0  ;;  %v3835_v9 = vsel %vm502_vm2, %v11285_v6, -inf }
0x1a24   :  { %3836 = vmax.xlane.f32.xlu1 %v3835_v9  ;;  %v3832_v11 = vsel %vm502_vm2, %v3823_v7, -inf }
0x1a25   :  { %3833 = vmax.xlane.f32.xlu0 %v3832_v11 }
0x1ab1   :  { %v3837_v13 = vpop.xlane.xlu1 %3836 }
0x1ab2   :  { %v3839_v15 = vsub.f32 %v11285_v6, %v3837_v13  ;;  %v3834_v16 = vpop.xlane.xlu0 %3833 }
0x1ab3   :  { %v3838_v58 = vsub.f32 %v3823_v7, %v3834_v16 }
0x1ab4   :  { %v3842_v17 = vmul.f32 1.442695, %v3839_v15 }
0x1ab5   :  { %v3840_v18 = vmul.f32 1.442695, %v3838_v58 }
0x1ab6   :  { %12545 = vpow2.f32 %v3842_v17  ;;  %v10153_v17 = vld [vmem:[%s14377_s3 + $0x80] sm:$0xff] }
0x1ab7   :  { %12547 = vpow2.f32 %v3840_v18  ;;  %v10154_v18 = vld [vmem:[%s14377_s3 + $0x88] sm:$0xff] }
0x1ac0   :  { %v12546_v19 = vpop.eup %12545 }
0x1ac1   :  { %v12548_v20 = vpop.eup %12547  ;;  %v3847_v22 = vsel %vm502_vm2, %v12546_v19, 0.0 }
0x1ac2   :  { %3848 = vadd.xlane.f32.xlu1 %v3847_v22  ;;  %v3844_v23 = vsel %vm502_vm2, %v12548_v20, 0.0  ;;  %v10160_v22 = vld [vmem:[%s14377_s3 + $0xa8] sm:$0xff] }
0x1ac3   :  { %3845 = vadd.xlane.f32.xlu0 %v3844_v23  ;;  %v10155_v23 = vld [vmem:[%s14377_s3 + $0x90] sm:$0xff] }
0x1b4f   :  { %v3849_v29 = vpop.xlane.xlu1 %3848 }
0x1b50   :  { %12549 = vrcp.f32 %v3849_v29  ;;  %v3846_v32 = vpop.xlane.xlu0 %3845  ;;  %v12649_v29 = vld [vmem:[%s14375_s1] sm:$0x1] }
0x1b51   :  { %12551 = vrcp.f32 %v3846_v32  ;;  %v10152_v32 = vld [vmem:[%s14383_s9 + $0x1] ss:$0 sm:$0xff] }
0x1b5a   :  { %v12550_v33 = vpop.eup %12549 }
0x1b5b   :  { %v12552_v36 = vpop.eup %12551  ;;  %v3853_v38 = vmul.f32 %v12550_v33, %v12546_v19  ;;  %v10159_v19 = vld [vmem:[%s14377_s3 + $0xa0] sm:$0xff] }
0x1b5c   :  { %v3852_v37 = vmul.f32 %v12552_v36, %v12548_v20  ;;  %v12123_v20 = vpack.c.bf16 %v10154_v18, %v10153_v17  ;;  %v12129_v57 = vpack.c.bf16 %v10160_v22, %v10159_v19 }
0x1b5e   :  { %11288 = vmatprep.mubr.msk.f32.mxu1 %vm502_vm2, %v3852_v37 }
0x1b5f   :  { %11289 = vmatmul.mubr.msk.f32.vlgmr.msra.gmra.mrb[38].mxu1 %vm502_vm2, %v3853_v38 }
0x1b60   :  { %12111 = vmatpush3.bf16.msra.mxu1 %v12108_v27  ;;  %11304 = vmatprep.mubr.msk.f32.mxu1 %vm68_vm1, %v13224_v31  ;;  %v12126_v27 = vpack.c.bf16 %v10156_v24, %v10155_v23  ;;  %v10163_v24 = vld [vmem:[%s14378_s4 + $0x5] sm:$0x1] }
0x1b61   :  { %12113 = vmatprep.subr.bf16.mxu1 %v12112_v39 }
0x1b64   :  { %12115 = vmatpush3.bf16.msra.mxu1 %v12112_v39 }
0x1b67   :  { %11305 = vmatmul.mubr.msk.f32.vlgmr.msra.gmra.mrb[40].mxu1 %vm68_vm1, %v13222_v30 }
0x1c32   :  { %v11290_v42 = vpop.f32.mrb[38].mxu1 }
0x1c33   :  { %v3926_v14 = vpop.f32.mrb[39].mxu1 }
0x1c34   :  { %11293 = vmatprep.mubr.msk.f32.mxu0 %vm502_vm2, %v3926_v14 }
0x1c35   :  { %11294 = vmatmul.mubr.msk.f32.vlgmr.msra.gmra.mrb[36].mxu0 %vm502_vm2, %v11290_v42 }
0x1c36   :  { %12118 = vmatpush3.bf16.msra.mxu0 %v12117_v43  ;;  %11311 = vmatprep.mubr.msk.f32.mxu0 %vm12705_vm0, %v12706_v1 }
0x1c37   :  { %12119 = vmatprep.subr.bf16.mxu0 %v12704_v0 }
0x1c39   :  { %11312 = vmatmul.mubr.msk.f32.vlgmr.msra.gmra.mrb[42].mxu0 %vm590_vm4, %v13209_v10 }
0x1c3a   :  { %v11306_v30 = vpop.f32.mrb[40].mxu1  ;;  %11318 = vmatprep.mubr.msk.f32.mxu0 %vm12705_vm0, %v12706_v1  ;;  %12121 = vmatpush3.bf16.msra.mxu0 %v12120_v50 }
0x1c3b   :  { %v4091_v31 = vpop.f32.mrb[41].mxu1 }
0x1c3c   :  { %11323 = vmatprep.mubr.msk.f32.mxu1 %vm502_vm2, %v4091_v31 }
0x1c3d   :  { %11319 = vmatmul.mubr.msk.f32.vlgmr.msra.gmra.mrb[44].mxu0 %vm590_vm4, %v13209_v10 }
0x1d0c   :  { %v4169_v46 = vpop.f32.mrb[42].mxu0 }
0x1d0d   :  { %v11313_v47 = vpop.f32.mrb[43].mxu0  ;;  %11321 = vmatprep.subr.msk.mxu1 %vm502_vm2, %v4169_v46 }
0x1d0e   :  { %11322 = vmatpush3.xpose.msk.msra.mxu1 %vm502_vm2, %v4169_v46  ;;  %v5021_v46 = vld [vmem:[#allocation2 + $0x18] sm:$0xff] }
0x1d0f   :  { %12122 = vmatprep.subr.bf16.mxu1 %v12704_v0  ;;  %v5182_v50 = vsel %vm68_vm1, %v5021_v46, 0.0 }
0x1d10   :  { %v4242_v12 = vpop.f32.mrb[44].mxu0 }
0x1d11   :  { %11324 = vmatmul.mubr.msk.f32.vlgmr.msra.gmra.mrb[42].mxu1 %vm502_vm2, %v11306_v30  ;;  %v11320_v4 = vpop.f32.mrb[45].mxu0  ;;  %11326 = vmatprep.subr.mxu0 %v4242_v12 }
0x1d12   :  { %11344 = vmatprep.mubr.msk.f32.mxu1 %vm12705_vm0, %v12706_v1  ;;  %11327 = vmatpush3.msra.mxu0 %v4242_v12  ;;  %v4724_v12 = vld [vmem:[%s14384_s10 + $0x10] sm:$0xff]  ;;  %v4725_v4 = vld [vmem:[%s14384_s10 + $0x18] sm:$0xff] }
0x1d13   :  { %11331 = vmatprep.subr.mxu0 %v10148_v5  ;;  %12124 = vmatpush3.bf16.msra.mxu1 %v12123_v20  ;;  %v10157_v20 = vld [vmem:[%s14378_s4 + $0x4] sm:$0x1] }
0x1d14   :  { %12125 = vmatprep.subr.bf16.mxu1 %v12704_v0 }
0x1d17   :  { %12127 = vmatpush3.bf16.msra.mxu1 %v12126_v27 }
0x1d1a   :  { %11345 = vmatmul.mubr.msk.f32.vlgmr.msra.gmra.mrb[44].mxu1 %vm68_vm1, %v12649_v29 }
0x1de4   :  { %v11325_v51 = vpop.f32.mrb[42].mxu1 }
0x1de5   :  { %v4321_v3 = vpop.f32.mrb[43].mxu1  ;;  %v4333_v52 = vsel %vm502_vm2, %v11325_v51, -inf }
0x1de6   :  { %4334 = vmax.xlane.f32.xlu1 %v4333_v52  ;;  %v4330_v53 = vsel %vm502_vm2, %v4321_v3, -inf }
0x1de7   :  { %4331 = vmax.xlane.f32.xlu0 %v4330_v53  ;;  %v10168_v53 = vld [vmem:[%s14384_s10 + $0x20] sm:$0xff] }
0x1e73   :  { %v4335_v2 = vpop.xlane.xlu1 %4334 }
0x1e74   :  { %v4337_v54 = vsub.f32 %v11325_v51, %v4335_v2  ;;  %v4332_v55 = vpop.xlane.xlu0 %4331  ;;  %v5179_v51 = vsel %vm68_vm1, %v5020_v48, 0.0  ;;  %v10169_v2 = vld [vmem:[%s14384_s10 + $0x28] sm:$0xff] }
0x1e75   :  { %v4336_v56 = vsub.f32 %v4321_v3, %v4332_v55  ;;  %v4603_v3 = vpop.f32.mrb[44].mxu1  ;;  %v4722_v55 = vld [vmem:[%s14384_s10] sm:$0xff] }
0x1e76   :  { %v4340_v60 = vmul.f32 1.442695, %v4337_v54  ;;  %v11346_v52 = vpop.f32.mrb[45].mxu1  ;;  %v12142_v54 = vpack.c.bf16 %v10169_v2, %v10168_v53  ;;  %v4916_v53 = vld [vmem:[%s14386_s12 + $0x10] sm:$0xff] }
0x1e77   :  { %v4338_v61 = vmul.f32 1.442695, %v4336_v56  ;;  %v4723_v56 = vld [vmem:[%s14384_s10 + $0x8] sm:$0xff] }
0x1e78   :  { %12553 = vpow2.f32 %v4340_v60  ;;  %v12134_v60 = vpack.c.bf16 %v4723_v56, %v4722_v55  ;;  %v4915_v52 = vld [vmem:[%s14386_s12 + $0x8] sm:$0xff] }
0x1e79   :  { %12555 = vpow2.f32 %v4338_v61 }
0x1e7a   :  { %12135 = vmatprep.subr.bf16.mxu1 %v12134_v60 }
0x1e7b   :  { %12137 = vmatpush3.bf16.msra.mxu1 %v12134_v60  ;;  %v4918_v60 = vld [vmem:[%s14386_s12 + $0x20] sm:$0xff] }
0x1e82   :  { %v12554_v62 = vpop.eup %12553 }
0x1e83   :  { %v12556_v63 = vpop.eup %12555  ;;  %v4345_v10 = vsel %vm502_vm2, %v12554_v62, 0.0 }
0x1e84   :  { %4346 = vadd.xlane.f32.xlu1 %v4345_v10  ;;  %v4342_v8 = vsel %vm502_vm2, %v12556_v63, 0.0  ;;  %v10171_v10 = vld [vmem:[%s14384_s10 + $0x38] sm:$0xff] }
0x1e85   :  { %4343 = vadd.xlane.f32.xlu0 %v4342_v8 }
0x1f11   :  { %v4347_v6 = vpop.xlane.xlu1 %4346 }
0x1f12   :  { %12557 = vrcp.f32 %v4347_v6  ;;  %v4344_v7 = vpop.xlane.xlu0 %4343 }
0x1f13   :  { %12559 = vrcp.f32 %v4344_v7 }
0x1f1c   :  { %v12558_v9 = vpop.eup %12557 }
0x1f1d   :  { %v12560_v11 = vpop.eup %12559  ;;  %v4351_v15 = vmul.f32 %v12558_v9, %v12554_v62 }
0x1f1e   :  { %v4350_v13 = vmul.f32 %v12560_v11, %v12556_v63  ;;  %v10170_v63 = vld [vmem:[%s14384_s10 + $0x30] sm:$0xff] }
0x1f1f   :  { %v12146_v8 = vpack.c.bf16 %v10171_v10, %v10170_v63  ;;  %v4920_v63 = vld [vmem:[%s14386_s12 + $0x30] sm:$0xff]  ;;  %v4921_v10 = vld [vmem:[%s14386_s12 + $0x38] sm:$0xff] }
0x1f20   :  { %11328 = vmatprep.mubr.msk.f32.mxu0 %vm502_vm2, %v4350_v13 }
0x1f21   :  { %11329 = vmatmul.mubr.msk.f32.vlgmr.msra.gmra.mrb[46].mxu0 %vm502_vm2, %v4351_v15 }
0x1f22   :  { %11332 = vmatpush3.msra.mxu0 %v10148_v5  ;;  %v12138_v5 = vpack.c.bf16 %v4725_v4, %v4724_v12  ;;  %v4922_v12 = vld [vmem:[%s14386_s12 + $0x40] sm:$0xff]  ;;  %v4923_v4 = vld [vmem:[%s14386_s12 + $0x48] sm:$0xff] }
0x1f23   :  { %12128 = vmatprep.subr.bf16.mxu0 %v12704_v0 }
0x1f24   :  { %12139 = vmatprep.subr.bf16.mxu1 %v12138_v5 }
0x1f25   :  { %12141 = vmatpush3.bf16.msra.mxu1 %v12138_v5  ;;  %v12166_v5 = vpack.c.bf16 %v4923_v4, %v4922_v12 }
0x1ff4   :  { %v11330_v16 = vpop.f32.mrb[46].mxu0 }
0x1ff5   :  { %v4424_v58 = vpop.f32.mrb[47].mxu0 }
0x1ff6   :  { %11333 = vmatprep.mubr.msk.f32.mxu0 %vm502_vm2, %v4424_v58 }
0x1ff7   :  { %11334 = vmatmul.mubr.msk.f32.vlgmr.msra.gmra.mrb[36].mxu0 %vm502_vm2, %v11330_v16 }
0x1ff8   :  { %11355 = vmatprep.mubr.msk.f32.mxu0 %vm12705_vm0, %v12706_v1  ;;  %12130 = vmatpush3.bf16.msra.mxu0 %v12129_v57  ;;  %v4604_v57 = vadd.f32 %v10157_v20, %v4603_v3  ;;  %v4914_v3 = vld [vmem:[%s14386_s12] sm:$0xff]  ;;  %v5220_v20 = vld [vmem:[%s14379_s5 + $0x18] sm:$0xff] }
0x1ff9   :  { %12131 = vmatprep.subr.bf16.mxu0 %v12704_v0  ;;  %v12150_v2 = vpack.c.bf16 %v4915_v52, %v4914_v3 }
0x1ffb   :  { %12151 = vmatprep.subr.bf16.mxu1 %v12150_v2 }
0x1ffc   :  { %12133 = vmatpush3.bf16.msra.mxu0 %v12132_v28 }
0x1ffd   :  { %12143 = vmatprep.subr.bf16.mxu0 %v12142_v54 }
0x1fff   :  { %11356 = vmatmul.mubr.msk.f32.vlgmr.msra.gmra.mrb[48].mxu0 %vm68_vm1, %v12649_v29  ;;  %v4713_v29 = vrot.slane %v4604_v57, %v12882_v59  ;;  %v4929_v57 = vld [vmem:[%s14386_s12 + $0x78] sm:$0xff] }
0x2000   :  { %12145 = vmatpush3.bf16.msra.mxu0 %v12142_v54  ;;  %v4917_v54 = vld [vmem:[%s14386_s12 + $0x18] sm:$0xff] }
0x2001   :  { %12147 = vmatprep.subr.bf16.mxu0 %v12146_v8  ;;  %v12154_v56 = vpack.c.bf16 %v4917_v54, %v4916_v53 }
0x2004   :  { %12149 = vmatpush3.bf16.msra.mxu0 %v12146_v8  ;;  %v12162_v8 = vpack.c.bf16 %v4921_v10, %v4920_v63 }
0x2005   :  { %12182 = vmatprep.subr.bf16.mxu0 %v12704_v0 }
0x20ca   :  { %v11335_v33 = vpop.f32.mrb[36].mxu0 }
0x20cb   :  { %v4527_v34 = vadd.f32 %v11335_v33, %v10152_v32  ;;  %v4507_v35 = vpop.f32.mrb[37].mxu0 }
0x20cc   :  { %v4526_v36 = vadd.f32 %v10152_v32, %v4507_v35 }
0x20cd   :  { %v13461_v37 = vadd.f32 %v4527_v34, %v13175_v44 }
0x20ce   :  { %v13464_v38 = vadd.f32 %v4526_v36, %v13178_v45 }
0x20cf   :  { %v4687_v39 = vsel %vm68_vm1, %v13461_v37, 0.0 }
0x20d0   :  { %4688 = vadd.xlane.f32.xlu1 %v4687_v39  ;;  %v4684_v40 = vsel %vm68_vm1, %v13464_v38, 0.0 }
0x20d1   :  { %4685 = vadd.xlane.f32.xlu0 %v4684_v40  ;;  %v5026_v40 = vld [vmem:[%s14377_s3] sm:$0xff] }
0x20d2   :  { %v4680_v61 = vpop.f32.mrb[48].mxu0 }
0x20d3   :  { %v11357_v62 = vpop.f32.mrb[49].mxu0  ;;  %v4681_v28 = vadd.f32 %v10163_v24, %v4680_v61  ;;  %v4919_v61 = vld [vmem:[%s14386_s12 + $0x28] sm:$0xff]  ;;  %v4928_v24 = vld [vmem:[%s14386_s12 + $0x70] sm:$0xff] }
0x20d4   :  { %v12158_v62 = vpack.c.bf16 %v4919_v61, %v4918_v60 }
0x20d5   :  { %v4719_v35 = vrot.slane %v4681_v28, %v12882_v59 }
0x215d   :  { %v4689_v41 = vpop.xlane.xlu1 %4688 }
0x215e   :  { %v4691_v42 = vmul.f32 0.03125, %v4689_v41  ;;  %v4686_v43 = vpop.xlane.xlu0 %4685  ;;  %v5027_v41 = vld [vmem:[%s14377_s3 + $0x8] sm:$0xff] }
0x215f   :  { %v4690_v14 = vmul.f32 0.03125, %v4686_v43 }
0x2160   :  { %v13471_v30 = vsub.f32 %v13461_v37, %v4691_v42 }
0x2161   :  { %v13474_v44 = vsub.f32 %v13464_v38, %v4690_v14 }
0x2162   :  { %v4695_v45 = vmul.f32 %v13471_v30, %v13471_v30 }
0x2163   :  { %v4694_v31 = vmul.f32 %v13474_v44, %v13474_v44 }
0x2164   :  { %v4699_v47 = vsel %vm68_vm1, %v4695_v45, 0.0  ;;  %v12183_v45 = vpack.c.bf16 %v5027_v41, %v5026_v40  ;;  %v10173_v40 = vld [vmem:[%s14385_s11 + $0x1] ss:$0 sm:$0xff] }
0x2165   :  { %4700 = vadd.xlane.f32.xlu1 %v4699_v47  ;;  %v4696_v49 = vsel %vm68_vm1, %v4694_v31, 0.0  ;;  %v10182_v47 = vld [vmem:[%s14377_s3 + $0x28] sm:$0xff] }
0x2166   :  { %4697 = vadd.xlane.f32.xlu0 %v4696_v49 }
0x2169   :  { %5183 = vadd.xlane.f32.xlu1 %v5182_v50  ;;  %v10183_v50 = vld [vmem:[%s14377_s3 + $0x30] sm:$0xff] }
0x216a   :  { %5180 = vadd.xlane.f32.xlu0 %v5179_v51  ;;  %v10184_v51 = vld [vmem:[%s14377_s3 + $0x38] sm:$0xff] }
0x216b   :  { %v12192_v55 = vpack.c.bf16 %v10184_v51, %v10183_v50 }
0x21f2   :  { %v4701_v6 = vpop.xlane.xlu1 %4700 }
0x21f3   :  { %v4703_v7 = vmul.f32 0.03125, %v4701_v6  ;;  %v4698_v9 = vpop.xlane.xlu0 %4697  ;;  %v4924_v6 = vld [vmem:[%s14386_s12 + $0x50] sm:$0xff] }
0x21f4   :  { %v4702_v11 = vmul.f32 0.03125, %v4698_v9 }
0x21f5   :  { %v4705_v13 = vadd.f32 1e-05, %v4703_v7  ;;  %v4925_v7 = vld [vmem:[%s14386_s12 + $0x58] sm:$0xff] }
0x21f6   :  { %v4704_v15 = vadd.f32 1e-05, %v4702_v11  ;;  %v5184_v16 = vpop.xlane.xlu1 %5183  ;;  %v12170_v9 = vpack.c.bf16 %v4925_v7, %v4924_v6  ;;  %v5217_v11 = vld [vmem:[%s14379_s5] sm:$0xff] }
0x21f7   :  { %12561 = vrsqrt.f32 %v4705_v13  ;;  %v5186_v58 = vmul.f32 0.03125, %v5184_v16  ;;  %v5181_v17 = vpop.xlane.xlu0 %5180  ;;  %v5218_v13 = vld [vmem:[%s14379_s5 + $0x8] sm:$0xff]  ;;  %v4926_v16 = vld [vmem:[%s14386_s12 + $0x60] sm:$0xff] }
0x21f8   :  { %12563 = vrsqrt.f32 %v4704_v15  ;;  %v5185_v18 = vmul.f32 0.03125, %v5181_v17  ;;  %v12194_v15 = vpack.c.bf16 %v5218_v13, %v5217_v11 }
0x21f9   :  { %v13509_v19 = vsub.f32 %v5021_v46, %v5186_v58  ;;  %v10181_v46 = vld [vmem:[%s14377_s3 + $0x20] sm:$0xff]  ;;  %v4927_v58 = vld [vmem:[%s14386_s12 + $0x68] sm:$0xff] }
0x21fa   :  { %v13514_v22 = vsub.f32 %v5020_v48, %v5185_v18  ;;  %v13557_v48 = vld [vmem:[%s14375_s1 + $0x1] sm:$0x1]  ;;  %v12189_v49 = vpack.c.bf16 %v10182_v47, %v10181_v46  ;;  %v12174_v17 = vpack.c.bf16 %v4927_v58, %v4926_v16  ;;  %v5219_v18 = vld [vmem:[%s14379_s5 + $0x10] sm:$0xff] }
0x21fb   :  { %v5190_v23 = vmul.f32 %v13509_v19, %v13509_v19 }
0x21fc   :  { %v5189_v25 = vmul.f32 %v13514_v22, %v13514_v22 }
0x21fd   :  { %v5194_v26 = vsel %vm68_vm1, %v5190_v23, 0.0  ;;  %v12198_v23 = vpack.c.bf16 %v5220_v20, %v5219_v18  ;;  %v5305_v18 = vld [vmem:[%s14380_s6 + $0x18] sm:$0xff] }
0x21fe   :  { %5195 = vadd.xlane.f32.xlu1 %v5194_v26  ;;  %v5191_v27 = vsel %vm68_vm1, %v5189_v25, 0.0  ;;  %v12178_v25 = vpack.c.bf16 %v4929_v57, %v4928_v24  ;;  %v5302_v26 = vld [vmem:[%s14380_s6] sm:$0xff]  ;;  %v10194_v20 = vld [vmem:[%s14380_s6 + $0x98] sm:$0xff] }
0x21ff   :  { %5192 = vadd.xlane.f32.xlu0 %v5191_v27  ;;  %v5303_v27 = vld [vmem:[%s14380_s6 + $0x8] sm:$0xff] }
0x2200   :  { %v13639_v28 = vpack.c.bf16 %v5303_v27, %v5302_v26 }
0x2201   :  { %v12562_v32 = vpop.eup %12561 }
0x2202   :  { %v12564_v33 = vpop.eup %12563  ;;  %v4709_v34 = vmul.f32 %v12562_v32, %v13471_v30  ;;  %v5028_v30 = vld [vmem:[%s14377_s3 + $0x10] sm:$0xff]  ;;  %v10192_v32 = vld [vmem:[%s14380_s6 + $0x88] sm:$0xff] }
0x2203   :  { %v4708_v36 = vmul.f32 %v12564_v33, %v13474_v44  ;;  %v5029_v44 = vld [vmem:[%s14377_s3 + $0x18] sm:$0xff] }
0x2204   :  { %v4715_v39 = vmul.f32 %v4713_v29, %v4709_v34  ;;  %v12186_v31 = vpack.c.bf16 %v5029_v44, %v5028_v30 }
0x2205   :  { %v4714_v42 = vmul.f32 %v4713_v29, %v4708_v36  ;;  %v10191_v29 = vld [vmem:[%s14380_s6 + $0x80] sm:$0xff] }
0x2206   :  { %v4721_v43 = vadd.f32 %v4719_v35, %v4715_v39  ;;  %v13648_v33 = vpack.c.bf16 %v10192_v32, %v10191_v29  ;;  %v10177_v29 = vld [vmem:[%s14383_s9 + $0x2] ss:$0 sm:$0xff] }
0x2207   :  { %v4720_v14 = vadd.f32 %v4719_v35, %v4714_v42 }
0x2209   :  { %11366 = vmatprep.mubr.msk.f32.mxu1 %vm68_vm1, %v4720_v14  ;;  %11377 = vmatprep.mubr.msk.f32.mxu0 %vm68_vm1, %v4720_v14 }
0x220a   :  { %11367 = vmatmul.mubr.msk.f32.vlgmr.msra.gmra.mrb[46].mxu1 %vm68_vm1, %v4721_v43  ;;  %11378 = vmatmul.mubr.msk.f32.vlgmr.msra.gmra.mrb[50].mxu0 %vm68_vm1, %v4721_v43 }
0x220b   :  { %12184 = vmatpush3.bf16.msra.mxu0 %v12183_v45  ;;  %11423 = vmatprep.mubr.msk.f32.mxu0 %vm12705_vm0, %v12706_v1 }
0x220c   :  { %12185 = vmatprep.subr.bf16.mxu0 %v12704_v0  ;;  %12153 = vmatpush3.bf16.msra.mxu1 %v12150_v2  ;;  %v10185_v2 = vld [vmem:[%s14378_s4 + $0x1] sm:$0x1] }
0x220d   :  { %12155 = vmatprep.subr.bf16.mxu1 %v12154_v56 }
0x220f   :  { %12187 = vmatpush3.bf16.msra.mxu0 %v12186_v31 }
0x2210   :  { %12188 = vmatprep.subr.bf16.mxu0 %v12704_v0  ;;  %12157 = vmatpush3.bf16.msra.mxu1 %v12154_v56 }
0x2211   :  { %12159 = vmatprep.subr.bf16.mxu1 %v12158_v62 }
0x2212   :  { %11424 = vmatmul.mubr.msk.f32.vlgmr.msra.gmra.mrb[52].mxu0 %vm68_vm1, %v13557_v48 }
0x2213   :  { %12190 = vmatpush3.bf16.msra.mxu0 %v12189_v49  ;;  %11434 = vmatprep.mubr.msk.f32.mxu0 %vm12705_vm0, %v12706_v1  ;;  %v5030_v49 = vld [vmem:[%s14378_s4] sm:$0x1] }
0x2214   :  { %12191 = vmatprep.subr.bf16.mxu0 %v12704_v0  ;;  %12161 = vmatpush3.bf16.msra.mxu1 %v12158_v62 }
0x2215   :  { %12163 = vmatprep.subr.bf16.mxu1 %v12162_v8 }
0x2217   :  { %12193 = vmatpush3.bf16.msra.mxu0 %v12192_v55  ;;  %v10165_v55 = vld [vmem:[%s14385_s11] ss:$0 sm:$0xff] }
0x2218   :  { %12165 = vmatpush3.bf16.msra.mxu1 %v12162_v8  ;;  %12195 = vmatprep.subr.bf16.mxu0 %v12194_v15 }
0x2219   :  { %12167 = vmatprep.subr.bf16.mxu1 %v12166_v5 }
0x221a   :  { %11435 = vmatmul.mubr.msk.f32.vlgmr.msra.gmra.mrb[54].mxu0 %vm68_vm1, %v13557_v48 }
0x221b   :  { %12197 = vmatpush3.bf16.msra.mxu0 %v12194_v15 }
0x221c   :  { %12169 = vmatpush3.bf16.msra.mxu1 %v12166_v5  ;;  %12199 = vmatprep.subr.bf16.mxu0 %v12198_v23 }
0x221d   :  { %12171 = vmatprep.subr.bf16.mxu1 %v12170_v9 }
0x221f   :  { %12201 = vmatpush3.bf16.msra.mxu0 %v12198_v23 }
0x2220   :  { %12173 = vmatpush3.bf16.msra.mxu1 %v12170_v9  ;;  %12203 = vmatprep.subr.bf16.mxu0 %v13639_v28 }
0x2221   :  { %12175 = vmatprep.subr.bf16.mxu1 %v12174_v17 }
0x2224   :  { %12177 = vmatpush3.bf16.msra.mxu1 %v12174_v17  ;;  %v5304_v17 = vld [vmem:[%s14380_s6 + $0x10] sm:$0xff] }
0x2225   :  { %12179 = vmatprep.subr.bf16.mxu1 %v12178_v25 }
0x2228   :  { %12181 = vmatpush3.bf16.msra.mxu1 %v12178_v25  ;;  %v12206_v25 = vpack.c.bf16 %v5305_v18, %v5304_v17  ;;  %v10216_v18 = vld [vmem:[%s14380_s6 + $0xa8] sm:$0xff] }
0x2229   :  { %12211 = vmatprep.subr.bf16.mxu1 %v13648_v33 }
0x228b   :  { %v5196_v34 = vpop.xlane.xlu1 %5195 }
0x228c   :  { %v5193_v35 = vpop.xlane.xlu0 %5192  ;;  %v5198_v36 = vmul.f32 0.03125, %v5196_v34 }
0x228d   :  { %v5197_v39 = vmul.f32 0.03125, %v5193_v35 }
0x228e   :  { %v5200_v41 = vadd.f32 1e-05, %v5198_v36 }
0x228f   :  { %v5199_v42 = vadd.f32 1e-05, %v5197_v39 }
0x2290   :  { %12565 = vrsqrt.f32 %v5200_v41 }
0x2291   :  { %12567 = vrsqrt.f32 %v5199_v42 }
0x229a   :  { %v12566_v52 = vpop.eup %12565 }
0x229b   :  { %v12568_v53 = vpop.eup %12567  ;;  %v5204_v63 = vmul.f32 %v12566_v52, %v13509_v19 }
0x229c   :  { %v5203_v4 = vmul.f32 %v12568_v53, %v13514_v22  ;;  %v10193_v22 = vld [vmem:[%s14380_s6 + $0x90] sm:$0xff] }
0x229d   :  { %v12214_v26 = vpack.c.bf16 %v10194_v20, %v10193_v22  ;;  %v10217_v20 = vld [vmem:[%s14380_s6 + $0xb0] sm:$0xff] }
0x22dd   :  { %v11368_v43 = vpop.f32.mrb[46].mxu1  ;;  %v11379_v14 = vpop.f32.mrb[50].mxu0 }
0x22de   :  { %v4899_v45 = vadd.f32 %v11379_v14, %v10173_v40  ;;  %v4805_v30 = vpop.f32.mrb[47].mxu1  ;;  %v4893_v44 = vpop.f32.mrb[51].mxu0  ;;  %v4811_v7 = vadd.f32 %v11368_v43, %v10165_v55 }
0x22df   :  { %v4894_v31 = vadd.f32 %v10173_v40, %v4893_v44  ;;  %v4806_v11 = vadd.f32 %v10165_v55, %v4805_v30  ;;  %v10209_v40 = vld [vmem:[%s14380_s6 + $0x20] sm:$0xff]  ;;  %v10211_v44 = vld [vmem:[%s14380_s6 + $0x30] sm:$0xff] }
0x22e0   :  { %v4905_v46 = vmul.f32 0.70710677, %v4899_v45  ;;  %v4903_v61 = vmul.f32 0.5, %v4899_v45 }
0x22e1   :  { %v4904_v47 = vmul.f32 0.70710677, %v4894_v31  ;;  %v4902_v8 = vmul.f32 0.5, %v4894_v31  ;;  %v10212_v31 = vld [vmem:[%s14380_s6 + $0x38] sm:$0xff] }
0x22e2   :  { %12569 = verf.f32 %v4905_v46  ;;  %v12240_v46 = vpack.c.bf16 %v10212_v31, %v10211_v44 }
0x22e3   :  { %12571 = verf.f32 %v4904_v47 }
0x22e5   :  { %v5100_v50 = vpop.f32.mrb[52].mxu0 }
0x22e6   :  { %v11425_v51 = vpop.f32.mrb[53].mxu0  ;;  %v5101_v3 = vadd.f32 %v5100_v50, %v5030_v49 }
0x22e8   :  { %v5208_v56 = vrot.slane %v5101_v3, %v12882_v59 }
0x22ea   :  { %v5209_v15 = vmul.f32 %v5208_v56, %v5203_v4  ;;  %v5210_v16 = vmul.f32 %v5208_v56, %v5204_v63  ;;  %v10204_v4 = vld [vmem:[%s14379_s5 + $0x28] sm:$0xff] }
0x22ec   :  { %v12570_v54 = vpop.eup %12569 }
0x22ed   :  { %v12572_v60 = vpop.eup %12571  ;;  %v4909_v62 = vadd.f32 1.0, %v12570_v54  ;;  %v5175_v10 = vpop.f32.mrb[54].mxu0 }
0x22ee   :  { %v4908_v12 = vadd.f32 1.0, %v12572_v60  ;;  %v5176_v5 = vadd.f32 %v10185_v2, %v5175_v10  ;;  %v11436_v6 = vpop.f32.mrb[55].mxu0 }
0x22ef   :  { %v4911_v9 = vmul.f32 %v4909_v62, %v4903_v61 }
0x22f0   :  { %v4910_v13 = vmul.f32 %v4908_v12, %v4902_v8  ;;  %v5214_v58 = vrot.slane %v5176_v5, %v12882_v59  ;;  %v10203_v12 = vld [vmem:[%s14379_s5 + $0x20] sm:$0xff] }
0x22f1   :  { %v4913_v19 = vmul.f32 %v4911_v9, %v4811_v7  ;;  %v12228_v5 = vpack.c.bf16 %v10204_v4, %v10203_v12  ;;  %v5650_v4 = vld [vmem:[%s14382_s8] sm:$0xff] }
0x22f2   :  { %v13679_v23 = vadd.f32 %v5214_v58, %v5209_v15  ;;  %v13681_v24 = vadd.f32 %v5214_v58, %v5210_v16  ;;  %v4912_v57 = vmul.f32 %v4910_v13, %v4806_v11  ;;  %v10205_v11 = vld [vmem:[%s14379_s5 + $0x30] sm:$0xff]  ;;  %v10206_v13 = vld [vmem:[%s14379_s5 + $0x38] sm:$0xff] }
0x22f3   :  { %v12232_v17 = vpack.c.bf16 %v10206_v13, %v10205_v11  ;;  %v10240_v13 = vld [vmem:[%s14380_s6 + $0x50] sm:$0xff] }
0x22f4   :  { %11445 = vmatprep.mubr.msk.f32.mxu0 %vm68_vm1, %v13679_v23  ;;  %11412 = vmatprep.mubr.f32.mxu1 %v4912_v57  ;;  %v10218_v57 = vld [vmem:[%s14380_s6 + $0xb8] sm:$0xff] }
0x22f5   :  { %11446 = vmatmul.mubr.msk.f32.vlgmr.msra.gmra.mrb[56].mxu0 %vm68_vm1, %v13681_v24  ;;  %11413 = vmatmul.mubr.f32.vlgmr.msra.gmra.mrb[48].mxu1 %v4913_v19  ;;  %v10215_v19 = vld [vmem:[%s14380_s6 + $0xa0] sm:$0xff] }
0x22f6   :  { %12205 = vmatpush3.bf16.msra.mxu0 %v13639_v28  ;;  %11456 = vmatprep.mubr.msk.f32.mxu0 %vm68_vm1, %v13679_v23  ;;  %v12244_v22 = vpack.c.bf16 %v10216_v18, %v10215_v19 }
0x22f7   :  { %12213 = vmatpush3.bf16.msra.mxu1 %v13648_v33  ;;  %11467 = vmatprep.mubr.msk.f32.mxu1 %vm68_vm1, %v13679_v23 }
0x22f8   :  { %12207 = vmatprep.subr.bf16.mxu0 %v12206_v25  ;;  %12215 = vmatprep.subr.bf16.mxu1 %v12214_v26 }
0x22fa   :  { %12209 = vmatpush3.bf16.msra.mxu0 %v12206_v25  ;;  %v12248_v25 = vpack.c.bf16 %v10218_v57, %v10217_v20 }
0x22fb   :  { %12217 = vmatpush3.bf16.msra.mxu1 %v12214_v26 }
0x22fd   :  { %11457 = vmatmul.mubr.msk.f32.vlgmr.msra.gmra.mrb[58].mxu0 %vm68_vm1, %v13681_v24 }
0x22fe   :  { %11468 = vmatmul.mubr.msk.f32.vlgmr.msra.gmra.mrb[50].mxu1 %vm68_vm1, %v13681_v24 }
0x23c8   :  { %v11447_v27 = vpop.f32.mrb[56].mxu0  ;;  %v11414_v28 = vpop.f32.mrb[48].mxu1 }
0x23c9   :  { %v5006_v32 = vadd.f32 %v11414_v28, %v13461_v37  ;;  %v5293_v33 = vpop.f32.mrb[57].mxu0  ;;  %v4996_v34 = vpop.f32.mrb[49].mxu1  ;;  %v10210_v37 = vld [vmem:[%s14380_s6 + $0x28] sm:$0xff] }
0x23ca   :  { %v5005_v35 = vadd.f32 %v4996_v34, %v13464_v38  ;;  %11474 = vmatprep.mubr.msk.f32.mxu0 %vm502_vm2, %v5293_v33  ;;  %v12236_v45 = vpack.c.bf16 %v10210_v37, %v10209_v40 }
0x23cb   :  { %v5016_v36 = vadd.f32 %v10177_v29, %v5006_v32 }
0x23cc   :  { %v5015_v39 = vadd.f32 %v10177_v29, %v5005_v35 }
0x23cd   :  { %5018 = vst.msk [vmem:[#allocation5 + $0x8] sm:$0xff] %vm68_vm1, %v5016_v36 }
0x23ce   :  { %5017 = vst.msk [vmem:[#allocation5] sm:$0xff] %vm68_vm1, %v5015_v39 }
0x23d0   :  { %v11458_v41 = vpop.f32.mrb[58].mxu0 }
0x23d1   :  { %v5372_v42 = vpop.f32.mrb[59].mxu0  ;;  %v11469_v43 = vpop.f32.mrb[50].mxu1 }
0x23d2   :  { %v12218_v38 = vpack.c.bf16 %v11458_v41, %v5372_v42  ;;  %v5451_v14 = vpop.f32.mrb[51].mxu1 }
0x23d3   :  { %v12224_v30 = vpack.c.bf16 %v11469_v43, %v5451_v14 }
0x23d4   :  { %12220 = vmatprep.subr.msk.bf16.mxu0 %vm12916_vm3, %v12218_v38 }
0x23d5   :  { %12223 = vmatpush3.bf16.xpose.msk.msra.mxu0 %vm12916_vm3, %v12218_v38  ;;  %12225 = vmatprep.subr.bf16.mxu1 %v12224_v30 }
0x23d6   :  { %12227 = vmatpush3.bf16.msra.mxu1 %v12224_v30  ;;  %12237 = vmatprep.subr.bf16.mxu0 %v12236_v45 }
0x23d7   :  { %12229 = vmatprep.subr.bf16.mxu1 %v12228_v5 }
0x23dc   :  { %11475 = vmatmul.mubr.msk.f32.vlgmr.msra.gmra.mrb[60].mxu0 %vm502_vm2, %v11447_v27 }
0x23dd   :  { %12239 = vmatpush3.bf16.msra.mxu0 %v12236_v45  ;;  %11503 = vmatprep.mubr.msk.f32.mxu0 %vm68_vm1, %v13679_v23 }
0x23de   :  { %12241 = vmatprep.subr.bf16.mxu0 %v12240_v46 }
0x23e1   :  { %12243 = vmatpush3.bf16.msra.mxu0 %v12240_v46  ;;  %v10232_v46 = vld [vmem:[%s14379_s5 + $0x40] sm:$0xff] }
0x23e4   :  { %11504 = vmatmul.mubr.msk.f32.vlgmr.msra.gmra.mrb[62].mxu0 %vm68_vm1, %v13681_v24 }
0x24af   :  { %v11476_v47 = vpop.f32.mrb[60].mxu0 }
0x24b0   :  { %v5538_v49 = vpop.f32.mrb[61].mxu0  ;;  %v5550_v50 = vsel %vm590_vm4, %v11476_v47, -inf }
0x24b1   :  { %5551 = vmax.xlane.f32.xlu1 %v5550_v50  ;;  %v5547_v51 = vsel %vm590_vm4, %v5538_v49, -inf  ;;  %v10227_v50 = vld [vmem:[%s14382_s8 + $0x8] sm:$0xff] }
0x24b2   :  { %5548 = vmax.xlane.f32.xlu0 %v5547_v51 }
0x24b7   :  { %v11505_v3 = vpop.f32.mrb[62].mxu0 }
0x24b8   :  { %v5800_v52 = vpop.f32.mrb[63].mxu0 }
0x24b9   :  { %v12252_v53 = vpack.c.bf16 %v11505_v3, %v5800_v52 }
0x24bb   :  { %12254 = vmatprep.subr.msk.bf16.mxu0 %vm12916_vm3, %v12252_v53 }
0x24bc   :  { %12257 = vmatpush3.bf16.xpose.msk.msra.mxu0 %vm12916_vm3, %v12252_v53  ;;  %v10234_v53 = vld [vmem:[%s14379_s5 + $0x50] sm:$0xff] }
0x24bd   :  { %11531 = vmatprep.subr.mxu0 %v10227_v50 }
0x253e   :  { %v5552_v2 = vpop.xlane.xlu1 %5551 }
0x253f   :  { %v5554_v54 = vsub.f32 %v11476_v47, %v5552_v2  ;;  %v5549_v55 = vpop.xlane.xlu0 %5548  ;;  %v10233_v47 = vld [vmem:[%s14379_s5 + $0x48] sm:$0xff]  ;;  %v10235_v2 = vld [vmem:[%s14379_s5 + $0x58] sm:$0xff] }
0x2540   :  { %v5553_v56 = vsub.f32 %v5538_v49, %v5549_v55  ;;  %v12262_v49 = vpack.c.bf16 %v10233_v47, %v10232_v46  ;;  %v10261_v46 = vld [vmem:[%s14379_s5 + $0x70] sm:$0xff]  ;;  %v10262_v47 = vld [vmem:[%s14379_s5 + $0x78] sm:$0xff] }
0x2541   :  { %v5557_v60 = vmul.f32 1.442695, %v5554_v54 }
0x2542   :  { %v5555_v61 = vmul.f32 1.442695, %v5553_v56 }
0x2543   :  { %12573 = vpow2.f32 %v5557_v60  ;;  %v12266_v60 = vpack.c.bf16 %v10235_v2, %v10234_v53  ;;  %v10272_v53 = vld [vmem:[%s14380_s6 + $0xe8] sm:$0xff] }
0x2544   :  { %12575 = vpow2.f32 %v5555_v61  ;;  %v10244_v61 = vld [vmem:[%s14380_s6 + $0xc0] sm:$0xff] }
0x254d   :  { %v12574_v62 = vpop.eup %12573 }
0x254e   :  { %v12576_v63 = vpop.eup %12575  ;;  %v5562_v10 = vsel %vm590_vm4, %v12574_v62, 0.0 }
0x254f   :  { %5563 = vadd.xlane.f32.xlu1 %v5562_v10  ;;  %v5559_v8 = vsel %vm590_vm4, %v12576_v63, 0.0  ;;  %v10246_v10 = vld [vmem:[%s14380_s6 + $0xd0] sm:$0xff] }
0x2550   :  { %5560 = vadd.xlane.f32.xlu0 %v5559_v8  ;;  %v10247_v8 = vld [vmem:[%s14380_s6 + $0xd8] sm:$0xff] }
0x2551   :  { %v12282_v12 = vpack.c.bf16 %v10247_v8, %v10246_v10  ;;  %v10268_v10 = vld [vmem:[%s14380_s6 + $0x78] sm:$0xff] }
0x25dc   :  { %v5564_v6 = vpop.xlane.xlu1 %5563 }
0x25dd   :  { %12577 = vrcp.f32 %v5564_v6  ;;  %v5561_v7 = vpop.xlane.xlu0 %5560  ;;  %v10239_v6 = vld [vmem:[%s14380_s6 + $0x48] sm:$0xff] }
0x25de   :  { %12579 = vrcp.f32 %v5561_v7 }
0x25e7   :  { %v12578_v9 = vpop.eup %12577 }
0x25e8   :  { %v12580_v15 = vpop.eup %12579  ;;  %v5568_v58 = vmul.f32 %v12578_v9, %v12574_v62  ;;  %v10245_v62 = vld [vmem:[%s14380_s6 + $0xc8] sm:$0xff] }
0x25e9   :  { %v5567_v16 = vmul.f32 %v12580_v15, %v12576_v63  ;;  %v12278_v63 = vpack.c.bf16 %v10245_v62, %v10244_v61  ;;  %v10241_v15 = vld [vmem:[%s14380_s6 + $0x58] sm:$0xff]  ;;  %v10266_v61 = vld [vmem:[%s14380_s6 + $0x68] sm:$0xff] }
0x25eb   :  { %11481 = vmatprep.mubr.msk.f32.mxu1 %vm590_vm4, %v5567_v16 }
0x25ec   :  { %11482 = vmatmul.mubr.msk.f32.vlgmr.msra.gmra.mrb[52].mxu1 %vm590_vm4, %v5568_v58 }
0x25ed   :  { %12231 = vmatpush3.bf16.msra.mxu1 %v12228_v5  ;;  %11492 = vmatprep.mubr.msk.f32.mxu1 %vm68_vm1, %v13679_v23  ;;  %v10238_v5 = vld [vmem:[%s14380_s6 + $0x40] sm:$0xff] }
0x25ee   :  { %12233 = vmatprep.subr.bf16.mxu1 %v12232_v17  ;;  %v12270_v11 = vpack.c.bf16 %v10239_v6, %v10238_v5 }
0x25f1   :  { %12235 = vmatpush3.bf16.msra.mxu1 %v12232_v17  ;;  %v12274_v17 = vpack.c.bf16 %v10241_v15, %v10240_v13 }
0x25f2   :  { %12245 = vmatprep.subr.bf16.mxu1 %v12244_v22 }
0x25f4   :  { %11493 = vmatmul.mubr.msk.f32.vlgmr.msra.gmra.mrb[54].mxu1 %vm68_vm1, %v13681_v24 }
0x25f5   :  { %12247 = vmatpush3.bf16.msra.mxu1 %v12244_v22  ;;  %11514 = vmatprep.mubr.msk.f32.mxu1 %vm68_vm1, %v13679_v23 }
0x25f6   :  { %12249 = vmatprep.subr.bf16.mxu1 %v12248_v25 }
0x25f9   :  { %12251 = vmatpush3.bf16.msra.mxu1 %v12248_v25 }
0x25fc   :  { %11515 = vmatmul.mubr.msk.f32.vlgmr.msra.gmra.mrb[56].mxu1 %vm68_vm1, %v13681_v24 }
0x26bf   :  { %v13768_v26 = vpop.f32.mrb[52].mxu1 }
0x26c0   :  { %v13770_v27 = vpop.f32.mrb[53].mxu1 }
0x26c7   :  { %v11494_v28 = vpop.f32.mrb[54].mxu1 }
0x26c8   :  { %v5721_v29 = vpop.f32.mrb[55].mxu1 }
0x26c9   :  { %11521 = vmatprep.mubr.msk.f32.mxu0 %vm502_vm2, %v5721_v29 }
0x26ca   :  { %11522 = vmatmul.mubr.msk.f32.vlgmr.msra.gmra.mrb[64].mxu0 %vm502_vm2, %v11494_v28 }
0x26cb   :  { %11532 = vmatpush3.msra.mxu0 %v10227_v50 }
0x26cc   :  { %11536 = vmatprep.subr.mxu0 %v5650_v4 }
0x26cf   :  { %v11516_v32 = vpop.f32.mrb[56].mxu1 }
0x26d0   :  { %v5879_v33 = vpop.f32.mrb[57].mxu1 }
0x26d1   :  { %v12258_v34 = vpack.c.bf16 %v11516_v32, %v5879_v33 }
0x26d3   :  { %12259 = vmatprep.subr.bf16.mxu1 %v12258_v34 }
0x26d4   :  { %12261 = vmatpush3.bf16.msra.mxu1 %v12258_v34 }
0x26d5   :  { %12263 = vmatprep.subr.bf16.mxu1 %v12262_v49 }
0x279d   :  { %v11523_v35 = vpop.f32.mrb[64].mxu0 }
0x279e   :  { %v5966_v36 = vpop.f32.mrb[65].mxu0  ;;  %v5978_v39 = vsel %vm590_vm4, %v11523_v35, -inf }
0x279f   :  { %5979 = vmax.xlane.f32.xlu1 %v5978_v39  ;;  %v5975_v40 = vsel %vm590_vm4, %v5966_v36, -inf }
0x27a0   :  { %5976 = vmax.xlane.f32.xlu0 %v5975_v40 }
0x282c   :  { %v5980_v37 = vpop.xlane.xlu1 %5979 }
0x282d   :  { %v5982_v41 = vsub.f32 %v11523_v35, %v5980_v37  ;;  %v5977_v42 = vpop.xlane.xlu0 %5976 }
0x282e   :  { %v5981_v43 = vsub.f32 %v5966_v36, %v5977_v42 }
0x282f   :  { %v5985_v38 = vmul.f32 1.442695, %v5982_v41 }
0x2830   :  { %v5983_v14 = vmul.f32 1.442695, %v5981_v43  ;;  %v10259_v43 = vld [vmem:[%s14379_s5 + $0x60] sm:$0xff] }
0x2831   :  { %12581 = vpow2.f32 %v5985_v38  ;;  %v10260_v38 = vld [vmem:[%s14379_s5 + $0x68] sm:$0xff] }
0x2832   :  { %12583 = vpow2.f32 %v5983_v14  ;;  %v12296_v14 = vpack.c.bf16 %v10260_v38, %v10259_v43  ;;  %v10293_v43 = vld [vmem:[%s14377_s3 + $0x60] sm:$0xff] }
0x283b   :  { %v12582_v45 = vpop.eup %12581 }
0x283c   :  { %v12584_v30 = vpop.eup %12583  ;;  %v5990_v44 = vsel %vm590_vm4, %v12582_v45, 0.0 }
0x283d   :  { %5991 = vadd.xlane.f32.xlu1 %v5990_v44  ;;  %v5987_v31 = vsel %vm590_vm4, %v12584_v30, 0.0 }
0x283e   :  { %5988 = vadd.xlane.f32.xlu0 %v5987_v31 }
0x28ca   :  { %v5992_v51 = vpop.xlane.xlu1 %5991 }
0x28cb   :  { %12585 = vrcp.f32 %v5992_v51  ;;  %v5989_v3 = vpop.xlane.xlu0 %5988 }
0x28cc   :  { %12587 = vrcp.f32 %v5989_v3  ;;  %v12300_v3 = vpack.c.bf16 %v10262_v47, %v10261_v46  ;;  %v10296_v46 = vld [vmem:[%s14377_s3 + $0x78] sm:$0xff] }
0x28d5   :  { %v12586_v52 = vpop.eup %12585 }
0x28d6   :  { %v12588_v54 = vpop.eup %12587  ;;  %v5996_v56 = vmul.f32 %v12586_v52, %v12582_v45  ;;  %v10256_v45 = vld [vmem:[%s14382_s8 + $0x10] sm:$0xff]  ;;  %v10271_v52 = vld [vmem:[%s14380_s6 + $0xe0] sm:$0xff] }
0x28d7   :  { %v5995_v55 = vmul.f32 %v12588_v54, %v12584_v30  ;;  %v12312_v2 = vpack.c.bf16 %v10272_v53, %v10271_v52  ;;  %v10273_v54 = vld [vmem:[%s14380_s6 + $0xf0] sm:$0xff] }
0x28d9   :  { %11528 = vmatprep.mubr.msk.f32.mxu1 %vm590_vm4, %v5995_v55  ;;  %v10274_v55 = vld [vmem:[%s14380_s6 + $0xf8] sm:$0xff] }
0x28da   :  { %11529 = vmatmul.mubr.msk.f32.vlgmr.msra.gmra.mrb[58].mxu1 %vm590_vm4, %v5996_v56  ;;  %v12316_v56 = vpack.c.bf16 %v10274_v55, %v10273_v54  ;;  %v12651_v55 = vld [vmem:[#allocation2 + $0x10] sm:$0xff] }
0x28db   :  { %12265 = vmatpush3.bf16.msra.mxu1 %v12262_v49  ;;  %11549 = vmatprep.mubr.msk.f32.mxu1 %vm68_vm1, %v13679_v23 }
0x28dc   :  { %12267 = vmatprep.subr.bf16.mxu1 %v12266_v60 }
0x28df   :  { %12269 = vmatpush3.bf16.msra.mxu1 %v12266_v60  ;;  %v10265_v60 = vld [vmem:[%s14380_s6 + $0x60] sm:$0xff] }
0x28e0   :  { %12279 = vmatprep.subr.bf16.mxu1 %v12278_v63  ;;  %v12304_v62 = vpack.c.bf16 %v10266_v61, %v10265_v60 }
0x28e2   :  { %11550 = vmatmul.mubr.msk.f32.vlgmr.msra.gmra.mrb[60].mxu1 %vm68_vm1, %v13681_v24 }
0x28e3   :  { %12281 = vmatpush3.bf16.msra.mxu1 %v12278_v63  ;;  %11571 = vmatprep.mubr.msk.f32.mxu1 %vm68_vm1, %v13679_v23  ;;  %v10267_v63 = vld [vmem:[%s14380_s6 + $0x70] sm:$0xff] }
0x28e4   :  { %12283 = vmatprep.subr.bf16.mxu1 %v12282_v12 }
0x28e7   :  { %12285 = vmatpush3.bf16.msra.mxu1 %v12282_v12 }
0x28ea   :  { %11572 = vmatmul.mubr.msk.f32.vlgmr.msra.gmra.mrb[62].mxu1 %vm68_vm1, %v13681_v24 }
0x29ad   :  { %v11530_v7 = vpop.f32.mrb[58].mxu1 }
0x29ae   :  { %v6069_v9 = vpop.f32.mrb[59].mxu1 }
0x29af   :  { %11533 = vmatprep.mubr.msk.f32.mxu0 %vm502_vm2, %v6069_v9 }
0x29b0   :  { %11534 = vmatmul.mubr.msk.f32.vlgmr.msra.gmra.mrb[66].mxu0 %vm502_vm2, %v11530_v7 }
0x29b1   :  { %11537 = vmatpush3.msra.mxu0 %v5650_v4  ;;  %11538 = vmatprep.mubr.msk.f32.mxu0 %vm502_vm2, %v13770_v27  ;;  %v12308_v4 = vpack.c.bf16 %v10268_v10, %v10267_v63 }
0x29b2   :  { %12271 = vmatprep.subr.bf16.mxu0 %v12270_v11 }
0x29b5   :  { %v11551_v16 = vpop.f32.mrb[60].mxu1 }
0x29b6   :  { %v6311_v58 = vpop.f32.mrb[61].mxu1 }
0x29b8   :  { %11539 = vmatmul.mubr.msk.f32.vlgmr.msra.gmra.mrb[66].mxu0 %vm502_vm2, %v13768_v26 }
0x29b9   :  { %12273 = vmatpush3.bf16.msra.mxu0 %v12270_v11  ;;  %11560 = vmatprep.mubr.msk.f32.mxu0 %vm68_vm1, %v13679_v23 }
0x29ba   :  { %12275 = vmatprep.subr.bf16.mxu0 %v12274_v17 }
0x29bd   :  { %12277 = vmatpush3.bf16.msra.mxu0 %v12274_v17  ;;  %v11573_v19 = vpop.f32.mrb[62].mxu1 }
0x29be   :  { %v6469_v18 = vpop.f32.mrb[63].mxu1 }
0x29bf   :  { %v12292_v22 = vpack.c.bf16 %v11573_v19, %v6469_v18 }
0x29c0   :  { %11561 = vmatmul.mubr.msk.f32.vlgmr.msra.gmra.mrb[68].mxu0 %vm68_vm1, %v13681_v24 }
0x29c1   :  { %11578 = vmatprep.mubr.msk.f32.mxu0 %vm502_vm2, %v6311_v58  ;;  %12293 = vmatprep.subr.bf16.mxu1 %v12292_v22 }
0x29c2   :  { %12295 = vmatpush3.bf16.msra.mxu1 %v12292_v22 }
0x29c3   :  { %12297 = vmatprep.subr.bf16.mxu1 %v12296_v14 }
0x2a93   :  { %v11562_v20 = vpop.f32.mrb[68].mxu0 }
0x2a94   :  { %v6390_v57 = vpop.f32.mrb[69].mxu0 }
0x2a95   :  { %v12286_v25 = vpack.c.bf16 %v11562_v20, %v6390_v57 }
0x2a97   :  { %12288 = vmatprep.subr.msk.bf16.mxu0 %vm12916_vm3, %v12286_v25 }
0x2a98   :  { %12291 = vmatpush3.bf16.xpose.msk.msra.mxu0 %vm12916_vm3, %v12286_v25 }
0x2a99   :  { %11588 = vmatprep.subr.mxu0 %v10256_v45 }
0x2a9f   :  { %11579 = vmatmul.mubr.msk.f32.vlgmr.msra.gmra.mrb[70].mxu0 %vm502_vm2, %v11551_v16 }
0x2aa0   :  { %11589 = vmatpush3.msra.mxu0 %v10256_v45  ;;  %v10289_v45 = vld [vmem:[%s14377_s3 + $0x50] sm:$0xff] }
0x2aa1   :  { %12305 = vmatprep.subr.bf16.mxu0 %v12304_v62 }
0x2b72   :  { %v11580_v26 = vpop.f32.mrb[70].mxu0 }
0x2b73   :  { %v6556_v27 = vpop.f32.mrb[71].mxu0  ;;  %v6568_v28 = vsel %vm590_vm4, %v11580_v26, -inf }
0x2b74   :  { %6569 = vmax.xlane.f32.xlu1 %v6568_v28  ;;  %v6565_v29 = vsel %vm590_vm4, %v6556_v27, -inf }
0x2b75   :  { %6566 = vmax.xlane.f32.xlu0 %v6565_v29  ;;  %v10283_v29 = vld [vmem:[%s14382_s8 + $0x18] sm:$0xff] }
0x2c01   :  { %v6570_v32 = vpop.xlane.xlu1 %6569 }
0x2c02   :  { %v6572_v33 = vsub.f32 %v11580_v26, %v6570_v32  ;;  %v6567_v34 = vpop.xlane.xlu0 %6566 }
0x2c03   :  { %v6571_v35 = vsub.f32 %v6556_v27, %v6567_v34 }
0x2c04   :  { %v6575_v36 = vmul.f32 1.442695, %v6572_v33 }
0x2c05   :  { %v6573_v39 = vmul.f32 1.442695, %v6571_v35 }
0x2c06   :  { %12589 = vpow2.f32 %v6575_v36 }
0x2c07   :  { %12591 = vpow2.f32 %v6573_v39 }
0x2c10   :  { %v12590_v40 = vpop.eup %12589 }
0x2c11   :  { %v12592_v37 = vpop.eup %12591  ;;  %v6580_v41 = vsel %vm590_vm4, %v12590_v40, 0.0 }
0x2c12   :  { %6581 = vadd.xlane.f32.xlu1 %v6580_v41  ;;  %v6577_v42 = vsel %vm590_vm4, %v12592_v37, 0.0  ;;  %v10287_v41 = vld [vmem:[%s14377_s3 + $0x40] sm:$0xff] }
0x2c13   :  { %6578 = vadd.xlane.f32.xlu0 %v6577_v42  ;;  %v10288_v42 = vld [vmem:[%s14377_s3 + $0x48] sm:$0xff] }
0x2c14   :  { %v12331_v38 = vpack.c.bf16 %v10288_v42, %v10287_v41 }
0x2c9f   :  { %v6582_v30 = vpop.xlane.xlu1 %6581 }
0x2ca0   :  { %12593 = vrcp.f32 %v6582_v30  ;;  %v6579_v44 = vpop.xlane.xlu0 %6578  ;;  %v10290_v30 = vld [vmem:[%s14377_s3 + $0x58] sm:$0xff] }
0x2ca1   :  { %12595 = vrcp.f32 %v6579_v44  ;;  %v12334_v47 = vpack.c.bf16 %v10290_v30, %v10289_v45 }
0x2caa   :  { %v12594_v31 = vpop.eup %12593 }
0x2cab   :  { %v12596_v49 = vpop.eup %12595  ;;  %v6586_v51 = vmul.f32 %v12594_v31, %v12590_v40  ;;  %v10295_v31 = vld [vmem:[%s14377_s3 + $0x70] sm:$0xff] }
0x2cac   :  { %v6585_v50 = vmul.f32 %v12596_v49, %v12592_v37  ;;  %v12340_v49 = vpack.c.bf16 %v10296_v46, %v10295_v31  ;;  %v10315_v31 = vld [vmem:[%s14379_s5 + $0xa0] sm:$0xff]  ;;  %v10316_v46 = vld [vmem:[%s14379_s5 + $0xa8] sm:$0xff] }
0x2cae   :  { %11585 = vmatprep.mubr.msk.f32.mxu1 %vm590_vm4, %v6585_v50  ;;  %v10286_v50 = vld [vmem:[%s14383_s9] ss:$0 sm:$0xff] }
0x2caf   :  { %11586 = vmatmul.mubr.msk.f32.vlgmr.msra.gmra.mrb[64].mxu1 %vm590_vm4, %v6586_v51 }
0x2cb0   :  { %12299 = vmatpush3.bf16.msra.mxu1 %v12296_v14  ;;  %11601 = vmatprep.mubr.msk.f32.mxu1 %vm68_vm1, %v13679_v23  ;;  %v10294_v14 = vld [vmem:[%s14377_s3 + $0x68] sm:$0xff] }
0x2cb1   :  { %12301 = vmatprep.subr.bf16.mxu1 %v12300_v3  ;;  %v12337_v44 = vpack.c.bf16 %v10294_v14, %v10293_v43 }
0x2cb4   :  { %12303 = vmatpush3.bf16.msra.mxu1 %v12300_v3 }
0x2cb5   :  { %12313 = vmatprep.subr.bf16.mxu1 %v12312_v2 }
0x2cb7   :  { %11602 = vmatmul.mubr.msk.f32.vlgmr.msra.gmra.mrb[66].mxu1 %vm68_vm1, %v13681_v24 }
0x2cb8   :  { %12315 = vmatpush3.bf16.msra.mxu1 %v12312_v2  ;;  %11623 = vmatprep.mubr.msk.f32.mxu1 %vm68_vm1, %v13679_v23  ;;  %v12650_v2 = vld [vmem:[#allocation2 + $0x18] sm:$0xff] }
0x2cb9   :  { %12317 = vmatprep.subr.bf16.mxu1 %v12316_v56 }
0x2cbc   :  { %12319 = vmatpush3.bf16.msra.mxu1 %v12316_v56 }
0x2cbf   :  { %11624 = vmatmul.mubr.msk.f32.vlgmr.msra.gmra.mrb[68].mxu1 %vm68_vm1, %v13681_v24 }
0x2d82   :  { %v11587_v8 = vpop.f32.mrb[64].mxu1 }
0x2d83   :  { %v6659_v12 = vpop.f32.mrb[65].mxu1 }
0x2d84   :  { %11590 = vmatprep.mubr.msk.f32.mxu0 %vm502_vm2, %v6659_v12 }
0x2d85   :  { %11591 = vmatmul.mubr.msk.f32.vlgmr.msra.gmra.mrb[66].mxu0 %vm502_vm2, %v11587_v8 }
0x2d86   :  { %12307 = vmatpush3.bf16.msra.mxu0 %v12304_v62  ;;  %11612 = vmatprep.mubr.msk.f32.mxu0 %vm68_vm1, %v13679_v23 }
0x2d87   :  { %12309 = vmatprep.subr.bf16.mxu0 %v12308_v4 }
0x2d8a   :  { %v11603_v5 = vpop.f32.mrb[66].mxu1  ;;  %12311 = vmatpush3.bf16.msra.mxu0 %v12308_v4 }
0x2d8b   :  { %v6822_v6 = vpop.f32.mrb[67].mxu1 }
0x2d8d   :  { %11613 = vmatmul.mubr.msk.f32.vlgmr.msra.gmra.mrb[72].mxu0 %vm68_vm1, %v13681_v24 }
0x2d8e   :  { %11630 = vmatprep.mubr.msk.f32.mxu0 %vm502_vm2, %v6822_v6 }
0x2d92   :  { %v11625_v7 = vpop.f32.mrb[68].mxu1 }
0x2d93   :  { %v6980_v9 = vpop.f32.mrb[69].mxu1 }
0x2d94   :  { %v12326_v11 = vpack.c.bf16 %v11625_v7, %v6980_v9 }
0x2d96   :  { %12327 = vmatprep.subr.bf16.mxu1 %v12326_v11 }
0x2d97   :  { %12329 = vmatpush3.bf16.msra.mxu1 %v12326_v11 }
0x2d98   :  { %12330 = vmatprep.subr.bf16.mxu1 %v12704_v0 }
0x2e60   :  { %v11614_v13 = vpop.f32.mrb[72].mxu0 }
0x2e61   :  { %v6901_v15 = vpop.f32.mrb[73].mxu0 }
0x2e62   :  { %v12320_v16 = vpack.c.bf16 %v11614_v13, %v6901_v15  ;;  %v10299_v13 = vld [vmem:[%s14379_s5 + $0x80] sm:$0xff]  ;;  %v10300_v15 = vld [vmem:[%s14379_s5 + $0x88] sm:$0xff] }
0x2e64   :  { %12322 = vmatprep.subr.msk.bf16.mxu0 %vm12916_vm3, %v12320_v16 }
0x2e65   :  { %12325 = vmatpush3.bf16.xpose.msk.msra.mxu0 %vm12916_vm3, %v12320_v16  ;;  %v12342_v16 = vpack.c.bf16 %v10300_v15, %v10299_v13 }
0x2e66   :  { %11640 = vmatprep.subr.mxu0 %v10283_v29 }
0x2e6c   :  { %11631 = vmatmul.mubr.msk.f32.vlgmr.msra.gmra.mrb[74].mxu0 %vm502_vm2, %v11603_v5 }
0x2e6d   :  { %11641 = vmatpush3.msra.mxu0 %v10283_v29 }
0x2e6e   :  { %12336 = vmatprep.subr.bf16.mxu0 %v12704_v0 }
0x2f3f   :  { %v11632_v23 = vpop.f32.mrb[74].mxu0 }
0x2f40   :  { %v7067_v24 = vpop.f32.mrb[75].mxu0  ;;  %v7079_v58 = vsel %vm590_vm4, %v11632_v23, -inf }
0x2f41   :  { %7080 = vmax.xlane.f32.xlu1 %v7079_v58  ;;  %v7076_v17 = vsel %vm590_vm4, %v7067_v24, -inf  ;;  %v7548_v58 = vld [vmem:[%s14381_s7 + $0x8] sm:$0xff] }
0x2f42   :  { %7077 = vmax.xlane.f32.xlu0 %v7076_v17 }
0x2fce   :  { %v7081_v19 = vpop.xlane.xlu1 %7080 }
0x2fcf   :  { %v7083_v18 = vsub.f32 %v11632_v23, %v7081_v19  ;;  %v7078_v22 = vpop.xlane.xlu0 %7077 }
0x2fd0   :  { %v7082_v20 = vsub.f32 %v7067_v24, %v7078_v22  ;;  %v7547_v24 = vld [vmem:[%s14381_s7] sm:$0xff]  ;;  %v10302_v22 = vld [vmem:[%s14379_s5 + $0x98] sm:$0xff] }
0x2fd1   :  { %v7086_v57 = vmul.f32 1.442695, %v7083_v18  ;;  %v12351_v19 = vpack.c.bf16 %v7548_v58, %v7547_v24  ;;  %v10301_v18 = vld [vmem:[%s14379_s5 + $0x90] sm:$0xff] }
0x2fd2   :  { %v7084_v25 = vmul.f32 1.442695, %v7082_v20  ;;  %v12346_v20 = vpack.c.bf16 %v10302_v22, %v10301_v18 }
0x2fd3   :  { %12597 = vpow2.f32 %v7086_v57  ;;  %v13997_v57 = vld [vmem:[%s14376_s2 + $0x8] sm:$0xff] }
0x2fd4   :  { %12599 = vpow2.f32 %v7084_v25 }
0x2fdd   :  { %v12598_v21 = vpop.eup %12597 }
0x2fde   :  { %v12600_v26 = vpop.eup %12599  ;;  %v7091_v27 = vsel %vm590_vm4, %v12598_v21, 0.0 }
0x2fdf   :  { %7092 = vadd.xlane.f32.xlu1 %v7091_v27  ;;  %v7088_v28 = vsel %vm590_vm4, %v12600_v26, 0.0 }
0x2fe0   :  { %7089 = vadd.xlane.f32.xlu0 %v7088_v28 }
0x306c   :  { %v7093_v32 = vpop.xlane.xlu1 %7092 }
0x306d   :  { %12601 = vrcp.f32 %v7093_v32  ;;  %v7090_v33 = vpop.xlane.xlu0 %7089  ;;  %v10291_v32 = vld [vmem:[%s14378_s4 + $0x2] sm:$0x1] }
0x306e   :  { %12603 = vrcp.f32 %v7090_v33  ;;  %v10297_v33 = vld [vmem:[%s14378_s4 + $0x3] sm:$0x1] }
0x3077   :  { %v12602_v34 = vpop.eup %12601 }
0x3078   :  { %v12604_v35 = vpop.eup %12603  ;;  %v7097_v39 = vmul.f32 %v12602_v34, %v12598_v21 }
0x3079   :  { %v7096_v36 = vmul.f32 %v12604_v35, %v12600_v26 }
0x307b   :  { %11637 = vmatprep.mubr.msk.f32.mxu1 %vm590_vm4, %v7096_v36 }
0x307c   :  { %11638 = vmatmul.mubr.msk.f32.vlgmr.msra.gmra.mrb[70].mxu1 %vm590_vm4, %v7097_v39 }
0x307d   :  { %11653 = vmatprep.mubr.msk.f32.mxu1 %vm12705_vm0, %v12706_v1  ;;  %12332 = vmatpush3.bf16.msra.mxu1 %v12331_v38 }
0x307e   :  { %12333 = vmatprep.subr.bf16.mxu1 %v12704_v0 }
0x3081   :  { %12335 = vmatpush3.bf16.msra.mxu1 %v12334_v47  ;;  %v12356_v47 = vpack.c.bf16 %v10316_v46, %v10315_v31 }
0x3082   :  { %12343 = vmatprep.subr.bf16.mxu1 %v12342_v16 }
0x3084   :  { %11654 = vmatmul.mubr.msk.f32.vlgmr.msra.gmra.mrb[72].mxu1 %vm68_vm1, %v13557_v48 }
0x3085   :  { %12345 = vmatpush3.bf16.msra.mxu1 %v12342_v16 }
0x3086   :  { %12347 = vmatprep.subr.bf16.mxu1 %v12346_v20 }
0x3089   :  { %12349 = vmatpush3.bf16.msra.mxu1 %v12346_v20 }
0x308a   :  { %12353 = vmatprep.subr.bf16.mxu1 %v12704_v0 }
0x314f   :  { %v11639_v40 = vpop.f32.mrb[70].mxu1 }
0x3150   :  { %v7170_v37 = vpop.f32.mrb[71].mxu1 }
0x3151   :  { %11642 = vmatprep.mubr.msk.f32.mxu0 %vm502_vm2, %v7170_v37 }
0x3152   :  { %11643 = vmatmul.mubr.msk.f32.vlgmr.msra.gmra.mrb[66].mxu0 %vm502_vm2, %v11639_v40 }
0x3153   :  { %11664 = vmatprep.mubr.msk.f32.mxu0 %vm12705_vm0, %v12706_v1  ;;  %12338 = vmatpush3.bf16.msra.mxu0 %v12337_v44 }
0x3154   :  { %12339 = vmatprep.subr.bf16.mxu0 %v12704_v0 }
0x3157   :  { %12341 = vmatpush3.bf16.msra.mxu0 %v12340_v49  ;;  %v7345_v9 = vpop.f32.mrb[72].mxu1  ;;  %v10317_v49 = vld [vmem:[%s14379_s5 + $0xb0] sm:$0xff] }
0x3158   :  { %12350 = vmatprep.subr.bf16.mxu0 %v12704_v0  ;;  %v11655_v11 = vpop.f32.mrb[73].mxu1  ;;  %v7346_v34 = vadd.f32 %v10291_v32, %v7345_v9  ;;  %v10324_v32 = vld [vmem:[%s14381_s7 + $0x50] sm:$0xff] }
0x315a   :  { %11665 = vmatmul.mubr.msk.f32.vlgmr.msra.gmra.mrb[76].mxu0 %vm68_vm1, %v13557_v48  ;;  %v7453_v36 = vrot.slane %v7346_v34, %v12882_v59 }
0x315b   :  { %11682 = vmatprep.mubr.msk.f32.mxu0 %vm12705_vm0, %v12706_v1  ;;  %12352 = vmatpush3.bf16.msra.mxu0 %v12351_v19  ;;  %v10322_v19 = vld [vmem:[%s14381_s7 + $0x18] sm:$0xff] }
0x315e   :  { %11683 = vmatmul.mubr.msk.f32.vlgmr.msra.gmra.mrb[78].mxu0 %vm590_vm4, %v13997_v57 }
0x3225   :  { %v11644_v51 = vpop.f32.mrb[66].mxu0 }
0x3226   :  { %v7271_v3 = vadd.f32 %v11644_v51, %v10286_v50  ;;  %v7252_v52 = vpop.f32.mrb[67].mxu0 }
0x3227   :  { %v7270_v53 = vadd.f32 %v10286_v50, %v7252_v52  ;;  %v10318_v50 = vld [vmem:[%s14379_s5 + $0xb8] sm:$0xff] }
0x3228   :  { %v13964_v54 = vadd.f32 %v12650_v2, %v7271_v3  ;;  %v12360_v52 = vpack.c.bf16 %v10318_v50, %v10317_v49  ;;  %v10307_v2 = vld [vmem:[%s14381_s7 + $0x48] sm:$0xff] }
0x3229   :  { %v13966_v56 = vadd.f32 %v12651_v55, %v7270_v53  ;;  %v10306_v53 = vld [vmem:[%s14381_s7 + $0x40] sm:$0xff] }
0x322a   :  { %v7427_v48 = vsel %vm68_vm1, %v13964_v54, 0.0  ;;  %v12354_v55 = vpack.c.bf16 %v10307_v2, %v10306_v53  ;;  %v10332_v53 = vld [vmem:[%s14382_s8 + $0x28] sm:$0xff] }
0x322b   :  { %7428 = vadd.xlane.f32.xlu1 %v7427_v48  ;;  %v7424_v60 = vsel %vm68_vm1, %v13966_v56, 0.0 }
0x322c   :  { %7425 = vadd.xlane.f32.xlu0 %v7424_v60 }
0x322d   :  { %v7420_v23 = vpop.f32.mrb[76].mxu0 }
0x322e   :  { %v11666_v17 = vpop.f32.mrb[77].mxu0  ;;  %v7421_v35 = vadd.f32 %v10297_v33, %v7420_v23  ;;  %v10325_v33 = vld [vmem:[%s14381_s7 + $0x58] sm:$0xff] }
0x322f   :  { %v10321_v17 = vld [vmem:[%s14381_s7 + $0x10] sm:$0xff]  ;;  %v12368_v34 = vpack.c.bf16 %v10325_v33, %v10324_v32 }
0x3230   :  { %v7459_v41 = vrot.slane %v7421_v35, %v12882_v59 }
0x3231   :  { %v7618_v30 = vpop.f32.mrb[78].mxu0 }
0x3232   :  { %v11684_v44 = vpop.f32.mrb[79].mxu0  ;;  %11692 = vmatprep.subr.msk.mxu0 %vm502_vm2, %v7618_v30 }
0x3233   :  { %11693 = vmatpush3.xpose.msk.msra.mxu0 %vm502_vm2, %v7618_v30 }
0x3234   :  { %12357 = vmatprep.subr.bf16.mxu0 %v12356_v47 }
0x32b8   :  { %v7429_v61 = vpop.xlane.xlu1 %7428 }
0x32b9   :  { %v7431_v62 = vmul.f32 0.03125, %v7429_v61  ;;  %v7426_v63 = vpop.xlane.xlu0 %7425 }
0x32ba   :  { %v7430_v10 = vmul.f32 0.03125, %v7426_v63 }
0x32bb   :  { %v7433_v8 = vsub.f32 %v13964_v54, %v7431_v62 }
0x32bc   :  { %v7432_v12 = vsub.f32 %v13966_v56, %v7430_v10 }
0x32bd   :  { %v7435_v4 = vmul.f32 %v7433_v8, %v7433_v8 }
0x32be   :  { %v7434_v5 = vmul.f32 %v7432_v12, %v7432_v12 }
0x32bf   :  { %v7439_v6 = vsel %vm68_vm1, %v7435_v4, 0.0 }
0x32c0   :  { %7440 = vadd.xlane.f32.xlu1 %v7439_v6  ;;  %v7436_v7 = vsel %vm68_vm1, %v7434_v5, 0.0 }
0x32c1   :  { %7437 = vadd.xlane.f32.xlu0 %v7436_v7 }
0x334d   :  { %v7441_v25 = vpop.xlane.xlu1 %7440 }
0x334e   :  { %v7443_v21 = vmul.f32 0.03125, %v7441_v25  ;;  %v7438_v26 = vpop.xlane.xlu0 %7437  ;;  %v12365_v25 = vpack.c.bf16 %v10322_v19, %v10321_v17 }
0x334f   :  { %v7442_v27 = vmul.f32 0.03125, %v7438_v26 }
0x3350   :  { %v7445_v28 = vadd.f32 1e-05, %v7443_v21 }
0x3351   :  { %v7444_v29 = vadd.f32 1e-05, %v7442_v27 }
0x3352   :  { %12605 = vrsqrt.f32 %v7445_v28 }
0x3353   :  { %12607 = vrsqrt.f32 %v7444_v29 }
0x335c   :  { %v12606_v39 = vpop.eup %12605 }
0x335d   :  { %v12608_v40 = vpop.eup %12607  ;;  %v7449_v37 = vmul.f32 %v12606_v39, %v7433_v8 }
0x335e   :  { %v7448_v42 = vmul.f32 %v12608_v40, %v7432_v12 }
0x335f   :  { %v7455_v43 = vmul.f32 %v7453_v36, %v7449_v37 }
0x3360   :  { %v7454_v38 = vmul.f32 %v7453_v36, %v7448_v42 }
0x3361   :  { %v14010_v14 = vadd.f32 %v7459_v41, %v7455_v43 }
0x3362   :  { %v14012_v45 = vadd.f32 %v7459_v41, %v7454_v38 }
0x3364   :  { %11675 = vmatprep.mubr.msk.f32.mxu1 %vm68_vm1, %v14012_v45 }
0x3365   :  { %11676 = vmatmul.mubr.msk.f32.vlgmr.msra.gmra.mrb[74].mxu1 %vm68_vm1, %v14010_v14 }
0x3366   :  { %11689 = vmatprep.mubr.msk.f32.mxu1 %vm12705_vm0, %v12706_v1  ;;  %12355 = vmatpush3.bf16.msra.mxu1 %v12354_v55 }
0x3369   :  { %11690 = vmatmul.mubr.msk.f32.vlgmr.msra.gmra.mrb[76].mxu1 %vm590_vm4, %v13997_v57 }
0x3438   :  { %v11677_v51 = vpop.f32.mrb[74].mxu1 }
0x3439   :  { %v7538_v3 = vpop.f32.mrb[75].mxu1 }
0x343a   :  { %11694 = vmatprep.mubr.msk.f32.mxu0 %vm502_vm2, %v7538_v3  ;;  %v10338_v3 = vld [vmem:[%s14379_s5 + $0xc8] sm:$0xff] }
0x343b   :  { %11695 = vmatmul.mubr.msk.f32.vlgmr.msra.gmra.mrb[80].mxu0 %vm502_vm2, %v11677_v51  ;;  %v10337_v51 = vld [vmem:[%s14379_s5 + $0xc0] sm:$0xff] }
0x343c   :  { %12359 = vmatpush3.bf16.msra.mxu0 %v12356_v47  ;;  %11710 = vmatprep.mubr.msk.f32.mxu0 %vm68_vm1, %v14012_v45  ;;  %v7690_v16 = vpop.f32.mrb[76].mxu1 }
0x343d   :  { %12361 = vmatprep.subr.bf16.mxu0 %v12360_v52  ;;  %v11691_v23 = vpop.f32.mrb[77].mxu1  ;;  %11697 = vmatprep.subr.mxu1 %v7690_v16 }
0x343e   :  { %11698 = vmatpush3.msra.mxu1 %v7690_v16  ;;  %v10346_v23 = vld [vmem:[%s14381_s7 + $0x60] sm:$0xff] }
0x343f   :  { %12364 = vmatprep.subr.bf16.mxu1 %v12704_v0 }
0x3440   :  { %12363 = vmatpush3.bf16.msra.mxu0 %v12360_v52  ;;  %v12370_v52 = vpack.c.bf16 %v10338_v3, %v10337_v51  ;;  %v10364_v51 = vld [vmem:[%s14381_s7 + $0x38] sm:$0xff] }
0x3443   :  { %11711 = vmatmul.mubr.msk.f32.vlgmr.msra.gmra.mrb[82].mxu0 %vm68_vm1, %v14010_v14 }
0x350e   :  { %v11696_v48 = vpop.f32.mrb[80].mxu0 }
0x350f   :  { %v7769_v60 = vpop.f32.mrb[81].mxu0  ;;  %v7781_v61 = vsel %vm502_vm2, %v11696_v48, -inf }
0x3510   :  { %7782 = vmax.xlane.f32.xlu1 %v7781_v61  ;;  %v7778_v62 = vsel %vm502_vm2, %v7769_v60, -inf  ;;  %v10340_v61 = vld [vmem:[%s14379_s5 + $0xd8] sm:$0xff] }
0x3511   :  { %7779 = vmax.xlane.f32.xlu0 %v7778_v62 }
0x3516   :  { %v11712_v63 = vpop.f32.mrb[82].mxu0 }
0x3517   :  { %v7952_v10 = vpop.f32.mrb[83].mxu0 }
0x3518   :  { %11729 = vmatprep.mubr.msk.f32.mxu0 %vm502_vm2, %v7952_v10 }
0x359d   :  { %v7783_v8 = vpop.xlane.xlu1 %7782 }
0x359e   :  { %v7785_v12 = vsub.f32 %v11696_v48, %v7783_v8  ;;  %v7780_v4 = vpop.xlane.xlu0 %7779 }
0x359f   :  { %v7784_v5 = vsub.f32 %v7769_v60, %v7780_v4  ;;  %v10339_v60 = vld [vmem:[%s14379_s5 + $0xd0] sm:$0xff] }
0x35a0   :  { %v7788_v6 = vmul.f32 1.442695, %v7785_v12  ;;  %v12374_v8 = vpack.c.bf16 %v10340_v61, %v10339_v60  ;;  %v10314_v12 = vld [vmem:[%s14382_s8 + $0x20] sm:$0xff]  ;;  %v10367_v60 = vld [vmem:[%s14381_s7 + $0x78] sm:$0xff] }
0x35a1   :  { %v7786_v7 = vmul.f32 1.442695, %v7784_v5 }
0x35a2   :  { %12609 = vpow2.f32 %v7788_v6  ;;  %v10343_v6 = vld [vmem:[%s14381_s7 + $0x20] sm:$0xff] }
0x35a3   :  { %12611 = vpow2.f32 %v7786_v7  ;;  %v10344_v7 = vld [vmem:[%s14381_s7 + $0x28] sm:$0xff] }
0x35ac   :  { %v12610_v9 = vpop.eup %12609 }
0x35ad   :  { %v12612_v11 = vpop.eup %12611  ;;  %v7793_v13 = vsel %vm502_vm2, %v12610_v9, 0.0 }
0x35ae   :  { %7794 = vadd.xlane.f32.xlu1 %v7793_v13  ;;  %v7790_v15 = vsel %vm502_vm2, %v12612_v11, 0.0 }
0x35af   :  { %7791 = vadd.xlane.f32.xlu0 %v7790_v15 }
0x363b   :  { %v7795_v24 = vpop.xlane.xlu1 %7794 }
0x363c   :  { %12613 = vrcp.f32 %v7795_v24  ;;  %v7792_v58 = vpop.xlane.xlu0 %7791  ;;  %v10347_v24 = vld [vmem:[%s14381_s7 + $0x68] sm:$0xff] }
0x363d   :  { %12615 = vrcp.f32 %v7792_v58  ;;  %v12382_v58 = vpack.c.bf16 %v10347_v24, %v10346_v23  ;;  %v10374_v24 = vld [vmem:[%s14382_s8 + $0x38] sm:$0xff] }
0x3646   :  { %v12614_v18 = vpop.eup %12613 }
0x3647   :  { %v12616_v22 = vpop.eup %12615  ;;  %v7799_v21 = vmul.f32 %v12614_v18, %v12610_v9 }
0x3648   :  { %v7798_v20 = vmul.f32 %v12616_v22, %v12612_v11  ;;  %v12379_v11 = vpack.c.bf16 %v10344_v7, %v10343_v6 }
0x364a   :  { %11699 = vmatprep.mubr.msk.f32.mxu1 %vm502_vm2, %v7798_v20 }
0x364b   :  { %11700 = vmatmul.mubr.msk.f32.vlgmr.msra.gmra.mrb[78].mxu1 %vm502_vm2, %v7799_v21 }
0x364c   :  { %12366 = vmatpush3.bf16.msra.mxu1 %v12365_v25  ;;  %11717 = vmatprep.mubr.msk.f32.mxu1 %vm12705_vm0, %v12706_v1 }
0x364d   :  { %12367 = vmatprep.subr.bf16.mxu1 %v12704_v0 }
0x364f   :  { %11718 = vmatmul.mubr.msk.f32.vlgmr.msra.gmra.mrb[80].mxu1 %vm590_vm4, %v13997_v57 }
0x3650   :  { %11724 = vmatprep.mubr.msk.f32.mxu1 %vm12705_vm0, %v12706_v1  ;;  %12369 = vmatpush3.bf16.msra.mxu1 %v12368_v34 }
0x3653   :  { %11725 = vmatmul.mubr.msk.f32.vlgmr.msra.gmra.mrb[82].mxu1 %vm590_vm4, %v13997_v57 }
0x371e   :  { %v14069_v26 = vpop.f32.mrb[78].mxu1 }
0x371f   :  { %v14071_v27 = vpop.f32.mrb[79].mxu1 }
0x3722   :  { %v8029_v28 = vpop.f32.mrb[80].mxu1 }
0x3723   :  { %v11719_v29 = vpop.f32.mrb[81].mxu1  ;;  %11727 = vmatprep.subr.msk.mxu0 %vm502_vm2, %v8029_v28 }
0x3724   :  { %11728 = vmatpush3.xpose.msk.msra.mxu0 %vm502_vm2, %v8029_v28 }
0x3725   :  { %11737 = vmatprep.subr.mxu0 %v10332_v53 }
0x3726   :  { %v8101_v49 = vpop.f32.mrb[82].mxu1 }
0x3727   :  { %11730 = vmatmul.mubr.msk.f32.vlgmr.msra.gmra.mrb[84].mxu0 %vm502_vm2, %v11712_v63  ;;  %v11726_v50 = vpop.f32.mrb[83].mxu1  ;;  %11732 = vmatprep.subr.mxu1 %v8101_v49 }
0x3728   :  { %11733 = vmatpush3.msra.mxu1 %v8101_v49  ;;  %11738 = vmatpush3.msra.mxu0 %v10332_v53  ;;  %v10363_v50 = vld [vmem:[%s14381_s7 + $0x30] sm:$0xff] }
0x3729   :  { %12371 = vmatprep.subr.bf16.mxu1 %v12370_v52  ;;  %11742 = vmatprep.subr.mxu0 %v10314_v12 }
0x37fa   :  { %v11731_v35 = vpop.f32.mrb[84].mxu0 }
0x37fb   :  { %v8180_v36 = vpop.f32.mrb[85].mxu0  ;;  %v8192_v39 = vsel %vm502_vm2, %v11731_v35, -inf }
0x37fc   :  { %8193 = vmax.xlane.f32.xlu1 %v8192_v39  ;;  %v8189_v40 = vsel %vm502_vm2, %v8180_v36, -inf  ;;  %v10357_v39 = vld [vmem:[%s14379_s5 + $0xe0] sm:$0xff] }
0x37fd   :  { %8190 = vmax.xlane.f32.xlu0 %v8189_v40  ;;  %v10358_v40 = vld [vmem:[%s14379_s5 + $0xe8] sm:$0xff] }
0x3889   :  { %v8194_v37 = vpop.xlane.xlu1 %8193 }
0x388a   :  { %v8196_v41 = vsub.f32 %v11731_v35, %v8194_v37  ;;  %v8191_v42 = vpop.xlane.xlu0 %8190  ;;  %v12384_v37 = vpack.c.bf16 %v10358_v40, %v10357_v39 }
0x388b   :  { %v8195_v43 = vsub.f32 %v8180_v36, %v8191_v42 }
0x388c   :  { %v8199_v38 = vmul.f32 1.442695, %v8196_v41  ;;  %v10354_v41 = vld [vmem:[%s14382_s8 + $0x30] sm:$0xff] }
0x388d   :  { %v8197_v30 = vmul.f32 1.442695, %v8195_v43 }
0x388e   :  { %12617 = vpow2.f32 %v8199_v38 }
0x388f   :  { %12619 = vpow2.f32 %v8197_v30  ;;  %v10359_v30 = vld [vmem:[%s14379_s5 + $0xf0] sm:$0xff] }
0x3898   :  { %v12618_v44 = vpop.eup %12617 }
0x3899   :  { %v12620_v31 = vpop.eup %12619  ;;  %v8204_v46 = vsel %vm502_vm2, %v12618_v44, 0.0 }
0x389a   :  { %8205 = vadd.xlane.f32.xlu1 %v8204_v46  ;;  %v8201_v47 = vsel %vm502_vm2, %v12620_v31, 0.0 }
0x389b   :  { %8202 = vadd.xlane.f32.xlu0 %v8201_v47 }
0x3927   :  { %v8206_v2 = vpop.xlane.xlu1 %8205 }
0x3928   :  { %12621 = vrcp.f32 %v8206_v2  ;;  %v8203_v55 = vpop.xlane.xlu0 %8202 }
0x3929   :  { %12623 = vrcp.f32 %v8203_v55 }
0x3932   :  { %v12622_v48 = vpop.eup %12621 }
0x3933   :  { %v12624_v62 = vpop.eup %12623  ;;  %v8210_v10 = vmul.f32 %v12622_v48, %v12618_v44  ;;  %v10360_v44 = vld [vmem:[%s14379_s5 + $0xf8] sm:$0xff]  ;;  %v10366_v48 = vld [vmem:[%s14381_s7 + $0x70] sm:$0xff] }
0x3934   :  { %v8209_v63 = vmul.f32 %v12624_v62, %v12620_v31  ;;  %v12388_v49 = vpack.c.bf16 %v10360_v44, %v10359_v30  ;;  %v12396_v61 = vpack.c.bf16 %v10367_v60, %v10366_v48  ;;  %v9643_v48 = vld [vmem:[%s14384_s10 + $0x8] sm:$0xff]  ;;  %v10394_v60 = vld [vmem:[%s14384_s10 + $0x20] sm:$0xff] }
0x3936   :  { %11734 = vmatprep.mubr.msk.f32.mxu1 %vm502_vm2, %v8209_v63 }
0x3937   :  { %11735 = vmatmul.mubr.msk.f32.vlgmr.msra.gmra.mrb[84].mxu1 %vm502_vm2, %v8210_v10 }
0x3938   :  { %12373 = vmatpush3.bf16.msra.mxu1 %v12370_v52  ;;  %11755 = vmatprep.mubr.msk.f32.mxu1 %vm68_vm1, %v14012_v45  ;;  %v12393_v52 = vpack.c.bf16 %v10364_v51, %v10363_v50 }
0x3939   :  { %12375 = vmatprep.subr.bf16.mxu1 %v12374_v8 }
0x393c   :  { %12377 = vmatpush3.bf16.msra.mxu1 %v12374_v8 }
0x393d   :  { %12381 = vmatprep.subr.bf16.mxu1 %v12704_v0 }
0x393f   :  { %11756 = vmatmul.mubr.msk.f32.vlgmr.msra.gmra.mrb[86].mxu1 %vm68_vm1, %v14010_v14 }
0x3940   :  { %11769 = vmatprep.mubr.msk.f32.mxu1 %vm12705_vm0, %v12706_v1  ;;  %12383 = vmatpush3.bf16.msra.mxu1 %v12382_v58 }
0x3943   :  { %11770 = vmatmul.mubr.msk.f32.vlgmr.msra.gmra.mrb[88].mxu1 %vm590_vm4, %v13997_v57 }
0x3a0a   :  { %v11736_v4 = vpop.f32.mrb[84].mxu1 }
0x3a0b   :  { %v8283_v5 = vpop.f32.mrb[85].mxu1 }
0x3a0c   :  { %11739 = vmatprep.mubr.msk.f32.mxu0 %vm502_vm2, %v8283_v5 }
0x3a0d   :  { %11740 = vmatmul.mubr.msk.f32.vlgmr.msra.gmra.mrb[86].mxu0 %vm502_vm2, %v11736_v4 }
0x3a0e   :  { %11743 = vmatpush3.msra.mxu0 %v10314_v12  ;;  %11744 = vmatprep.mubr.msk.f32.mxu0 %vm502_vm2, %v14071_v27 }
0x3a0f   :  { %12378 = vmatprep.subr.bf16.mxu0 %v12704_v0 }
0x3a12   :  { %v11757_v9 = vpop.f32.mrb[86].mxu1 }
0x3a13   :  { %v8525_v13 = vpop.f32.mrb[87].mxu1 }
0x3a15   :  { %11745 = vmatmul.mubr.msk.f32.vlgmr.msra.gmra.mrb[86].mxu0 %vm502_vm2, %v14069_v26 }
0x3a16   :  { %12380 = vmatpush3.bf16.msra.mxu0 %v12379_v11  ;;  %11762 = vmatprep.mubr.msk.f32.mxu0 %vm12705_vm0, %v12706_v1  ;;  %v8674_v35 = vpop.f32.mrb[88].mxu1 }
0x3a17   :  { %v11771_v36 = vpop.f32.mrb[89].mxu1  ;;  %11777 = vmatprep.subr.mxu1 %v8674_v35 }
0x3a18   :  { %11778 = vmatpush3.msra.mxu1 %v8674_v35  ;;  %v10387_v35 = vld [vmem:[%s14377_s3 + $0xb0] sm:$0xff]  ;;  %v10388_v36 = vld [vmem:[%s14377_s3 + $0xb8] sm:$0xff] }
0x3a19   :  { %11763 = vmatmul.mubr.msk.f32.vlgmr.msra.gmra.mrb[88].mxu0 %vm590_vm4, %v13997_v57  ;;  %12385 = vmatprep.subr.bf16.mxu1 %v12384_v37  ;;  %v12408_v40 = vpack.c.bf16 %v10388_v36, %v10387_v35 }
0x3a1a   :  { %11774 = vmatprep.mubr.msk.f32.mxu0 %vm502_vm2, %v8525_v13 }
0x3aec   :  { %v8602_v15 = vpop.f32.mrb[88].mxu0 }
0x3aed   :  { %v11764_v16 = vpop.f32.mrb[89].mxu0  ;;  %11772 = vmatprep.subr.msk.mxu0 %vm502_vm2, %v8602_v15 }
0x3aee   :  { %11773 = vmatpush3.xpose.msk.msra.mxu0 %vm502_vm2, %v8602_v15 }
0x3aef   :  { %11782 = vmatprep.subr.mxu0 %v10354_v41 }
0x3af1   :  { %11775 = vmatmul.mubr.msk.f32.vlgmr.msra.gmra.mrb[90].mxu0 %vm502_vm2, %v11757_v9 }
0x3af2   :  { %11783 = vmatpush3.msra.mxu0 %v10354_v41  ;;  %v10378_v41 = vld [vmem:[%s14383_s9 + $0x1] ss:$0 sm:$0xff] }
0x3af3   :  { %12392 = vmatprep.subr.bf16.mxu0 %v12704_v0 }
0x3bc4   :  { %v11776_v17 = vpop.f32.mrb[90].mxu0 }
0x3bc5   :  { %v8753_v19 = vpop.f32.mrb[91].mxu0  ;;  %v8765_v18 = vsel %vm502_vm2, %v11776_v17, -inf }
0x3bc6   :  { %8766 = vmax.xlane.f32.xlu1 %v8765_v18  ;;  %v8762_v22 = vsel %vm502_vm2, %v8753_v19, -inf }
0x3bc7   :  { %8763 = vmax.xlane.f32.xlu0 %v8762_v22 }
0x3c53   :  { %v8767_v20 = vpop.xlane.xlu1 %8766 }
0x3c54   :  { %v8769_v25 = vsub.f32 %v11776_v17, %v8767_v20  ;;  %v8764_v21 = vpop.xlane.xlu0 %8763 }
0x3c55   :  { %v8768_v26 = vsub.f32 %v8753_v19, %v8764_v21 }
0x3c56   :  { %v8772_v27 = vmul.f32 1.442695, %v8769_v25 }
0x3c57   :  { %v8770_v28 = vmul.f32 1.442695, %v8768_v26  ;;  %v10379_v26 = vld [vmem:[%s14377_s3 + $0x80] sm:$0xff] }
0x3c58   :  { %12625 = vpow2.f32 %v8772_v27  ;;  %v10380_v27 = vld [vmem:[%s14377_s3 + $0x88] sm:$0xff] }
0x3c59   :  { %12627 = vpow2.f32 %v8770_v28  ;;  %v10385_v28 = vld [vmem:[%s14377_s3 + $0xa0] sm:$0xff] }
0x3c62   :  { %v12626_v29 = vpop.eup %12625 }
0x3c63   :  { %v12628_v32 = vpop.eup %12627  ;;  %v8777_v33 = vsel %vm502_vm2, %v12626_v29, 0.0 }
0x3c64   :  { %8778 = vadd.xlane.f32.xlu1 %v8777_v33  ;;  %v8774_v34 = vsel %vm502_vm2, %v12628_v32, 0.0  ;;  %v10382_v33 = vld [vmem:[%s14377_s3 + $0x98] sm:$0xff] }
0x3c65   :  { %8775 = vadd.xlane.f32.xlu0 %v8774_v34 }
0x3cf1   :  { %v8779_v42 = vpop.xlane.xlu1 %8778 }
0x3cf2   :  { %12629 = vrcp.f32 %v8779_v42  ;;  %v8776_v43 = vpop.xlane.xlu0 %8775 }
0x3cf3   :  { %12631 = vrcp.f32 %v8776_v43 }
0x3cfc   :  { %v12630_v38 = vpop.eup %12629 }
0x3cfd   :  { %v12632_v31 = vpop.eup %12631  ;;  %v8783_v47 = vmul.f32 %v12630_v38, %v12626_v29  ;;  %v12399_v29 = vpack.c.bf16 %v10380_v27, %v10379_v26 }
0x3cfe   :  { %v8782_v46 = vmul.f32 %v12632_v31, %v12628_v32  ;;  %v10386_v32 = vld [vmem:[%s14377_s3 + $0xa8] sm:$0xff] }
0x3cff   :  { %v12405_v34 = vpack.c.bf16 %v10386_v32, %v10385_v28 }
0x3d00   :  { %11779 = vmatprep.mubr.msk.f32.mxu1 %vm502_vm2, %v8782_v46 }
0x3d01   :  { %11780 = vmatmul.mubr.msk.f32.vlgmr.msra.gmra.mrb[90].mxu1 %vm502_vm2, %v8783_v47 }
0x3d02   :  { %12387 = vmatpush3.bf16.msra.mxu1 %v12384_v37  ;;  %11795 = vmatprep.mubr.msk.f32.mxu1 %vm68_vm1, %v14012_v45  ;;  %v12652_v37 = vld [vmem:[%s14375_s1 + $0x1] sm:$0x1] }
0x3d03   :  { %12389 = vmatprep.subr.bf16.mxu1 %v12388_v49 }
0x3d06   :  { %12391 = vmatpush3.bf16.msra.mxu1 %v12388_v49 }
0x3d09   :  { %11796 = vmatmul.mubr.msk.f32.vlgmr.msra.gmra.mrb[92].mxu1 %vm68_vm1, %v14010_v14 }
0x3dd4   :  { %v11781_v3 = vpop.f32.mrb[90].mxu1 }
0x3dd5   :  { %v8856_v53 = vpop.f32.mrb[91].mxu1 }
0x3dd6   :  { %11784 = vmatprep.mubr.msk.f32.mxu0 %vm502_vm2, %v8856_v53 }
0x3dd7   :  { %11785 = vmatmul.mubr.msk.f32.vlgmr.msra.gmra.mrb[86].mxu0 %vm502_vm2, %v11781_v3 }
0x3dd8   :  { %12394 = vmatpush3.bf16.msra.mxu0 %v12393_v52  ;;  %11802 = vmatprep.mubr.msk.f32.mxu0 %vm12705_vm0, %v12706_v1 }
0x3dd9   :  { %12395 = vmatprep.subr.bf16.mxu0 %v12704_v0 }
0x3ddb   :  { %11803 = vmatmul.mubr.msk.f32.vlgmr.msra.gmra.mrb[92].mxu0 %vm590_vm4, %v13997_v57 }
0x3ddc   :  { %v11797_v14 = vpop.f32.mrb[92].mxu1  ;;  %11809 = vmatprep.mubr.msk.f32.mxu0 %vm12705_vm0, %v12706_v1  ;;  %12397 = vmatpush3.bf16.msra.mxu0 %v12396_v61 }
0x3ddd   :  { %v9019_v45 = vpop.f32.mrb[93].mxu1 }
0x3dde   :  { %11814 = vmatprep.mubr.msk.f32.mxu1 %vm502_vm2, %v9019_v45 }
0x3ddf   :  { %11810 = vmatmul.mubr.msk.f32.vlgmr.msra.gmra.mrb[94].mxu0 %vm590_vm4, %v13997_v57 }
0x3eae   :  { %v9096_v2 = vpop.f32.mrb[92].mxu0 }
0x3eaf   :  { %v11804_v55 = vpop.f32.mrb[93].mxu0  ;;  %11812 = vmatprep.subr.msk.mxu1 %vm502_vm2, %v9096_v2 }
0x3eb0   :  { %11813 = vmatpush3.xpose.msk.msra.mxu1 %vm502_vm2, %v9096_v2  ;;  %v9642_v55 = vld [vmem:[%s14384_s10] sm:$0xff] }
0x3eb1   :  { %12398 = vmatprep.subr.bf16.mxu1 %v12704_v0  ;;  %v12410_v61 = vpack.c.bf16 %v9643_v48, %v9642_v55 }
0x3eb2   :  { %v9168_v16 = vpop.f32.mrb[94].mxu0 }
0x3eb3   :  { %11815 = vmatmul.mubr.msk.f32.vlgmr.msra.gmra.mrb[94].mxu1 %vm502_vm2, %v11797_v14  ;;  %v11811_v23 = vpop.f32.mrb[95].mxu0  ;;  %11817 = vmatprep.subr.mxu0 %v9168_v16 }
0x3eb4   :  { %11835 = vmatprep.mubr.msk.f32.mxu1 %vm12705_vm0, %v12706_v1  ;;  %11818 = vmatpush3.msra.mxu0 %v9168_v16 }
0x3eb5   :  { %11822 = vmatprep.subr.mxu0 %v10374_v24  ;;  %12400 = vmatpush3.bf16.msra.mxu1 %v12399_v29 }
0x3eb6   :  { %12401 = vmatprep.subr.bf16.mxu1 %v12704_v0 }
0x3f86   :  { %v11816_v62 = vpop.f32.mrb[94].mxu1 }
0x3f87   :  { %v9247_v63 = vpop.f32.mrb[95].mxu1  ;;  %v9259_v10 = vsel %vm502_vm2, %v11816_v62, -inf }
0x3f88   :  { %9260 = vmax.xlane.f32.xlu1 %v9259_v10  ;;  %v9256_v8 = vsel %vm502_vm2, %v9247_v63, -inf }
0x3f89   :  { %9257 = vmax.xlane.f32.xlu0 %v9256_v8 }
0x4015   :  { %v9261_v12 = vpop.xlane.xlu1 %9260 }
0x4016   :  { %v9263_v4 = vsub.f32 %v11816_v62, %v9261_v12  ;;  %v9258_v5 = vpop.xlane.xlu0 %9257  ;;  %v10395_v62 = vld [vmem:[%s14384_s10 + $0x28] sm:$0xff]  ;;  %v9644_v12 = vld [vmem:[%s14384_s10 + $0x10] sm:$0xff] }
0x4017   :  { %v9262_v6 = vsub.f32 %v9247_v63, %v9258_v5  ;;  %v12418_v10 = vpack.c.bf16 %v10395_v62, %v10394_v60  ;;  %v10396_v5 = vld [vmem:[%s14384_s10 + $0x30] sm:$0xff] }
0x4018   :  { %v9266_v7 = vmul.f32 1.442695, %v9263_v4  ;;  %v9645_v4 = vld [vmem:[%s14384_s10 + $0x18] sm:$0xff] }
0x4019   :  { %v9264_v9 = vmul.f32 1.442695, %v9262_v6  ;;  %v12414_v6 = vpack.c.bf16 %v9645_v4, %v9644_v12 }
0x401a   :  { %12633 = vpow2.f32 %v9266_v7  ;;  %v10397_v7 = vld [vmem:[%s14384_s10 + $0x38] sm:$0xff] }
0x401b   :  { %12635 = vpow2.f32 %v9264_v9  ;;  %v12422_v9 = vpack.c.bf16 %v10397_v7, %v10396_v5 }
0x4024   :  { %v12634_v11 = vpop.eup %12633 }
0x4025   :  { %v12636_v13 = vpop.eup %12635  ;;  %v9271_v57 = vsel %vm502_vm2, %v12634_v11, 0.0 }
0x4026   :  { %9272 = vadd.xlane.f32.xlu1 %v9271_v57  ;;  %v9268_v15 = vsel %vm502_vm2, %v12636_v13, 0.0 }
0x4027   :  { %9269 = vadd.xlane.f32.xlu0 %v9268_v15 }
0x40b3   :  { %v9273_v58 = vpop.xlane.xlu1 %9272 }
0x40b4   :  { %12637 = vrcp.f32 %v9273_v58  ;;  %v9270_v17 = vpop.xlane.xlu0 %9269 }
0x40b5   :  { %12639 = vrcp.f32 %v9270_v17 }
0x40be   :  { %v12638_v19 = vpop.eup %12637 }
0x40bf   :  { %v12640_v18 = vpop.eup %12639  ;;  %v9277_v20 = vmul.f32 %v12638_v19, %v12634_v11  ;;  %v9832_v11 = vld [vmem:[%s14386_s12] sm:$0xff] }
0x40c0   :  { %v9276_v22 = vmul.f32 %v12640_v18, %v12636_v13  ;;  %v9833_v13 = vld [vmem:[%s14386_s12 + $0x8] sm:$0xff]  ;;  %v10383_v19 = vld [vmem:[%s14378_s4 + $0x4] sm:$0x1]  ;;  %v10389_v18 = vld [vmem:[%s14378_s4 + $0x5] sm:$0x1] }
0x40c1   :  { %v12426_v57 = vpack.c.bf16 %v9833_v13, %v9832_v11 }
0x40c2   :  { %11819 = vmatprep.mubr.msk.f32.mxu0 %vm502_vm2, %v9276_v22 }
0x40c3   :  { %11820 = vmatmul.mubr.msk.f32.vlgmr.msra.gmra.mrb[96].mxu0 %vm502_vm2, %v9277_v20 }
0x40c4   :  { %11823 = vmatpush3.msra.mxu0 %v10374_v24 }
0x40c5   :  { %12404 = vmatprep.subr.bf16.mxu0 %v12704_v0 }
0x4196   :  { %v11821_v25 = vpop.f32.mrb[96].mxu0 }
0x4197   :  { %v9350_v21 = vpop.f32.mrb[97].mxu0 }
0x4198   :  { %11824 = vmatprep.mubr.msk.f32.mxu0 %vm502_vm2, %v9350_v21 }
0x4199   :  { %11825 = vmatmul.mubr.msk.f32.vlgmr.msra.gmra.mrb[86].mxu0 %vm502_vm2, %v11821_v25 }
0x419a   :  { %11846 = vmatprep.mubr.msk.f32.mxu0 %vm12705_vm0, %v12706_v1  ;;  %v10381_v1 = vld [vmem:[%s14377_s3 + $0x90] sm:$0xff]  ;;  %12406 = vmatpush3.bf16.msra.mxu0 %v12405_v34  ;;  %v9835_v34 = vld [vmem:[%s14386_s12 + $0x18] sm:$0xff] }
0x419b   :  { %v12402_v39 = vpack.c.bf16 %v10382_v33, %v10381_v1  ;;  %12407 = vmatprep.subr.bf16.mxu0 %v12704_v0  ;;  %v9834_v33 = vld [vmem:[%s14386_s12 + $0x10] sm:$0xff] }
0x419d   :  { %12403 = vmatpush3.bf16.msra.mxu1 %v12402_v39  ;;  %v12430_v39 = vpack.c.bf16 %v9835_v34, %v9834_v33 }
0x419e   :  { %12409 = vmatpush3.bf16.msra.mxu0 %v12408_v40  ;;  %12411 = vmatprep.subr.bf16.mxu1 %v12410_v61  ;;  %v9837_v40 = vld [vmem:[%s14386_s12 + $0x28] sm:$0xff] }
0x419f   :  { %12419 = vmatprep.subr.bf16.mxu0 %v12418_v10 }
0x41a0   :  { %11836 = vmatmul.mubr.msk.f32.vlgmr.msra.gmra.mrb[96].mxu1 %vm68_vm1, %v12652_v37 }
0x41a1   :  { %11847 = vmatmul.mubr.msk.f32.vlgmr.msra.gmra.mrb[98].mxu0 %vm68_vm1, %v12652_v37  ;;  %12413 = vmatpush3.bf16.msra.mxu1 %v12410_v61 }
0x41a2   :  { %12421 = vmatpush3.bf16.msra.mxu0 %v12418_v10  ;;  %12415 = vmatprep.subr.bf16.mxu1 %v12414_v6  ;;  %v10391_v10 = vld [vmem:[%s14385_s11] ss:$0 sm:$0xff] }
0x41a3   :  { %12423 = vmatprep.subr.bf16.mxu0 %v12422_v9 }
0x41a5   :  { %12417 = vmatpush3.bf16.msra.mxu1 %v12414_v6 }
0x41a6   :  { %12425 = vmatpush3.bf16.msra.mxu0 %v12422_v9  ;;  %12427 = vmatprep.subr.bf16.mxu1 %v12426_v57 }
0x426c   :  { %v11826_v42 = vpop.f32.mrb[86].mxu0 }
0x426d   :  { %v9451_v43 = vadd.f32 %v11826_v42, %v10378_v41  ;;  %v9432_v38 = vpop.f32.mrb[87].mxu0  ;;  %v9839_v42 = vld [vmem:[%s14386_s12 + $0x38] sm:$0xff] }
0x426e   :  { %v9450_v30 = vadd.f32 %v10378_v41, %v9432_v38  ;;  %v9838_v41 = vld [vmem:[%s14386_s12 + $0x30] sm:$0xff]  ;;  %v9840_v38 = vld [vmem:[%s14386_s12 + $0x40] sm:$0xff] }
0x426f   :  { %v14249_v0 = vadd.f32 %v9451_v43, %v13964_v54  ;;  %v12438_v43 = vpack.c.bf16 %v9839_v42, %v9838_v41 }
0x4270   :  { %v14252_v44 = vadd.f32 %v9450_v30, %v13966_v56  ;;  %v9841_v30 = vld [vmem:[%s14386_s12 + $0x48] sm:$0xff] }
0x4271   :  { %v9607_v31 = vsel %vm68_vm1, %v14249_v0, 0.0 }
0x4272   :  { %9608 = vadd.xlane.f32.xlu1 %v9607_v31  ;;  %v9604_v46 = vsel %vm68_vm1, %v14252_v44, 0.0  ;;  %v12442_v31 = vpack.c.bf16 %v9841_v30, %v9840_v38 }
0x4273   :  { %9605 = vadd.xlane.f32.xlu0 %v9604_v46  ;;  %v9525_v45 = vpop.f32.mrb[96].mxu1  ;;  %v9842_v46 = vld [vmem:[%s14386_s12 + $0x50] sm:$0xff] }
0x4274   :  { %v11837_v2 = vpop.f32.mrb[97].mxu1  ;;  %v9600_v63 = vpop.f32.mrb[98].mxu0  ;;  %v9526_v22 = vadd.f32 %v10383_v19, %v9525_v45 }
0x4275   :  { %v11848_v8 = vpop.f32.mrb[99].mxu0  ;;  %v9601_v20 = vadd.f32 %v10389_v18, %v9600_v63 }
0x4276   :  { %v9633_v25 = vrot.slane %v9526_v22, %v12882_v59 }
0x4277   :  { %v9639_v28 = vrot.slane %v9601_v20, %v12882_v59  ;;  %v9836_v59 = vld [vmem:[%s14386_s12 + $0x20] sm:$0xff] }
0x4278   :  { %v12434_v37 = vpack.c.bf16 %v9837_v40, %v9836_v59 }
0x42ff   :  { %v9609_v47 = vpop.xlane.xlu1 %9608 }
0x4300   :  { %v9611_v49 = vmul.f32 0.03125, %v9609_v47  ;;  %v9606_v50 = vpop.xlane.xlu0 %9605  ;;  %v9843_v47 = vld [vmem:[%s14386_s12 + $0x58] sm:$0xff] }
0x4301   :  { %v9610_v51 = vmul.f32 0.03125, %v9606_v50  ;;  %v9844_v50 = vld [vmem:[%s14386_s12 + $0x60] sm:$0xff] }
0x4302   :  { %v9613_v3 = vsub.f32 %v14249_v0, %v9611_v49  ;;  %v12446_v49 = vpack.c.bf16 %v9843_v47, %v9842_v46 }
0x4303   :  { %v9612_v54 = vsub.f32 %v14252_v44, %v9610_v51  ;;  %v9845_v51 = vld [vmem:[%s14386_s12 + $0x68] sm:$0xff] }
0x4304   :  { %v9615_v52 = vmul.f32 %v9613_v3, %v9613_v3 }
0x4305   :  { %v9614_v53 = vmul.f32 %v9612_v54, %v9612_v54 }
0x4306   :  { %v9619_v56 = vsel %vm68_vm1, %v9615_v52, 0.0  ;;  %v9847_v52 = vld [vmem:[%s14386_s12 + $0x78] sm:$0xff] }
0x4307   :  { %9620 = vadd.xlane.f32.xlu1 %v9619_v56  ;;  %v9616_v14 = vsel %vm68_vm1, %v9614_v53, 0.0  ;;  %v10399_v56 = vld [vmem:[%s14385_s11 + $0x1] ss:$0 sm:$0xff]  ;;  %s12707_s11 = smov [#allocation5]  }
0x4308   :  { %9617 = vadd.xlane.f32.xlu0 %v9616_v14  ;;  %s9942_s23 = sshll.u32 %s12707_s11, 4  ;;  %s9943_s23 = int_to_ptr.vmem [resolvable:$true] %s9942_s23 }
0x4309   :  { %s12675_s0 = scalar_lea.vmem %s9943_s23, 512  ;;  %p12680_p9 = scmp.lt.s32.totalorder %s9943_s23, %s9943_s23 }
0x430a   :  { %p12676_p8 = scmp.ne.s32.totalorder %s9943_s23, %s12675_s0  ;;  %p12681_p10 = scmp.lt.s32.totalorder %s12675_s0, %s12675_s0 }
0x430c   :  { %p12682_p11 = por %p12681_p10, %p12680_p9 }
0x430e   :  { %p12683_p12 = pnand %p12682_p11, %p12676_p8 }
0x4394   :  { %v9621_v15 = vpop.xlane.xlu1 %9620 }
0x4395   :  { %v9623_v16 = vmul.f32 0.03125, %v9621_v15  ;;  %v9618_v23 = vpop.xlane.xlu0 %9617 }
0x4396   :  { %v9622_v24 = vmul.f32 0.03125, %v9618_v23  ;;  %v10403_v23 = vld [vmem:[%s14383_s9 + $0x2] ss:$0 sm:$0xff] }
0x4397   :  { %v9625_v58 = vadd.f32 1e-05, %v9623_v16 }
0x4398   :  { %v9624_v17 = vadd.f32 1e-05, %v9622_v24 }
0x4399   :  { %12641 = vrsqrt.f32 %v9625_v58 }
0x439a   :  { %12643 = vrsqrt.f32 %v9624_v17 }
0x43a3   :  { %v12642_v21 = vpop.eup %12641 }
0x43a4   :  { %v12644_v26 = vpop.eup %12643  ;;  %v9629_v27 = vmul.f32 %v12642_v21, %v9613_v3  ;;  %v12450_v3 = vpack.c.bf16 %v9845_v51, %v9844_v50 }
0x43a5   :  { %v9628_v29 = vmul.f32 %v12644_v26, %v9612_v54  ;;  %v9846_v54 = vld [vmem:[%s14386_s12 + $0x70] sm:$0xff] }
0x43a6   :  { %v9635_v32 = vmul.f32 %v9633_v25, %v9629_v27  ;;  %v12454_v53 = vpack.c.bf16 %v9847_v52, %v9846_v54 }
0x43a7   :  { %v9634_v1 = vmul.f32 %v9633_v25, %v9628_v29 }
0x43a8   :  { %v9641_v35 = vadd.f32 %v9639_v28, %v9635_v32 }
0x43a9   :  { %v9640_v36 = vadd.f32 %v9639_v28, %v9634_v1 }
0x43ab   :  { %11857 = vmatprep.mubr.msk.f32.mxu1 %vm68_vm1, %v9640_v36  ;;  %11868 = vmatprep.mubr.msk.f32.mxu0 %vm68_vm1, %v9640_v36 }
0x43ac   :  { %11858 = vmatmul.mubr.msk.f32.vlgmr.msra.gmra.mrb[98].mxu1 %vm68_vm1, %v9641_v35  ;;  %11869 = vmatmul.mubr.msk.f32.vlgmr.msra.gmra.mrb[100].mxu0 %vm68_vm1, %v9641_v35 }
0x43ad   :  { %12429 = vmatpush3.bf16.msra.mxu1 %v12426_v57 }
0x43ae   :  { %12431 = vmatprep.subr.bf16.mxu1 %v12430_v39 }
0x43b1   :  { %12433 = vmatpush3.bf16.msra.mxu1 %v12430_v39 }
0x43b2   :  { %12435 = vmatprep.subr.bf16.mxu1 %v12434_v37 }
0x43b5   :  { %12437 = vmatpush3.bf16.msra.mxu1 %v12434_v37 }
0x43b6   :  { %12439 = vmatprep.subr.bf16.mxu1 %v12438_v43 }
0x43b9   :  { %12441 = vmatpush3.bf16.msra.mxu1 %v12438_v43 }
0x43ba   :  { %12443 = vmatprep.subr.bf16.mxu1 %v12442_v31 }
0x43bd   :  { %12445 = vmatpush3.bf16.msra.mxu1 %v12442_v31 }
0x43be   :  { %12447 = vmatprep.subr.bf16.mxu1 %v12446_v49 }
0x43c1   :  { %12449 = vmatpush3.bf16.msra.mxu1 %v12446_v49 }
0x43c2   :  { %12451 = vmatprep.subr.bf16.mxu1 %v12450_v3 }
0x43c5   :  { %12453 = vmatpush3.bf16.msra.mxu1 %v12450_v3 }
0x43c6   :  { %12455 = vmatprep.subr.bf16.mxu1 %v12454_v53 }
0x43c9   :  { %12457 = vmatpush3.bf16.msra.mxu1 %v12454_v53 }
0x447f   :  { %v11859_v14 = vpop.f32.mrb[98].mxu1  ;;  %v11870_v45 = vpop.f32.mrb[100].mxu0 }
0x4480   :  { %v9817_v2 = vadd.f32 %v11870_v45, %v10399_v56  ;;  %v9725_v55 = vpop.f32.mrb[99].mxu1  ;;  %v9811_v48 = vpop.f32.mrb[101].mxu0  ;;  %v9731_v7 = vadd.f32 %v11859_v14, %v10391_v10 }
0x4481   :  { %v9812_v60 = vadd.f32 %v10399_v56, %v9811_v48  ;;  %v9726_v11 = vadd.f32 %v10391_v10, %v9725_v55 }
0x4482   :  { %v9823_v61 = vmul.f32 0.70710677, %v9817_v2  ;;  %v9821_v12 = vmul.f32 0.5, %v9817_v2 }
0x4483   :  { %v9822_v62 = vmul.f32 0.70710677, %v9812_v60  ;;  %v9820_v5 = vmul.f32 0.5, %v9812_v60 }
0x4484   :  { %12645 = verf.f32 %v9823_v61 }
0x4485   :  { %12647 = verf.f32 %v9822_v62 }
0x448e   :  { %v12646_v63 = vpop.eup %12645 }
0x448f   :  { %v12648_v8 = vpop.eup %12647  ;;  %v9827_v4 = vadd.f32 1.0, %v12646_v63 }
0x4490   :  { %v9826_v6 = vadd.f32 1.0, %v12648_v8 }
0x4491   :  { %v9829_v9 = vmul.f32 %v9827_v4, %v9821_v12 }
0x4492   :  { %v9828_v13 = vmul.f32 %v9826_v6, %v9820_v5 }
0x4493   :  { %v9831_v57 = vmul.f32 %v9829_v9, %v9731_v7 }
0x4494   :  { %v9830_v15 = vmul.f32 %v9828_v13, %v9726_v11 }
0x4496   :  { %11903 = vmatprep.mubr.f32.mxu1 %v9830_v15 }
0x4497   :  { %11904 = vmatmul.mubr.f32.vlgmr.msra.gmra.mrb[100].mxu1 %v9831_v57 }
0x456a   :  { %v11905_v16 = vpop.f32.mrb[100].mxu1 }
0x456b   :  { %v9924_v24 = vadd.f32 %v11905_v16, %v14249_v0  ;;  %v9914_v58 = vpop.f32.mrb[101].mxu1 }
0x456c   :  { %v9923_v17 = vadd.f32 %v9914_v58, %v14252_v44 }
0x456d   :  { %v9933_v19 = vadd.f32 %v10403_v23, %v9924_v24 }
0x456e   :  { %v9932_v18 = vadd.f32 %v10403_v23, %v9923_v17 }
0x456f   :  { %9936 = vst.msk [vmem:[#allocation5 + $0x18] sm:$0xff] %vm68_vm1, %v9933_v19 }
0x4570   :  { %9935 = vst.msk [vmem:[#allocation5 + $0x10] sm:$0xff] %vm68_vm1, %v9932_v18 }
0x4571   :  { %12686 = shalt.err (!%p12683_p12)
}
0x4572   :  { %s12687_s25 = scalar_lea.hbm %s14387_s13, 512 }
0x4573   :  { %p12688_p13 = scmp.ne.s32.totalorder %s14387_s13, %s12687_s25  ;;  %p12691_p0 = scmp.lt.u32.totalorder %s12687_s25, %s14387_s13 }
0x4575   :  { %p12693_p1 = pnand %p12691_p0, %p12688_p13 }
0x4577   :  { %12696 = shalt.err (!%p12693_p1)
}
0x4578   :  { %9948 = dma.vmem_to_hbm [thread:$0]  %s9943_s23, 512, %s14387_s13, [#allocation4], %s12702_s18, %s12702_s18, %s12703_s19  }
0x4579   :  { %12699 = dma.done.wait [#allocation4], 512  }
0x457a   :  { %12700 = vsyncadd [#allocation4], 4294966784 }
0x457b   :  { %9952 = vsyncpa [#allocation3], 1 }
0x457c   :  { %9953 = vsyncpa [#allocation4], 1 }

</bundles_post_ra>
